<compile_context>
chip_gen: v5e
topology: v5e:2x2
jax: 0.10.0
libtpu: 0.0.40
codegen_flags: <defaults>
</compile_context>

<pallas_src>
import math

import jax
import jax.numpy as jnp
from jax.experimental import pallas as pl
from jax.experimental.pallas import tpu as pltpu

DATA_SIZE = (1, 32, 32)
DATA_DIM = 1 * 32 * 32          # 1024
HIDDEN_DIM = 512
ETA = 1e-6                      # Constants.eta in the bivae codebase


def dec_kernel(z_ref, w1_ref, b1_ref, w2_ref, b2_ref, out_ref):
    # Hidden layer: Linear(latent -> 512) + ReLU.  bf16 operands, f32 accumulate (MXU).
    h = jnp.dot(z_ref[...], w1_ref[...], preferred_element_type=jnp.float32)
    h = jnp.maximum(h + b1_ref[...], 0.0)
    # Output layer: Linear(512 -> 1024).  Cast activations to bf16 for the native MXU path.
    p = jnp.dot(h.astype(jnp.bfloat16), w2_ref[...], preferred_element_type=jnp.float32)
    p = p + b2_ref[...]
    # Sigmoid + clamp tail: hidden under the f32 output write (kernel is HBM-write bound).
    d = jax.nn.sigmoid(p)
    out_ref[...] = jnp.clip(d, ETA, 1.0 - ETA).astype(out_ref.dtype)


def _round_up(x, m):
    return (x + m - 1) // m * m


def _pick_block_b(B, block_b):
    """Batch tile: multiple of 8 sublanes, >= 2 grid steps when possible, <= 512."""
    if block_b is not None:
        return max(8, min(_round_up(block_b, 8), _round_up(B, 8)))
    # Default: split the batch into at least 2 tiles (v7x megacore + DMA pipelining),
    # but never exceed 512 rows per tile (keeps per-step VMEM bounded for any B).
    tb = _round_up(pl.cdiv(B, 2), 8)
    return max(8, min(tb, 512))


def dec_forward(z, w1, b1, w2, b2, *, block_b=None):
    """z: (B, latent_dim) -> (d: (B, 1, 32, 32) float32, scale: scalar 0.75).

    Weights are stored (in_features, out_features): the kernel computes x @ W + b,
    equivalent to PyTorch's x @ W.T with W of shape (out, in).  Pass the weights
    pre-cast to bf16 (init_params does this) so no per-call cast traffic occurs.
    """
    B, latent_dim = z.shape
    TB = _pick_block_b(B, block_b)
    num_tiles = pl.cdiv(B, TB)

    # No-ops when the caller already stores bf16 weights / f32 biases.
    z_bf = jnp.asarray(z, jnp.bfloat16)
    w1_bf = jnp.asarray(w1, jnp.bfloat16)
    w2_bf = jnp.asarray(w2, jnp.bfloat16)
    b1_f = jnp.asarray(b1, jnp.float32).reshape(1, HIDDEN_DIM)
    b2_f = jnp.asarray(b2, jnp.float32).reshape(1, DATA_DIM)

    out = pl.pallas_call(
        dec_kernel,
        out_shape=jax.ShapeDtypeStruct((B, DATA_DIM), jnp.float32),
        grid_spec=pltpu.PrefetchScalarGridSpec(
            num_scalar_prefetch=0,
            grid=(num_tiles,),
            in_specs=[
                # z: tiled along batch (ragged last block handled by Pallas masking).
                pl.BlockSpec((TB, latent_dim), lambda i: (i, 0)),
                # Weights / biases: constant index_map -> fetched once, VMEM-resident.
                pl.BlockSpec((latent_dim, HIDDEN_DIM), lambda i: (0, 0)),
                pl.BlockSpec((1, HIDDEN_DIM), lambda i: (0, 0)),
                pl.BlockSpec((HIDDEN_DIM, DATA_DIM), lambda i: (0, 0)),
                pl.BlockSpec((1, DATA_DIM), lambda i: (0, 0)),
            ],
            out_specs=pl.BlockSpec((TB, DATA_DIM), lambda i: (i, 0)),
        ),
        compiler_params=pltpu.CompilerParams(
            # Batch tiles are independent -> megacore sharding on v7x.
            dimension_semantics=("parallel",),
            vmem_limit_bytes=32 << 20,
        ),
    )(z_bf, w1_bf, b1_f, w2_bf, b2_f)

    d = out.reshape(B, *DATA_SIZE)          # NCHW view done in the wrapper (metadata only)
    return d, jnp.asarray(0.75, dtype=jnp.float32)


def init_params(key, latent_dim):
    """PyTorch-style init: U(-1/sqrt(fan_in), 1/sqrt(fan_in)).

    Weights are cast to bf16 ONCE here (perf: avoids a per-forward wrapper cast
    that would add ~3 MiB of extra HBM traffic per call); biases stay f32.
    """
    k1, k2, k3, k4 = jax.random.split(key, 4)
    bound1 = 1.0 / math.sqrt(latent_dim)
    bound2 = 1.0 / math.sqrt(HIDDEN_DIM)
    # Stored (in_features, out_features) so the kernel does x @ W.
    w1 = jax.random.uniform(k1, (latent_dim, HIDDEN_DIM), jnp.float32, -bound1, bound1)
    b1 = jax.random.uniform(k2, (1, HIDDEN_DIM), jnp.float32, -bound1, bound1)
    w2 = jax.random.uniform(k3, (HIDDEN_DIM, DATA_DIM), jnp.float32, -bound2, bound2)
    b2 = jax.random.uniform(k4, (1, DATA_DIM), jnp.float32, -bound2, bound2)
    return w1.astype(jnp.bfloat16), b1, w2.astype(jnp.bfloat16), b2


def _reference(z, w1, b1, w2, b2):
    """Pure-JAX reference with the same bf16 weight/activation casts as the kernel."""
    zb = z.astype(jnp.bfloat16)
    w1b = jnp.asarray(w1, jnp.bfloat16)
    w2b = jnp.asarray(w2, jnp.bfloat16)
    h = jnp.maximum(jnp.dot(zb, w1b, preferred_element_type=jnp.float32)
                    + jnp.asarray(b1, jnp.float32), 0.0)
    p = (jnp.dot(h.astype(jnp.bfloat16), w2b, preferred_element_type=jnp.float32)
         + jnp.asarray(b2, jnp.float32))
    return jnp.clip(jax.nn.sigmoid(p), ETA, 1.0 - ETA).reshape(z.shape[0], *DATA_SIZE)


if __name__ == "__main__":
    key = jax.random.PRNGKey(0)
    kz, kz2, kp = jax.random.split(key, 3)

    latent_dim = 16
    w1, b1, w2, b2 = init_params(kp, latent_dim)

    fwd = jax.jit(dec_forward, static_argnames=("block_b",))

    # Case 1: B divides the tile; default heuristic picks TB=32 -> 2 grid steps
    # (exercises the pipelined / megacore-parallel batch axis).
    B = 64
    z = jax.random.normal(kz, (B, latent_dim), dtype=jnp.float32)
    d, scale = fwd(z, w1, b1, w2, b2)
    d = jax.block_until_ready(d)
    scale = jax.block_until_ready(scale)

    d_ref = _reference(z, w1, b1, w2, b2)
    assert d.shape == (B, 1, 32, 32), d.shape
    assert bool(jnp.all(jnp.isfinite(d)))
    assert jnp.allclose(d, d_ref, atol=5e-3, rtol=0.0), float(jnp.max(jnp.abs(d - d_ref)))
    assert float(scale) == 0.75

    # Case 2: non-multiple batch exercises the ragged (masked) last block path
    # with an explicitly chosen tile size.
    B2 = 20
    z2 = jax.random.normal(kz2, (B2, latent_dim), dtype=jnp.float32)
    d2, _ = fwd(z2, w1, b1, w2, b2, block_b=16)
    d2 = jax.block_until_ready(d2)
    d2_ref = _reference(z2, w1, b1, w2, b2)
    assert d2.shape == (B2, 1, 32, 32), d2.shape
    assert bool(jnp.all(jnp.isfinite(d2)))
    assert jnp.allclose(d2, d2_ref, atol=5e-3, rtol=0.0), float(jnp.max(jnp.abs(d2 - d2_ref)))

    print("KERNEL_OK")
</pallas_src>

<mosaic_0001>
module attributes {stable_mosaic.version = 11 : i64} {
  func.func @dec_kernel(%arg0: i32, %arg1: memref<32x16xbf16, #tpu.memory_space<vmem>>, %arg2: memref<16x512xbf16, #tpu.memory_space<vmem>>, %arg3: memref<1x512xf32, #tpu.memory_space<vmem>>, %arg4: memref<512x1024xbf16, #tpu.memory_space<vmem>>, %arg5: memref<1x1024xf32, #tpu.memory_space<vmem>>, %arg6: memref<32x1024xf32, #tpu.memory_space<vmem>>) attributes {dimension_semantics = [#tpu.dimension_semantics<parallel>], iteration_bounds = array<i64: 2>, scalar_prefetch = 0 : i64, scratch_operands = 0 : i64, tpu.core_type = #tpu.core_type<tc>, window_params = [{transform_indices = @transform_0, window_bounds = array<i64: 32, 16>}, {pipeline_mode = #tpu.pipeline_mode<synchronous>, transform_indices = @transform_1, window_bounds = array<i64: 16, 512>}, {pipeline_mode = #tpu.pipeline_mode<synchronous>, transform_indices = @transform_2, window_bounds = array<i64: 1, 512>}, {pipeline_mode = #tpu.pipeline_mode<synchronous>, transform_indices = @transform_3, window_bounds = array<i64: 512, 1024>}, {pipeline_mode = #tpu.pipeline_mode<synchronous>, transform_indices = @transform_4, window_bounds = array<i64: 1, 1024>}, {transform_indices = @transform_5, window_bounds = array<i64: 32, 1024>}]} {
    %c0 = arith.constant 0 : index
    %c0_0 = arith.constant 0 : index
    %0 = vector.load %arg1[%c0, %c0_0] : memref<32x16xbf16, #tpu.memory_space<vmem>>, vector<32x16xbf16>
    %c0_1 = arith.constant 0 : index
    %c0_2 = arith.constant 0 : index
    %1 = vector.load %arg2[%c0_1, %c0_2] : memref<16x512xbf16, #tpu.memory_space<vmem>>, vector<16x512xbf16>
    %cst = arith.constant dense<0.000000e+00> : vector<32x512xf32>
    %2 = tpu.matmul %0, %1, %cst {dimension_numbers = #tpu.dot_dimension_numbers<[1], [0], [0], [1], [0, 0, 1, 1], [], []>} : vector<32x16xbf16>, vector<16x512xbf16>, vector<32x512xf32> -> vector<32x512xf32>
    %c0_3 = arith.constant 0 : index
    %c0_4 = arith.constant 0 : index
    %3 = vector.load %arg3[%c0_3, %c0_4] : memref<1x512xf32, #tpu.memory_space<vmem>>, vector<1x512xf32>
    %4 = vector.broadcast %3 : vector<1x512xf32> to vector<32x512xf32>
    %5 = arith.addf %2, %4 : vector<32x512xf32>
    %cst_5 = arith.constant 0.000000e+00 : f32
    %6 = vector.broadcast %cst_5 : f32 to vector<32x512xf32>
    %7 = arith.maximumf %5, %6 : vector<32x512xf32>
    %8 = arith.truncf %7 : vector<32x512xf32> to vector<32x512xbf16>
    %c0_6 = arith.constant 0 : index
    %c0_7 = arith.constant 0 : index
    %9 = vector.load %arg4[%c0_6, %c0_7] : memref<512x1024xbf16, #tpu.memory_space<vmem>>, vector<512x1024xbf16>
    %cst_8 = arith.constant dense<0.000000e+00> : vector<32x1024xf32>
    %10 = tpu.matmul %8, %9, %cst_8 {dimension_numbers = #tpu.dot_dimension_numbers<[1], [0], [0], [1], [0, 0, 1, 1], [], []>} : vector<32x512xbf16>, vector<512x1024xbf16>, vector<32x1024xf32> -> vector<32x1024xf32>
    %c0_9 = arith.constant 0 : index
    %c0_10 = arith.constant 0 : index
    %11 = vector.load %arg5[%c0_9, %c0_10] : memref<1x1024xf32, #tpu.memory_space<vmem>>, vector<1x1024xf32>
    %12 = vector.broadcast %11 : vector<1x1024xf32> to vector<32x1024xf32>
    %13 = arith.addf %10, %12 : vector<32x1024xf32>
    %14 = arith.negf %13 : vector<32x1024xf32>
    %15 = math.exp %14 : vector<32x1024xf32>
    %cst_11 = arith.constant 1.000000e+00 : f32
    %16 = vector.broadcast %cst_11 : f32 to vector<32x1024xf32>
    %17 = arith.addf %16, %15 : vector<32x1024xf32>
    %18 = arith.divf %16, %17 : vector<32x1024xf32>
    %cst_12 = arith.constant 9.99999997E-7 : f32
    %cst_13 = arith.constant 0.999998986 : f32
    %19 = vector.broadcast %cst_12 : f32 to vector<32x1024xf32>
    %20 = arith.maximumf %19, %18 : vector<32x1024xf32>
    %21 = vector.broadcast %cst_13 : f32 to vector<32x1024xf32>
    %22 = arith.minimumf %21, %20 : vector<32x1024xf32>
    %c0_14 = arith.constant 0 : index
    %c0_15 = arith.constant 0 : index
    %23 = vector.load %arg6[%c0_14, %c0_15] : memref<32x1024xf32, #tpu.memory_space<vmem>>, vector<32x1024xf32>
    tpu.vector_store %arg6[%c0_14, %c0_15], %22 {strides = array<i32>} : memref<32x1024xf32, #tpu.memory_space<vmem>>, vector<32x1024xf32>,
    return
  }
  func.func @transform_0(%arg0: i32) -> (i32, i32) {
    %c0_i32 = arith.constant 0 : i32
    %c0_i32_0 = arith.constant 0 : i32
    return %arg0, %c0_i32 : i32, i32
  }
  func.func @transform_1(%arg0: i32) -> (i32, i32) {
    %c0_i32 = arith.constant 0 : i32
    %c0_i32_0 = arith.constant 0 : i32
    %c0_i32_1 = arith.constant 0 : i32
    return %c0_i32, %c0_i32_0 : i32, i32
  }
  func.func @transform_2(%arg0: i32) -> (i32, i32) {
    %c0_i32 = arith.constant 0 : i32
    %c0_i32_0 = arith.constant 0 : i32
    %c0_i32_1 = arith.constant 0 : i32
    return %c0_i32, %c0_i32_0 : i32, i32
  }
  func.func @transform_3(%arg0: i32) -> (i32, i32) {
    %c0_i32 = arith.constant 0 : i32
    %c0_i32_0 = arith.constant 0 : i32
    %c0_i32_1 = arith.constant 0 : i32
    return %c0_i32, %c0_i32_0 : i32, i32
  }
  func.func @transform_4(%arg0: i32) -> (i32, i32) {
    %c0_i32 = arith.constant 0 : i32
    %c0_i32_0 = arith.constant 0 : i32
    %c0_i32_1 = arith.constant 0 : i32
    return %c0_i32, %c0_i32_0 : i32, i32
  }
  func.func @transform_5(%arg0: i32) -> (i32, i32) {
    %c0_i32 = arith.constant 0 : i32
    %c0_i32_0 = arith.constant 0 : i32
    return %arg0, %c0_i32 : i32, i32
  }
}

</mosaic_0001>

<bundles_post_ra>
// kernel: dec_forward.1
= control target key start
LH: loop header
LB: loop body
LE: loop exit
PB: predicated region body
PF: predicated region fallthrough
CT: control target
= control target key end

     0   :  { %10 = vsyncpa [#allocation3], 0  ;;  %s4929_s18 = smov 0   ;;  %s5403_s0 = inlined_call_operand.vmem [shape: bf16[64,16], index: 0, kind: input, shape index: {}]   ;;  %s5404_s1 = inlined_call_operand.vmem [shape: bf16[16,512], index: 1, kind: input, shape index: {}]   ;;  %s5405_s2 = inlined_call_operand.vmem [shape: f32[1,512], index: 2, kind: input, shape index: {}]   ;;  %s5406_s3 = inlined_call_operand.hbm [shape: bf16[512,1024], index: 3, kind: input, shape index: {}]   ;;  %s5407_s4 = inlined_call_operand.vmem [shape: f32[1,1024], index: 4, kind: input, shape index: {}]   ;;  %s5408_s5 = inlined_call_operand.vmem [shape: f32[64,1024], index: 5, kind: output, shape index: {}]  }
   0x1 LB: > { %s174_s21 = sshll.u32 %s5406_s3, 4  ;;  %s3339_s22 = sadd.s32 4294967295, %s4894_s18   ;;  %s4894_s18 = sphi %s4929_s18, %s16_s18   ;;  %s175_s21 = int_to_ptr.hbm [resolvable:$true] %s174_s21 }
   0x2   : > { %p3341_p0 = scmp.ge.s32.totalorder %s4894_s18, 1  ;;  %p157_p1 = scmp.lt.s32.totalorder %s4894_s18, 3 }
   0x3   : > { %p4712_p2 = scmp.eq.s32.totalorder %s3339_s22, 0  ;;  %s4896_s23 = smov [#allocation2]  }
   0x4   : > { %p158_p3 = pnand %p3341_p0, %p157_p1  ;;  %s176_s24 = sshll.u32 %s4896_s23, 4  ;;  %s177_s24 = int_to_ptr.vmem [resolvable:$true] %s176_s24 }
   0x5   : > { %s4897_s25 = smov 512   ;;  %s4898_s26 = smov 32  }
   0x6   : > { %p4708_p4 = pneg %p158_p3  ;;  %204 = sbr.rel (%p158_p3) target bundleno = 587 (0x24b), region = 40 }
   0x8   : > { %p4709_p5 = pnand %p4712_p2, %p4708_p4 }
   0xa   : > { %4711 = dma.hbm_to_vmem [thread:$0]  (!%p4709_p5), %s175_s21, 32768, %s177_s24, [#allocation3], %s4897_s25, %s4897_s25, %s4898_s26  }
   0xb   : > { %4889 = dma.done.wait (%p4712_p2), [#allocation3], 32768  }
   0xc   : > { %4891 = vsyncadd (%p4712_p2), [#allocation3], 4294934528  ;;  %s3346_s27 = sshll.u32 %s3339_s22, 2  ;;  %v3361_v0 = vld [vmem:[%s5404_s1] sm:$0xf]  ;;  %vm296_vm0 = vcmask 130048  }
   0xd   : > { %p235_p6 = scmp.lt.s32.totalorder %s3346_s27, 7  ;;  %v4446_v1 = vld [vmem:[%s5404_s1 + $0xc] sm:$0xf0]  ;;  %v4444_v2 = vld [vmem:[%s5404_s1 + $0x4] sm:$0xf] }
   0xe   : > { %v3362_v3 = vor.u32 %v4446_v1, %v3361_v0  ;;  %v3363_v4 = vld [vmem:[%s5404_s1 + $0x10] sm:$0xf0]  ;;  %v3369_v5 = vld [vmem:[%s5404_s1 + $0x8] sm:$0xf]  ;;  %v4447_v6 = vld [vmem:[%s5404_s1 + $0x14] sm:$0xf0] }
   0xf   : > { %s5424_s27 = smov (!%p235_p6, %s3346_s27), 7  ;;  %v3366_v7 = vor.u32 %v4444_v2, %v3363_v4  ;;  %v3370_v8 = vor.u32 %v4447_v6, %v3369_v5  ;;  %v4445_v9 = vld [vmem:[%s5404_s1 + $0xc] sm:$0xf]  ;;  %v3371_v10 = vld [vmem:[%s5404_s1 + $0x18] sm:$0xf0] }
  0x10   : > { %s3347_s28 = sshll.u32 %s5424_s27, 2  ;;  %310 = vmatpush.bf16.msra.mxu0 %v3362_v3  ;;  %v3374_v12 = vor.u32 %v4445_v9, %v3371_v10  ;;  %v3609_v13 = vld [vmem:[#allocation2 + $0x1c0] sm:$0xf]  ;;  %s4441_s29 = sshll.u32 %s5424_s27, 6 }
  0x11   : > { %s4946_s6 = scalar_lea.vmem %s5403_s0, %s3347_s28  ;;  %v4508_v14 = vld [vmem:[#allocation2 + $0x1dc] sm:$0xf0]  ;;  %329 = vmatpush.bf16.msra.mxu1 %v3366_v7  ;;  %348 = vmatpush.bf16.msra.mxu2 %v3370_v8  ;;  %s5157_s7 = scalar_lea.vmem %s5408_s5, %s4441_s29 }
  0x12   : > { %v4442_v11 = vld [vmem:[%s4946_s6] sm:$0xff]  ;;  %v3610_v15 = vor.u32 %v4508_v14, %v3609_v13  ;;  %367 = vmatpush.bf16.msra.mxu3 %v3374_v12  ;;  %v4443_v55 = vld [vmem:[%s4946_s6 + $0x8] sm:$0xff] }
  0x13   : > { %v3865_v16 = vld [vmem:[#allocation2 + $0x3c0] sm:$0xf]  ;;  %3375 = vmatmul.msk.bf16.vlgmr.msra.gmra.mxu0 %vm296_vm0, %v4442_v11 }
  0x14   : > { %v4572_v17 = vld [vmem:[#allocation2 + $0x3dc] sm:$0xf0]  ;;  %3377 = vmatmul.msk.bf16.vlgmr.msra.gmra.mxu1 %vm296_vm0, %v4442_v11  ;;  %3379 = vmatmul.msk.bf16.vlgmr.msra.gmra.mxu2 %vm296_vm0, %v4442_v11 }
  0x15   : > { %v3577_v18 = vld [vmem:[#allocation2 + $0x180] sm:$0xf]  ;;  %v3866_v19 = vor.u32 %v4572_v17, %v3865_v16  ;;  %3381 = vmatmul.msk.bf16.vlgmr.msra.gmra.mxu3 %vm296_vm0, %v4442_v11  ;;  %1957 = vmatpush.bf16.msrb.mxu0 %v3610_v15 }
  0x16   : > { %v4500_v20 = vld [vmem:[#allocation2 + $0x19c] sm:$0xf0] }
  0x17   : > { %v3833_v21 = vld [vmem:[#allocation2 + $0x380] sm:$0xf]  ;;  %v3578_v28 = vor.u32 %v4500_v20, %v3577_v18  ;;  %1976 = vmatpush.bf16.msrb.mxu1 %v3866_v19 }
  0x18   : > { %v4564_v22 = vld [vmem:[#allocation2 + $0x39c] sm:$0xf0] }
  0x19   : > { %v4121_v23 = vld [vmem:[#allocation2 + $0x5c0] sm:$0xf]  ;;  %v3834_v33 = vor.u32 %v4564_v22, %v3833_v21  ;;  %1958 = vmatpush.bf16.msrb.mxu0 %v3578_v28 }
  0x1a   : > { %v4636_v24 = vld [vmem:[#allocation2 + $0x5dc] sm:$0xf0] }
  0x1b   : > { %v4377_v25 = vld [vmem:[#allocation2 + $0x7c0] sm:$0xf]  ;;  %v4122_v26 = vor.u32 %v4636_v24, %v4121_v23  ;;  %1977 = vmatpush.bf16.msrb.mxu1 %v3834_v33 }
  0x1c   : > { %v4700_v27 = vld [vmem:[#allocation2 + $0x7dc] sm:$0xf0] }
  0x1d   : > { %v4378_v29 = vor.u32 %v4700_v27, %v4377_v25  ;;  %v3545_v30 = vld [vmem:[#allocation2 + $0x140] sm:$0xf]  ;;  %1995 = vmatpush.bf16.msrb.mxu2 %v4122_v26 }
  0x1e   : > { %v4492_v31 = vld [vmem:[#allocation2 + $0x15c] sm:$0xf0] }
  0x1f   : > { %v4089_v32 = vld [vmem:[#allocation2 + $0x580] sm:$0xf]  ;;  %2014 = vmatpush.bf16.msrb.mxu3 %v4378_v29  ;;  %v3546_v43 = vor.u32 %v4492_v31, %v3545_v30 }
  0x20   : > { %v4628_v34 = vld [vmem:[#allocation2 + $0x59c] sm:$0xf0] }
  0x21   : > { %v4345_v35 = vld [vmem:[#allocation2 + $0x780] sm:$0xf]  ;;  %v4090_v39 = vor.u32 %v4628_v34, %v4089_v32  ;;  %1959 = vmatpush.bf16.msrb.mxu0 %v3546_v43 }
  0x22   : > { %v4692_v36 = vld [vmem:[#allocation2 + $0x79c] sm:$0xf0] }
  0x23   : > { %v3801_v37 = vld [vmem:[#allocation2 + $0x340] sm:$0xf]  ;;  %v4346_v40 = vor.u32 %v4692_v36, %v4345_v35  ;;  %1996 = vmatpush.bf16.msrb.mxu2 %v4090_v39  ;;  %3376 = vmatmul.msk.bf16.gmra.mxu0 %vm296_vm0, %v4443_v55 }
  0x24   : > { %v4556_v38 = vld [vmem:[#allocation2 + $0x35c] sm:$0xf0]  ;;  %3378 = vmatmul.msk.bf16.gmra.mxu1 %vm296_vm0, %v4443_v55  ;;  %3380 = vmatmul.msk.bf16.gmra.mxu2 %vm296_vm0, %v4443_v55 }
  0x25   : > { %v4057_v41 = vld [vmem:[#allocation2 + $0x540] sm:$0xf]  ;;  %v3802_v46 = vor.u32 %v4556_v38, %v3801_v37  ;;  %2015 = vmatpush.bf16.msrb.mxu3 %v4346_v40  ;;  %v4504_v40 = vld [vmem:[#allocation2 + $0x1c4] sm:$0xf] }
  0x26   : > { %v4620_v42 = vld [vmem:[#allocation2 + $0x55c] sm:$0xf0]  ;;  %3382 = vmatmul.msk.bf16.gmra.mxu3 %vm296_vm0, %v4443_v55 }
  0x27   : > { %v4313_v44 = vld [vmem:[#allocation2 + $0x740] sm:$0xf]  ;;  %v4058_v49 = vor.u32 %v4620_v42, %v4057_v41  ;;  %1978 = vmatpush.bf16.msrb.mxu1 %v3802_v46  ;;  %v3611_v41 = vld [vmem:[#allocation2 + $0x1e0] sm:$0xf0] }
  0x28   : > { %v4684_v45 = vld [vmem:[#allocation2 + $0x75c] sm:$0xf0]  ;;  %v4568_v42 = vld [vmem:[#allocation2 + $0x3c4] sm:$0xf]  ;;  %v3614_v43 = vor.u32 %v4504_v40, %v3611_v41 }
  0x29   : > { %v3513_v47 = vld [vmem:[#allocation2 + $0x100] sm:$0xf]  ;;  %v4314_v52 = vor.u32 %v4684_v45, %v4313_v44  ;;  %1997 = vmatpush.bf16.msrb.mxu2 %v4058_v49  ;;  %v3867_v44 = vld [vmem:[#allocation2 + $0x3e0] sm:$0xf0] }
  0x2a   : > { %v4484_v48 = vld [vmem:[#allocation2 + $0x11c] sm:$0xf0]  ;;  %v3870_v45 = vor.u32 %v4568_v42, %v3867_v44  ;;  %v4283_v40 = vld [vmem:[#allocation2 + $0x720] sm:$0xf0] }
  0x2b   : > { %v3769_v50 = vld [vmem:[#allocation2 + $0x300] sm:$0xf]  ;;  %v3514_v53 = vor.u32 %v4484_v48, %v3513_v47  ;;  %2016 = vmatpush.bf16.msrb.mxu3 %v4314_v52  ;;  %v4496_v52 = vld [vmem:[#allocation2 + $0x184] sm:$0xf] }
  0x2c   : > { %v4548_v51 = vld [vmem:[#allocation2 + $0x31c] sm:$0xf0]  ;;  %v4464_v42 = vld [vmem:[#allocation2 + $0x84] sm:$0xf] }
  0x2d   : > { %v3770_v54 = vor.u32 %v4548_v51, %v3769_v50  ;;  %1960 = vmatpush.bf16.msrb.mxu0 %v3514_v53  ;;  %v3481_v56 = vld [vmem:[#allocation2 + $0xc0] sm:$0xf]  ;;  %v3579_v53 = vld [vmem:[#allocation2 + $0x1a0] sm:$0xf0] }
  0x2e   : > { %v4476_v57 = vld [vmem:[#allocation2 + $0xdc] sm:$0xf0]  ;;  %v3582_v55 = vor.u32 %v4496_v52, %v3579_v53 }
  0x2f   : > { %1979 = vmatpush.bf16.msrb.mxu1 %v3770_v54  ;;  %v3737_v58 = vld [vmem:[#allocation2 + $0x2c0] sm:$0xf]  ;;  %v3482_v59 = vor.u32 %v4476_v57, %v3481_v56  ;;  %v4560_v54 = vld [vmem:[#allocation2 + $0x384] sm:$0xf] }
  0x30   : > { %v4540_v60 = vld [vmem:[#allocation2 + $0x2dc] sm:$0xf0]  ;;  %v3835_v56 = vld [vmem:[#allocation2 + $0x3a0] sm:$0xf0] }
  0x31   : > { %v3738_v61 = vor.u32 %v4540_v60, %v3737_v58  ;;  %v4025_v62 = vld [vmem:[#allocation2 + $0x500] sm:$0xf]  ;;  %1961 = vmatpush.bf16.msrb.mxu0 %v3482_v59  ;;  %v3838_v57 = vor.u32 %v4560_v54, %v3835_v56  ;;  %v4632_v58 = vld [vmem:[#allocation2 + $0x5c4] sm:$0xf] }
  0x32   : > { %v4612_v63 = vld [vmem:[#allocation2 + $0x51c] sm:$0xf0]  ;;  %v4123_v59 = vld [vmem:[#allocation2 + $0x5e0] sm:$0xf0] }
  0x33   : > { %v4281_v0 = vld [vmem:[#allocation2 + $0x700] sm:$0xf]  ;;  %v4026_v1 = vor.u32 %v4612_v63, %v4025_v62  ;;  %1980 = vmatpush.bf16.msrb.mxu1 %v3738_v61  ;;  %v4696_v60 = vld [vmem:[#allocation2 + $0x7c4] sm:$0xf]  ;;  %v4126_v61 = vor.u32 %v4632_v58, %v4123_v59 }
  0x34   : > { %v4676_v2 = vld [vmem:[#allocation2 + $0x71c] sm:$0xf0]  ;;  %v4379_v62 = vld [vmem:[#allocation2 + $0x7e0] sm:$0xf0] }
  0x35   : > { %v4282_v3 = vor.u32 %v4676_v2, %v4281_v0  ;;  %v3449_v4 = vld [vmem:[#allocation2 + $0x80] sm:$0xf]  ;;  %1998 = vmatpush.bf16.msrb.mxu2 %v4026_v1  ;;  %v4382_v63 = vor.u32 %v4696_v60, %v4379_v62  ;;  %v4488_v0 = vld [vmem:[#allocation2 + $0x144] sm:$0xf] }
  0x36   : > { %v4468_v5 = vld [vmem:[#allocation2 + $0x9c] sm:$0xf0]  ;;  %v3547_v1 = vld [vmem:[#allocation2 + $0x160] sm:$0xf0] }
  0x37   : > { %v3450_v6 = vor.u32 %v4468_v5, %v3449_v4  ;;  %v3705_v7 = vld [vmem:[#allocation2 + $0x280] sm:$0xf]  ;;  %2017 = vmatpush.bf16.msrb.mxu3 %v4282_v3  ;;  %v4552_v2 = vld [vmem:[#allocation2 + $0x344] sm:$0xf]  ;;  %v3550_v3 = vor.u32 %v4488_v0, %v3547_v1 }
  0x38   : > { %v4532_v8 = vld [vmem:[#allocation2 + $0x29c] sm:$0xf0]  ;;  %v3803_v4 = vld [vmem:[#allocation2 + $0x360] sm:$0xf0] }
  0x39   : > { %v3993_v9 = vld [vmem:[#allocation2 + $0x4c0] sm:$0xf]  ;;  %v3706_v10 = vor.u32 %v4532_v8, %v3705_v7  ;;  %1962 = vmatpush.bf16.msrb.mxu0 %v3450_v6  ;;  %v3806_v5 = vor.u32 %v4552_v2, %v3803_v4  ;;  %v4624_v6 = vld [vmem:[#allocation2 + $0x584] sm:$0xf] }
  0x3a   : > { %v4604_v11 = vld [vmem:[#allocation2 + $0x4dc] sm:$0xf0]  ;;  %v4091_v7 = vld [vmem:[#allocation2 + $0x5a0] sm:$0xf0] }
  0x3b   : > { %v4249_v12 = vld [vmem:[#allocation2 + $0x6c0] sm:$0xf]  ;;  %v3994_v13 = vor.u32 %v4604_v11, %v3993_v9  ;;  %1981 = vmatpush.bf16.msrb.mxu1 %v3706_v10  ;;  %v4688_v8 = vld [vmem:[#allocation2 + $0x784] sm:$0xf]  ;;  %v4094_v9 = vor.u32 %v4624_v6, %v4091_v7 }
  0x3c   : > { %v4668_v14 = vld [vmem:[#allocation2 + $0x6dc] sm:$0xf0]  ;;  %v4347_v10 = vld [vmem:[#allocation2 + $0x7a0] sm:$0xf0] }
  0x3d   : > { %v4250_v15 = vor.u32 %v4668_v14, %v4249_v12  ;;  %v3417_v16 = vld [vmem:[#allocation2 + $0x40] sm:$0xf]  ;;  %1999 = vmatpush.bf16.msrb.mxu2 %v3994_v13  ;;  %v4350_v11 = vor.u32 %v4688_v8, %v4347_v10  ;;  %v4480_v12 = vld [vmem:[#allocation2 + $0x104] sm:$0xf] }
  0x3e   : > { %v4460_v17 = vld [vmem:[#allocation2 + $0x5c] sm:$0xf0]  ;;  %v3515_v13 = vld [vmem:[#allocation2 + $0x120] sm:$0xf0] }
  0x3f   : > { %v3673_v18 = vld [vmem:[#allocation2 + $0x240] sm:$0xf]  ;;  %v3418_v19 = vor.u32 %v4460_v17, %v3417_v16  ;;  %2018 = vmatpush.bf16.msrb.mxu3 %v4250_v15  ;;  %v4544_v14 = vld [vmem:[#allocation2 + $0x304] sm:$0xf]  ;;  %v3518_v16 = vor.u32 %v4480_v12, %v3515_v13 }
  0x40   : > { %v4524_v20 = vld [vmem:[#allocation2 + $0x25c] sm:$0xf0]  ;;  %v3771_v17 = vld [vmem:[#allocation2 + $0x320] sm:$0xf0] }
  0x41   : > { %v3674_v21 = vor.u32 %v4524_v20, %v3673_v18  ;;  %v3961_v22 = vld [vmem:[#allocation2 + $0x480] sm:$0xf]  ;;  %1963 = vmatpush.bf16.msrb.mxu0 %v3418_v19  ;;  %v3774_v18 = vor.u32 %v4544_v14, %v3771_v17  ;;  %v4616_v19 = vld [vmem:[#allocation2 + $0x544] sm:$0xf] }
  0x42   : > { %v4596_v23 = vld [vmem:[#allocation2 + $0x49c] sm:$0xf0]  ;;  %v4059_v20 = vld [vmem:[#allocation2 + $0x560] sm:$0xf0] }
  0x43   : > { %v3962_v24 = vor.u32 %v4596_v23, %v3961_v22  ;;  %v4217_v25 = vld [vmem:[#allocation2 + $0x680] sm:$0xf]  ;;  %1982 = vmatpush.bf16.msrb.mxu1 %v3674_v21  ;;  %v4680_v21 = vld [vmem:[#allocation2 + $0x744] sm:$0xf]  ;;  %v4062_v23 = vor.u32 %v4616_v19, %v4059_v20 }
  0x44   : > { %v4660_v26 = vld [vmem:[#allocation2 + $0x69c] sm:$0xf0]  ;;  %v4251_v54 = vld [vmem:[#allocation2 + $0x6e0] sm:$0xf0] }
  0x45   : > { %v4218_v27 = vor.u32 %v4660_v26, %v4217_v25  ;;  %v3385_v28 = vld [vmem:[#allocation2] sm:$0xf]  ;;  %2000 = vmatpush.bf16.msrb.mxu2 %v3962_v24  ;;  %v4315_v24 = vld [vmem:[#allocation2 + $0x760] sm:$0xf0] }
  0x46   : > { %v4452_v29 = vld [vmem:[#allocation2 + $0x1c] sm:$0xf0]  ;;  %v4318_v25 = vor.u32 %v4680_v21, %v4315_v24  ;;  %v4472_v26 = vld [vmem:[#allocation2 + $0xc4] sm:$0xf] }
  0x47   : > { %v3641_v30 = vld [vmem:[#allocation2 + $0x200] sm:$0xf]  ;;  %v3386_v31 = vor.u32 %v4452_v29, %v3385_v28  ;;  %2019 = vmatpush.bf16.msrb.mxu3 %v4218_v27  ;;  %v3483_v27 = vld [vmem:[#allocation2 + $0xe0] sm:$0xf0] }
  0x48   : > { %v4516_v32 = vld [vmem:[#allocation2 + $0x21c] sm:$0xf0]  ;;  %v4536_v28 = vld [vmem:[#allocation2 + $0x2c4] sm:$0xf] }
  0x49   : > { %v3642_v33 = vor.u32 %v4516_v32, %v3641_v30  ;;  %v3929_v34 = vld [vmem:[#allocation2 + $0x440] sm:$0xf]  ;;  %1964 = vmatpush.bf16.msrb.mxu0 %v3386_v31  ;;  %v3486_v30 = vor.u32 %v4472_v26, %v3483_v27  ;;  %v3739_v31 = vld [vmem:[#allocation2 + $0x2e0] sm:$0xf0] }
  0x4a   : > { %v4588_v35 = vld [vmem:[#allocation2 + $0x45c] sm:$0xf0]  ;;  %v3419_v58 = vld [vmem:[#allocation2 + $0x60] sm:$0xf0] }
  0x4b   : > { %v4185_v36 = vld [vmem:[#allocation2 + $0x640] sm:$0xf]  ;;  %v3930_v37 = vor.u32 %v4588_v35, %v3929_v34  ;;  %1983 = vmatpush.bf16.msrb.mxu1 %v3642_v33  ;;  %v3742_v33 = vor.u32 %v4536_v28, %v3739_v31  ;;  %v4608_v34 = vld [vmem:[#allocation2 + $0x504] sm:$0xf] }
  0x4c   : > { %v4652_v38 = vld [vmem:[#allocation2 + $0x65c] sm:$0xf0]  ;;  %v4027_v35 = vld [vmem:[#allocation2 + $0x520] sm:$0xf0] }
  0x4d   : > { %v4186_v39 = vor.u32 %v4652_v38, %v4185_v36  ;;  %2001 = vmatpush.bf16.msrb.mxu2 %v3930_v37  ;;  %v3897_v46 = vld [vmem:[#allocation2 + $0x400] sm:$0xf]  ;;  %2033 = vmatpush.bf16.msra.mxu0 %v3614_v43  ;;  %v4672_v36 = vld [vmem:[#allocation2 + $0x704] sm:$0xf] }
  0x4e   : > { %v4580_v47 = vld [vmem:[#allocation2 + $0x41c] sm:$0xf0]  ;;  %v4286_v41 = vor.u32 %v4672_v36, %v4283_v40  ;;  %v3451_v43 = vld [vmem:[#allocation2 + $0xa0] sm:$0xf0] }
  0x4f   : > { %2020 = vmatpush.bf16.msrb.mxu3 %v4186_v39  ;;  %v4153_v48 = vld [vmem:[#allocation2 + $0x600] sm:$0xf]  ;;  %v3898_v49 = vor.u32 %v4580_v47, %v3897_v46  ;;  %2052 = vmatpush.bf16.msra.mxu1 %v3870_v45  ;;  %v4030_v39 = vor.u32 %v4608_v34, %v4027_v35  ;;  %v3454_v44 = vor.u32 %v4464_v42, %v3451_v43  ;;  %v4528_v45 = vld [vmem:[#allocation2 + $0x284] sm:$0xf]  ;;  %v4509_v34 = vld [vmem:[#allocation2 + $0x1e4] sm:$0xf0] }
  0x50   : > { %v4644_v50 = vld [vmem:[#allocation2 + $0x61c] sm:$0xf0]  ;;  %v3707_v46 = vld [vmem:[#allocation2 + $0x2a0] sm:$0xf0]  ;;  %v3873_v35 = vld [vmem:[#allocation2 + $0x3c8] sm:$0xf] }
  0x51   : > { %v4154_v51 = vor.u32 %v4644_v50, %v4153_v48  ;;  %2002 = vmatpush.bf16.msrb.mxu2 %v3898_v49  ;;  %2034 = vmatpush.bf16.msra.mxu0 %v3582_v55  ;;  %v4985_v15 = vld [vmem:[%s5405_s2] sm:$0xf]  ;;  %v3710_v47 = vor.u32 %v4528_v45, %v3707_v46  ;;  %v4600_v48 = vld [vmem:[#allocation2 + $0x4c4] sm:$0xf] }
  0x52   : > { %v4988_v22 = vperm.slane %v4985_v15, 0  ;;  %v4994_v38 = vperm.slane %v4985_v15, 1  ;;  %v3995_v49 = vld [vmem:[#allocation2 + $0x4e0] sm:$0xf0]  ;;  %v5000_v10 = vperm.slane %v4985_v15, 2 }
  0x53   : > { %2021 = vmatpush.bf16.msrb.mxu3 %v4154_v51  ;;  %2053 = vmatpush.bf16.msra.mxu1 %v3838_v57  ;;  %v4664_v50 = vld [vmem:[#allocation2 + $0x6c4] sm:$0xf]  ;;  %v3998_v53 = vor.u32 %v4600_v48, %v3995_v49 }
  0x54   : > { %v4254_v56 = vor.u32 %v4664_v50, %v4251_v54  ;;  %v4456_v57 = vld [vmem:[#allocation2 + $0x44] sm:$0xf]  ;;  %v3585_v50 = vld [vmem:[#allocation2 + $0x188] sm:$0xf] }
  0x55   : > { %2071 = vmatpush.bf16.msra.mxu2 %v4126_v61  ;;  %2035 = vmatpush.bf16.msra.mxu0 %v3550_v3  ;;  %v4520_v59 = vld [vmem:[#allocation2 + $0x244] sm:$0xf]  ;;  %v3422_v62 = vor.u32 %v4456_v57, %v3419_v58 }
  0x56   : > { %v4592_v0 = vld [vmem:[#allocation2 + $0x484] sm:$0xf] }
  0x57   : > { %2090 = vmatpush.bf16.msra.mxu3 %v4382_v63  ;;  %2054 = vmatpush.bf16.msra.mxu1 %v3806_v5  ;;  %v3675_v63 = vld [vmem:[#allocation2 + $0x260] sm:$0xf0] }
  0x58   : > { %v3963_v1 = vld [vmem:[#allocation2 + $0x4a0] sm:$0xf0]  ;;  %v3678_v4 = vor.u32 %v4520_v59, %v3675_v63 }
  0x59   : > { %2072 = vmatpush.bf16.msra.mxu2 %v4094_v9  ;;  %2036 = vmatpush.bf16.msra.mxu0 %v3518_v16  ;;  %v3966_v5 = vor.u32 %v4592_v0, %v3963_v1  ;;  %v4656_v6 = vld [vmem:[#allocation2 + $0x684] sm:$0xf]  ;;  %v5004_v16 = vperm.slane %v4985_v15, 3  ;;  %v4129_v0 = vld [vmem:[#allocation2 + $0x5c8] sm:$0xf] }
  0x5a   : > { %v4219_v7 = vld [vmem:[#allocation2 + $0x6a0] sm:$0xf0]  ;;  %v4637_v1 = vld [vmem:[#allocation2 + $0x5e4] sm:$0xf0] }
  0x5b   : > { %2091 = vmatpush.bf16.msra.mxu3 %v4350_v11  ;;  %2055 = vmatpush.bf16.msra.mxu1 %v3774_v18  ;;  %v4448_v8 = vld [vmem:[#allocation2 + $0x4] sm:$0xf]  ;;  %v4222_v12 = vor.u32 %v4656_v6, %v4219_v7  ;;  %v4701_v6 = vld [vmem:[#allocation2 + $0x7e4] sm:$0xf0] }
  0x5c   : > { %v3387_v13 = vld [vmem:[#allocation2 + $0x20] sm:$0xf0] }
  0x5d   : > { %2073 = vmatpush.bf16.msra.mxu2 %v4062_v23  ;;  %2037 = vmatpush.bf16.msra.mxu0 %v3486_v30  ;;  %v4512_v14 = vld [vmem:[#allocation2 + $0x204] sm:$0xf]  ;;  %v3390_v18 = vor.u32 %v4448_v8, %v3387_v13 }
  0x5e   : > { %v3643_v19 = vld [vmem:[#allocation2 + $0x220] sm:$0xf0] }
  0x5f   : > { %2092 = vmatpush.bf16.msra.mxu3 %v4318_v25  ;;  %2056 = vmatpush.bf16.msra.mxu1 %v3742_v33  ;;  %v4584_v20 = vld [vmem:[#allocation2 + $0x444] sm:$0xf]  ;;  %v3646_v23 = vor.u32 %v4512_v14, %v3643_v19  ;;  %v3617_v33 = vld [vmem:[#allocation2 + $0x1c8] sm:$0xf] }
  0x60   : > { %v3931_v24 = vld [vmem:[#allocation2 + $0x460] sm:$0xf0]  ;;  %v3618_v40 = vor.u32 %v4509_v34, %v3617_v33  ;;  %v4097_v19 = vld [vmem:[#allocation2 + $0x588] sm:$0xf] }
  0x61   : > { %2074 = vmatpush.bf16.msra.mxu2 %v4030_v39  ;;  %2038 = vmatpush.bf16.msra.mxu0 %v3454_v44  ;;  %v4648_v25 = vld [vmem:[#allocation2 + $0x644] sm:$0xf]  ;;  %v3934_v27 = vor.u32 %v4584_v20, %v3931_v24  ;;  %v4629_v20 = vld [vmem:[#allocation2 + $0x5a4] sm:$0xf0] }
  0x62   : > { %v4187_v28 = vld [vmem:[#allocation2 + $0x660] sm:$0xf0]  ;;  %v4485_v33 = vld [vmem:[#allocation2 + $0x124] sm:$0xf0] }
  0x63   : > { %2093 = vmatpush.bf16.msra.mxu3 %v4286_v41  ;;  %2057 = vmatpush.bf16.msra.mxu1 %v3710_v47  ;;  %v4190_v15 = vor.u32 %v4648_v25, %v4187_v28  ;;  %v4573_v41 = vld [vmem:[#allocation2 + $0x3e4] sm:$0xf0]  ;;  %v4576_v42 = vld [vmem:[#allocation2 + $0x404] sm:$0xf]  ;;  %v4098_v25 = vor.u32 %v4629_v20, %v4097_v19 }
  0x64   : > { %v3899_v43 = vld [vmem:[#allocation2 + $0x420] sm:$0xf0]  ;;  %v3874_v46 = vor.u32 %v4573_v41, %v3873_v35  ;;  %v4693_v28 = vld [vmem:[#allocation2 + $0x7a4] sm:$0xf0] }
  0x65   : > { %2075 = vmatpush.bf16.msra.mxu2 %v3998_v53  ;;  %2039 = vmatpush.bf16.msra.mxu0 %v3422_v62  ;;  %v3902_v47 = vor.u32 %v4576_v42, %v3899_v43  ;;  %v4640_v48 = vld [vmem:[#allocation2 + $0x604] sm:$0xf]  ;;  %v3777_v34 = vld [vmem:[#allocation2 + $0x308] sm:$0xf] }
  0x66   : > { %v4155_v49 = vld [vmem:[#allocation2 + $0x620] sm:$0xf0]  ;;  %v4621_v41 = vld [vmem:[#allocation2 + $0x564] sm:$0xf0] }
  0x67   : > { %2094 = vmatpush.bf16.msra.mxu3 %v4254_v56  ;;  %2058 = vmatpush.bf16.msra.mxu1 %v3678_v4  ;;  %v4158_v54 = vor.u32 %v4640_v48, %v4155_v49  ;;  %v3841_v56 = vld [vmem:[#allocation2 + $0x388] sm:$0xf] }
  0x68   : > { %v4321_v42 = vld [vmem:[#allocation2 + $0x748] sm:$0xf] }
  0x69   : > { %2076 = vmatpush.bf16.msra.mxu2 %v3966_v5  ;;  %2040 = vmatpush.bf16.msra.mxu0 %v3390_v18  ;;  %v4130_v5 = vor.u32 %v4637_v1, %v4129_v0  ;;  %v4557_v18 = vld [vmem:[#allocation2 + $0x364] sm:$0xf0] }
  0x6a   : > { %v4289_v0 = vld [vmem:[#allocation2 + $0x708] sm:$0xf] }
  0x6b   : > { %2095 = vmatpush.bf16.msra.mxu3 %v4222_v12  ;;  %2059 = vmatpush.bf16.msra.mxu1 %v3646_v23  ;;  %v3809_v12 = vld [vmem:[#allocation2 + $0x348] sm:$0xf] }
  0x6c   : > { %v3810_v24 = vor.u32 %v4557_v18, %v3809_v12  ;;  %v4677_v1 = vld [vmem:[#allocation2 + $0x724] sm:$0xf0] }
  0x6d   : > { %2077 = vmatpush.bf16.msra.mxu2 %v3934_v27  ;;  %v4353_v27 = vld [vmem:[#allocation2 + $0x788] sm:$0xf] }
  0x6e   : > { %v4257_v18 = vld [vmem:[#allocation2 + $0x6c8] sm:$0xf] }
  0x6f   : > { %2096 = vmatpush.bf16.msra.mxu3 %v4190_v15  ;;  %v4669_v20 = vld [vmem:[#allocation2 + $0x6e4] sm:$0xf0] }
  0x71   : > { %2078 = vmatpush.bf16.msra.mxu2 %v3902_v47 }
  0x73   : > { %2097 = vmatpush.bf16.msra.mxu3 %v4158_v54 }
  0x90   : > { %v312_v29 = vpop.f32.mrf.mxu0 }
  0x91   : > { %v331_v32 = vpop.f32.mrf.mxu1  ;;  %v4991_v37 = vadd.f32 %v312_v29, %v4988_v22 }
  0x92   : > { %v332_v52 = vadd.f32 %v331_v32, %v4994_v38 }
  0x93   : > { %v379_v51 = vmax.f32 %v4991_v37, 0.0 }
  0x94   : > { %v380_v9 = vmax.f32 %v332_v52, 0.0 }
  0x97   : > { %v350_v55 = vpop.f32.mrf.mxu2 }
  0x98   : > { %v369_v60 = vpop.f32.mrf.mxu3  ;;  %v314_v61 = vpop.f32.mrf.mxu0  ;;  %v351_v29 = vadd.f32 %v350_v55, %v5000_v10  ;;  %v4501_v55 = vld [vmem:[#allocation2 + $0x1a4] sm:$0xf0] }
  0x99   : > { %v315_v2 = vadd.f32 %v314_v61, %v4988_v22  ;;  %v333_v3 = vpop.f32.mrf.mxu1  ;;  %v370_v31 = vadd.f32 %v369_v60, %v5004_v16  ;;  %v3586_v59 = vor.u32 %v4501_v55, %v3585_v50  ;;  %v4565_v60 = vld [vmem:[#allocation2 + $0x3a4] sm:$0xf0] }
  0x9a   : > { %v334_v11 = vadd.f32 %v333_v3, %v4994_v38  ;;  %v3842_v62 = vor.u32 %v4565_v60, %v3841_v56  ;;  %v3489_v50 = vld [vmem:[#allocation2 + $0xc8] sm:$0xf] }
  0x9b   : > { %v383_v17 = vmax.f32 %v315_v2, 0.0  ;;  %v382_v57 = vmax.f32 %v370_v31, 0.0  ;;  %v4385_v2 = vld [vmem:[#allocation2 + $0x7c8] sm:$0xf] }
  0x9c   : > { %v384_v21 = vmax.f32 %v334_v11, 0.0  ;;  %v4386_v8 = vor.u32 %v4701_v6, %v4385_v2  ;;  %v4493_v11 = vld [vmem:[#allocation2 + $0x164] sm:$0xf0] }
  0x9d   : > { %v5006_v26 = vpack.c.bf16 %v383_v17, %v379_v51  ;;  %v381_v51 = vmax.f32 %v351_v29, 0.0  ;;  %v3521_v29 = vld [vmem:[#allocation2 + $0x108] sm:$0xf] }
  0x9e   : > { %v5009_v30 = vpack.c.bf16 %v384_v21, %v380_v9  ;;  %v3553_v9 = vld [vmem:[#allocation2 + $0x148] sm:$0xf] }
  0x9f   : > { %v352_v32 = vpop.f32.mrf.mxu2  ;;  %1965 = vmatmul.bf16.vlgmr.msrb.gmra.mxu0 %v5006_v26  ;;  %v3554_v17 = vor.u32 %v4493_v11, %v3553_v9  ;;  %v4541_v56 = vld [vmem:[#allocation2 + $0x2e4] sm:$0xf0] }
  0xa0   : > { %v353_v36 = vadd.f32 %v352_v32, %v5000_v10  ;;  %v371_v37 = vpop.f32.mrf.mxu3  ;;  %1984 = vmatmul.bf16.vlgmr.msrb.gmra.mxu1 %v5009_v30  ;;  %v317_v39 = vpop.f32.mrf.mxu0  ;;  %2109 = vmatpush.bf16.msrb.mxu0 %v3618_v40  ;;  %v4354_v32 = vor.u32 %v4693_v28, %v4353_v27  ;;  %v3457_v2 = vld [vmem:[#allocation2 + $0x88] sm:$0xf] }
  0xa1   : > { %v372_v44 = vadd.f32 %v371_v37, %v5004_v16  ;;  %v336_v45 = vpop.f32.mrf.mxu1  ;;  %v5017_v53 = vadd.f32 %v317_v39, %v4988_v22  ;;  %2128 = vmatpush.bf16.msrb.mxu1 %v3874_v46  ;;  %v4549_v37 = vld [vmem:[#allocation2 + $0x324] sm:$0xf0] }
  0xa2   : > { %v385_v52 = vmax.f32 %v353_v36, 0.0  ;;  %v337_v4 = vadd.f32 %v336_v45, %v4994_v38  ;;  %v3522_v36 = vor.u32 %v4485_v33, %v3521_v29  ;;  %v4065_v39 = vld [vmem:[#allocation2 + $0x548] sm:$0xf]  ;;  %v3778_v40 = vor.u32 %v4549_v37, %v3777_v34 }
  0xa3   : > { %v386_v58 = vmax.f32 %v372_v44, 0.0  ;;  %v387_v3 = vmax.f32 %v5017_v53, 0.0  ;;  %v4066_v44 = vor.u32 %v4621_v41, %v4065_v39  ;;  %v4685_v45 = vld [vmem:[#allocation2 + $0x764] sm:$0xf0] }
  0xa4   : > { %v5019_v61 = vpack.c.bf16 %v385_v52, %v381_v51  ;;  %2110 = vmatpush.bf16.msrb.mxu0 %v3586_v59  ;;  %v388_v15 = vmax.f32 %v337_v4, 0.0  ;;  %v4322_v47 = vor.u32 %v4685_v45, %v4321_v42  ;;  %v4477_v51 = vld [vmem:[#allocation2 + $0xe4] sm:$0xf0] }
  0xa5   : > { %v5021_v63 = vpack.c.bf16 %v386_v58, %v382_v57  ;;  %2129 = vmatpush.bf16.msrb.mxu1 %v3842_v62  ;;  %v3745_v52 = vld [vmem:[#allocation2 + $0x2c8] sm:$0xf]  ;;  %v3490_v55 = vor.u32 %v4477_v51, %v3489_v50  ;;  %v3619_v50 = vld [vmem:[#allocation2 + $0x1e8] sm:$0xf0] }
  0xa6   : > { %2003 = vmatmul.bf16.vlgmr.msrb.gmra.mxu2 %v5019_v61  ;;  %v4033_v57 = vld [vmem:[#allocation2 + $0x508] sm:$0xf]  ;;  %v3746_v60 = vor.u32 %v4541_v56, %v3745_v52  ;;  %v4569_v51 = vld [vmem:[#allocation2 + $0x3cc] sm:$0xf] }
  0xa7   : > { %2022 = vmatmul.bf16.vlgmr.msrb.gmra.mxu3 %v5021_v63  ;;  %v355_v7 = vpop.f32.mrf.mxu2  ;;  %2147 = vmatpush.bf16.msrb.mxu2 %v4130_v5  ;;  %v4613_v58 = vld [vmem:[#allocation2 + $0x524] sm:$0xf0] }
  0xa8   : > { %v319_v14 = vpop.f32.mrf.mxu0  ;;  %2166 = vmatpush.bf16.msrb.mxu3 %v4386_v8  ;;  %2111 = vmatpush.bf16.msrb.mxu0 %v3554_v17  ;;  %v4034_v62 = vor.u32 %v4613_v58, %v4033_v57  ;;  %v4469_v5 = vld [vmem:[#allocation2 + $0xa4] sm:$0xf0] }
  0xa9   : > { %v374_v13 = vpop.f32.mrf.mxu3  ;;  %v320_v21 = vadd.f32 %v319_v14, %v4988_v22  ;;  %v338_v23 = vpop.f32.mrf.mxu1  ;;  %2130 = vmatpush.bf16.msrb.mxu1 %v3810_v24  ;;  %v3713_v6 = vld [vmem:[#allocation2 + $0x288] sm:$0xf]  ;;  %v3458_v9 = vor.u32 %v4469_v5, %v3457_v2  ;;  %v3843_v2 = vld [vmem:[#allocation2 + $0x3a8] sm:$0xf0] }
  0xaa   : > { %v339_v31 = vadd.f32 %v338_v23, %v4994_v38  ;;  %v356_v38 = vadd.f32 %v355_v7, %v5000_v10  ;;  %v375_v48 = vadd.f32 %v374_v13, %v5004_v16  ;;  %v4533_v11 = vld [vmem:[#allocation2 + $0x2a4] sm:$0xf0]  ;;  %v4131_v5 = vld [vmem:[#allocation2 + $0x5e8] sm:$0xf0] }
  0xab   : > { %v391_v35 = vmax.f32 %v320_v21, 0.0  ;;  %2148 = vmatpush.bf16.msrb.mxu2 %v4098_v25  ;;  %v4001_v14 = vld [vmem:[#allocation2 + $0x4c8] sm:$0xf]  ;;  %v4258_v21 = vor.u32 %v4669_v20, %v4257_v18  ;;  %v3811_v18 = vld [vmem:[#allocation2 + $0x368] sm:$0xf0] }
  0xac   : > { %v392_v22 = vmax.f32 %v339_v31, 0.0  ;;  %2167 = vmatpush.bf16.msrb.mxu3 %v4354_v32  ;;  %2112 = vmatpush.bf16.msrb.mxu0 %v3522_v36  ;;  %v390_v7 = vmax.f32 %v375_v48, 0.0  ;;  %v4605_v17 = vld [vmem:[#allocation2 + $0x4e4] sm:$0xf0]  ;;  %v4099_v20 = vld [vmem:[#allocation2 + $0x5a8] sm:$0xf0] }
  0xad   : > { %v5029_v43 = vpack.c.bf16 %v391_v35, %v387_v3  ;;  %2131 = vmatpush.bf16.msrb.mxu1 %v3778_v40  ;;  %v389_v3 = vmax.f32 %v356_v38, 0.0  ;;  %v4002_v19 = vor.u32 %v4605_v17, %v4001_v14  ;;  %v3425_v23 = vld [vmem:[#allocation2 + $0x48] sm:$0xf]  ;;  %v4553_v14 = vld [vmem:[#allocation2 + $0x34c] sm:$0xf] }
  0xae   : > { %v5032_v46 = vpack.c.bf16 %v392_v22, %v388_v15  ;;  %v4461_v24 = vld [vmem:[#allocation2 + $0x64] sm:$0xf0] }
  0xaf   : > { %v357_v49 = vpop.f32.mrf.mxu2  ;;  %1970 = vmatmul.bf16.gmra.mxu0 %v5029_v43  ;;  %2149 = vmatpush.bf16.msrb.mxu2 %v4066_v44  ;;  %v3681_v25 = vld [vmem:[#allocation2 + $0x248] sm:$0xf]  ;;  %v3426_v27 = vor.u32 %v4461_v24, %v3425_v23  ;;  %v4689_v24 = vld [vmem:[#allocation2 + $0x78c] sm:$0xf] }
  0xb0   : > { %v358_v53 = vadd.f32 %v357_v49, %v5000_v10  ;;  %1989 = vmatmul.bf16.gmra.mxu1 %v5032_v46  ;;  %2168 = vmatpush.bf16.msrb.mxu3 %v4322_v47  ;;  %v4290_v10 = vor.u32 %v4677_v1, %v4289_v0  ;;  %v4525_v28 = vld [vmem:[#allocation2 + $0x264] sm:$0xf0]  ;;  %v4505_v49 = vld [vmem:[#allocation2 + $0x1cc] sm:$0xf] }
  0xb1   : > { %v376_v54 = vpop.f32.mrf.mxu3  ;;  %2113 = vmatpush.bf16.msrb.mxu0 %v3490_v55  ;;  %2132 = vmatpush.bf16.msrb.mxu1 %v3746_v60  ;;  %v3969_v29 = vld [vmem:[#allocation2 + $0x488] sm:$0xf]  ;;  %v3682_v31 = vor.u32 %v4525_v28, %v3681_v25  ;;  %v3622_v52 = vor.u32 %v4505_v49, %v3619_v50  ;;  %v4497_v60 = vld [vmem:[#allocation2 + $0x18c] sm:$0xf] }
  0xb2   : > { %v377_v59 = vadd.f32 %v376_v54, %v5004_v16  ;;  %v393_v4 = vmax.f32 %v358_v53, 0.0  ;;  %v3714_v16 = vor.u32 %v4533_v11, %v3713_v6  ;;  %v4597_v15 = vld [vmem:[#allocation2 + $0x4a4] sm:$0xf0]  ;;  %v3875_v53 = vld [vmem:[#allocation2 + $0x3e8] sm:$0xf0] }
  0xb3   : > { %2150 = vmatpush.bf16.msrb.mxu2 %v4034_v62  ;;  %v3970_v32 = vor.u32 %v4597_v15, %v3969_v29  ;;  %v4225_v33 = vld [vmem:[#allocation2 + $0x688] sm:$0xf]  ;;  %v3878_v56 = vor.u32 %v4569_v51, %v3875_v53  ;;  %v3587_v0 = vld [vmem:[#allocation2 + $0x1a8] sm:$0xf0] }
  0xb4   : > { %v394_v8 = vmax.f32 %v377_v59, 0.0  ;;  %v5039_v12 = vpack.c.bf16 %v393_v4, %v389_v3  ;;  %2169 = vmatpush.bf16.msrb.mxu3 %v4290_v10  ;;  %v4661_v34 = vld [vmem:[#allocation2 + $0x6a4] sm:$0xf0]  ;;  %v4561_v1 = vld [vmem:[#allocation2 + $0x38c] sm:$0xf]  ;;  %v3590_v3 = vor.u32 %v4497_v60, %v3587_v0 }
  0xb5   : > { %2114 = vmatpush.bf16.msrb.mxu0 %v3458_v9  ;;  %2133 = vmatpush.bf16.msrb.mxu1 %v3714_v16  ;;  %v3393_v35 = vld [vmem:[#allocation2 + $0x8] sm:$0xf]  ;;  %v4226_v36 = vor.u32 %v4661_v34, %v4225_v33  ;;  %v3846_v4 = vor.u32 %v4561_v1, %v3843_v2  ;;  %v4633_v10 = vld [vmem:[#allocation2 + $0x5cc] sm:$0xf] }
  0xb6   : > { %v5041_v13 = vpack.c.bf16 %v394_v8, %v390_v7  ;;  %2008 = vmatmul.bf16.gmra.mxu2 %v5039_v12  ;;  %v4453_v37 = vld [vmem:[#allocation2 + $0x24] sm:$0xf0]  ;;  %v4697_v6 = vld [vmem:[#allocation2 + $0x7cc] sm:$0xf]  ;;  %v4134_v7 = vor.u32 %v4633_v10, %v4131_v5 }
  0xb7   : > { %2151 = vmatpush.bf16.msrb.mxu2 %v4002_v19  ;;  %v3649_v39 = vld [vmem:[#allocation2 + $0x208] sm:$0xf]  ;;  %v3394_v40 = vor.u32 %v4453_v37, %v3393_v35  ;;  %v4387_v8 = vld [vmem:[#allocation2 + $0x7e8] sm:$0xf0] }
  0xb8   : > { %2027 = vmatmul.bf16.gmra.mxu3 %v5041_v13  ;;  %v4517_v22 = vld [vmem:[#allocation2 + $0x224] sm:$0xf0]  ;;  %v4390_v9 = vor.u32 %v4697_v6, %v4387_v8  ;;  %v4489_v11 = vld [vmem:[#allocation2 + $0x14c] sm:$0xf] }
  0xb9   : > { %2170 = vmatpush.bf16.msrb.mxu3 %v4258_v21  ;;  %2115 = vmatpush.bf16.msrb.mxu0 %v3426_v27  ;;  %v3650_v41 = vor.u32 %v4517_v22, %v3649_v39  ;;  %v3937_v42 = vld [vmem:[#allocation2 + $0x448] sm:$0xf]  ;;  %v3555_v16 = vld [vmem:[#allocation2 + $0x168] sm:$0xf0]  ;;  %v3814_v21 = vor.u32 %v4553_v14, %v3811_v18 }
  0xba   : > { %2134 = vmatpush.bf16.msrb.mxu1 %v3682_v31  ;;  %v4589_v44 = vld [vmem:[#allocation2 + $0x464] sm:$0xf0]  ;;  %v3558_v17 = vor.u32 %v4489_v11, %v3555_v16  ;;  %v4625_v19 = vld [vmem:[#allocation2 + $0x58c] sm:$0xf] }
  0xbb   : > { %v4193_v45 = vld [vmem:[#allocation2 + $0x648] sm:$0xf]  ;;  %2152 = vmatpush.bf16.msrb.mxu2 %v3970_v32  ;;  %v3938_v38 = vor.u32 %v4589_v44, %v3937_v42  ;;  %v4102_v23 = vor.u32 %v4625_v19, %v4099_v20  ;;  %v4355_v25 = vld [vmem:[#allocation2 + $0x7a8] sm:$0xf0] }
  0xbc   : > { %v4653_v47 = vld [vmem:[#allocation2 + $0x664] sm:$0xf0]  ;;  %v4481_v27 = vld [vmem:[#allocation2 + $0x10c] sm:$0xf]  ;;  %v4358_v28 = vor.u32 %v4689_v24, %v4355_v25 }
  0xbd   : > { %2171 = vmatpush.bf16.msrb.mxu3 %v4226_v36  ;;  %v4194_v48 = vor.u32 %v4653_v47, %v4193_v45  ;;  %2116 = vmatpush.bf16.msrb.mxu0 %v3394_v40  ;;  %v3905_v54 = vld [vmem:[#allocation2 + $0x408] sm:$0xf]  ;;  %v3523_v29 = vld [vmem:[#allocation2 + $0x128] sm:$0xf0] }
  0xbe   : > { %2135 = vmatpush.bf16.msrb.mxu1 %v3650_v41  ;;  %v4581_v55 = vld [vmem:[#allocation2 + $0x424] sm:$0xf0]  ;;  %v4545_v15 = vld [vmem:[#allocation2 + $0x30c] sm:$0xf]  ;;  %v3526_v32 = vor.u32 %v4481_v27, %v3523_v29 }
  0xbf   : > { %2041 = vmatmul.bf16.vlgmr.msra.gmra.mxu0 %v5006_v26  ;;  %2153 = vmatpush.bf16.msrb.mxu2 %v3938_v38  ;;  %v3906_v57 = vor.u32 %v4581_v55, %v3905_v54  ;;  %v4161_v58 = vld [vmem:[#allocation2 + $0x608] sm:$0xf]  ;;  %v3779_v31 = vld [vmem:[#allocation2 + $0x328] sm:$0xf0] }
  0xc0   : > { %2060 = vmatmul.bf16.vlgmr.msra.gmra.mxu1 %v5009_v30  ;;  %v4645_v59 = vld [vmem:[#allocation2 + $0x624] sm:$0xf0]  ;;  %v3782_v33 = vor.u32 %v4545_v15, %v3779_v31  ;;  %v4617_v34 = vld [vmem:[#allocation2 + $0x54c] sm:$0xf] }
  0xc1   : > { %2172 = vmatpush.bf16.msrb.mxu3 %v4194_v48  ;;  %2185 = vmatpush.bf16.msra.mxu0 %v3622_v52  ;;  %v4162_v62 = vor.u32 %v4645_v59, %v4161_v58  ;;  %v4067_v35 = vld [vmem:[#allocation2 + $0x568] sm:$0xf0] }
  0xc2   : > { %2204 = vmatpush.bf16.msra.mxu1 %v3878_v56  ;;  %v4681_v36 = vld [vmem:[#allocation2 + $0x74c] sm:$0xf]  ;;  %v4070_v37 = vor.u32 %v4617_v34, %v4067_v35  ;;  %v3881_v34 = vld [vmem:[#allocation2 + $0x3d0] sm:$0xf] }
  0xc3   : > { %2154 = vmatpush.bf16.msrb.mxu2 %v3906_v57  ;;  %v4323_v39 = vld [vmem:[#allocation2 + $0x768] sm:$0xf0] }
  0xc4   : > { %v4326_v22 = vor.u32 %v4681_v36, %v4323_v39  ;;  %v4473_v40 = vld [vmem:[#allocation2 + $0xcc] sm:$0xf]  ;;  %v4574_v36 = vld [vmem:[#allocation2 + $0x3ec] sm:$0xf0] }
  0xc5   : > { %2173 = vmatpush.bf16.msrb.mxu3 %v4162_v62  ;;  %2186 = vmatpush.bf16.msra.mxu0 %v3590_v3  ;;  %v3491_v41 = vld [vmem:[#allocation2 + $0xe8] sm:$0xf0] }
  0xc6   : > { %2079 = vmatmul.bf16.vlgmr.msra.gmra.mxu2 %v5019_v61  ;;  %2205 = vmatpush.bf16.msra.mxu1 %v3846_v4  ;;  %v4537_v42 = vld [vmem:[#allocation2 + $0x2cc] sm:$0xf]  ;;  %v3494_v44 = vor.u32 %v4473_v40, %v3491_v41 }
  0xc7   : > { %2223 = vmatpush.bf16.msra.mxu2 %v4134_v7  ;;  %v3747_v45 = vld [vmem:[#allocation2 + $0x2e8] sm:$0xf0] }
  0xc8   : > { %2098 = vmatmul.bf16.vlgmr.msra.gmra.mxu3 %v5021_v63  ;;  %v4609_v38 = vld [vmem:[#allocation2 + $0x50c] sm:$0xf]  ;;  %v3750_v48 = vor.u32 %v4537_v42, %v3747_v45 }
  0xc9   : > { %2242 = vmatpush.bf16.msra.mxu3 %v4390_v9  ;;  %2187 = vmatpush.bf16.msra.mxu0 %v3558_v17  ;;  %v4035_v47 = vld [vmem:[#allocation2 + $0x528] sm:$0xf0] }
  0xca   : > { %2206 = vmatpush.bf16.msra.mxu1 %v3814_v21  ;;  %v4038_v49 = vor.u32 %v4609_v38, %v4035_v47  ;;  %v4673_v50 = vld [vmem:[#allocation2 + $0x70c] sm:$0xf]  ;;  %v4502_v38 = vld [vmem:[#allocation2 + $0x1ac] sm:$0xf0] }
  0xcb   : > { %2224 = vmatpush.bf16.msra.mxu2 %v4102_v23  ;;  %v4291_v51 = vld [vmem:[#allocation2 + $0x728] sm:$0xf0]  ;;  %v3849_v47 = vld [vmem:[#allocation2 + $0x390] sm:$0xf] }
  0xcc   : > { %v4465_v52 = vld [vmem:[#allocation2 + $0x8c] sm:$0xf]  ;;  %v4294_v53 = vor.u32 %v4673_v50, %v4291_v51  ;;  %v4137_v51 = vld [vmem:[#allocation2 + $0x5d0] sm:$0xf] }
  0xcd   : > { %2243 = vmatpush.bf16.msra.mxu3 %v4358_v28  ;;  %2188 = vmatpush.bf16.msra.mxu0 %v3526_v32  ;;  %v3459_v54 = vld [vmem:[#allocation2 + $0xa8] sm:$0xf0]  ;;  %v3625_v32 = vld [vmem:[#allocation2 + $0x1d0] sm:$0xf] }
  0xce   : > { %2207 = vmatpush.bf16.msra.mxu1 %v3782_v33  ;;  %v4529_v55 = vld [vmem:[#allocation2 + $0x28c] sm:$0xf]  ;;  %v3462_v57 = vor.u32 %v4465_v52, %v3459_v54  ;;  %v4510_v33 = vld [vmem:[#allocation2 + $0x1ec] sm:$0xf0] }
  0xcf   : > { %2046 = vmatmul.bf16.gmra.mxu0 %v5029_v43  ;;  %2225 = vmatpush.bf16.msra.mxu2 %v4070_v37  ;;  %v3715_v56 = vld [vmem:[#allocation2 + $0x2a8] sm:$0xf0]  ;;  %v3626_v35 = vor.u32 %v4510_v33, %v3625_v32  ;;  %v4638_v52 = vld [vmem:[#allocation2 + $0x5ec] sm:$0xf0] }
  0xd0   : > { %2065 = vmatmul.bf16.gmra.mxu1 %v5032_v46  ;;  %v3718_v58 = vor.u32 %v4529_v55, %v3715_v56  ;;  %v4601_v59 = vld [vmem:[#allocation2 + $0x4cc] sm:$0xf]  ;;  %v4138_v54 = vor.u32 %v4638_v52, %v4137_v51  ;;  %v4702_v55 = vld [vmem:[#allocation2 + $0x7ec] sm:$0xf0] }
  0xd1   : > { %2244 = vmatpush.bf16.msra.mxu3 %v4326_v22  ;;  %2189 = vmatpush.bf16.msra.mxu0 %v3494_v44  ;;  %v4003_v60 = vld [vmem:[#allocation2 + $0x4e8] sm:$0xf0]  ;;  %v3882_v22 = vor.u32 %v4574_v36, %v3881_v34  ;;  %v3593_v44 = vld [vmem:[#allocation2 + $0x190] sm:$0xf] }
  0xd2   : > { %2208 = vmatpush.bf16.msra.mxu1 %v3750_v48  ;;  %v4665_v62 = vld [vmem:[#allocation2 + $0x6cc] sm:$0xf]  ;;  %v4006_v0 = vor.u32 %v4601_v59, %v4003_v60  ;;  %v4566_v48 = vld [vmem:[#allocation2 + $0x3ac] sm:$0xf0] }
  0xd3   : > { %2226 = vmatpush.bf16.msra.mxu2 %v4038_v49  ;;  %v4259_v1 = vld [vmem:[#allocation2 + $0x6e8] sm:$0xf0]  ;;  %v3594_v49 = vor.u32 %v4502_v38, %v3593_v44  ;;  %v3850_v50 = vor.u32 %v4566_v48, %v3849_v47  ;;  %v3817_v59 = vld [vmem:[#allocation2 + $0x350] sm:$0xf] }
  0xd4   : > { %v4262_v2 = vor.u32 %v4665_v62, %v4259_v1  ;;  %v4457_v3 = vld [vmem:[#allocation2 + $0x4c] sm:$0xf]  ;;  %v4558_v62 = vld [vmem:[#allocation2 + $0x36c] sm:$0xf0] }
  0xd5   : > { %2245 = vmatpush.bf16.msra.mxu3 %v4294_v53  ;;  %2190 = vmatpush.bf16.msra.mxu0 %v3462_v57  ;;  %v3427_v4 = vld [vmem:[#allocation2 + $0x68] sm:$0xf0]  ;;  %v4393_v53 = vld [vmem:[#allocation2 + $0x7d0] sm:$0xf] }
  0xd6   : > { %2084 = vmatmul.bf16.gmra.mxu2 %v5039_v12  ;;  %2209 = vmatpush.bf16.msra.mxu1 %v3718_v58  ;;  %v4521_v10 = vld [vmem:[#allocation2 + $0x24c] sm:$0xf]  ;;  %v3430_v5 = vor.u32 %v4457_v3, %v3427_v4  ;;  %v4394_v56 = vor.u32 %v4702_v55, %v4393_v53  ;;  %v3561_v57 = vld [vmem:[#allocation2 + $0x150] sm:$0xf] }
  0xd7   : > { %2227 = vmatpush.bf16.msra.mxu2 %v4006_v0  ;;  %v3683_v6 = vld [vmem:[#allocation2 + $0x268] sm:$0xf0]  ;;  %v4494_v58 = vld [vmem:[#allocation2 + $0x16c] sm:$0xf0] }
  0xd8   : > { %2103 = vmatmul.bf16.gmra.mxu3 %v5041_v13  ;;  %v4593_v7 = vld [vmem:[#allocation2 + $0x48c] sm:$0xf]  ;;  %v3686_v9 = vor.u32 %v4521_v10, %v3683_v6  ;;  %v3562_v60 = vor.u32 %v4494_v58, %v3561_v57  ;;  %v4105_v0 = vld [vmem:[#allocation2 + $0x590] sm:$0xf] }
  0xd9   : > { %v3971_v8 = vld [vmem:[#allocation2 + $0x4a8] sm:$0xf0]  ;;  %2246 = vmatpush.bf16.msra.mxu3 %v4262_v2  ;;  %2191 = vmatpush.bf16.msra.mxu0 %v3430_v5  ;;  %v4630_v1 = vld [vmem:[#allocation2 + $0x5ac] sm:$0xf0]  ;;  %v3818_v2 = vor.u32 %v4558_v62, %v3817_v59 }
  0xda   : > { %v3974_v11 = vor.u32 %v4593_v7, %v3971_v8  ;;  %v4657_v16 = vld [vmem:[#allocation2 + $0x68c] sm:$0xf]  ;;  %2210 = vmatpush.bf16.msra.mxu1 %v3686_v9  ;;  %v4106_v3 = vor.u32 %v4630_v1, %v4105_v0  ;;  %v4361_v4 = vld [vmem:[#allocation2 + $0x790] sm:$0xf] }
  0xdb   : > { %v4227_v14 = vld [vmem:[#allocation2 + $0x6a8] sm:$0xf0]  ;;  %v4694_v10 = vld [vmem:[#allocation2 + $0x7ac] sm:$0xf0] }
  0xdc   : > { %v4449_v17 = vld [vmem:[#allocation2 + $0xc] sm:$0xf]  ;;  %v4230_v18 = vor.u32 %v4657_v16, %v4227_v14  ;;  %2228 = vmatpush.bf16.msra.mxu2 %v3974_v11  ;;  %v3529_v5 = vld [vmem:[#allocation2 + $0x110] sm:$0xf]  ;;  %v4362_v6 = vor.u32 %v4694_v10, %v4361_v4 }
  0xdd   : > { %v3395_v19 = vld [vmem:[#allocation2 + $0x28] sm:$0xf0]  ;;  %v4486_v7 = vld [vmem:[#allocation2 + $0x12c] sm:$0xf0] }
  0xde   : > { %v4513_v20 = vld [vmem:[#allocation2 + $0x20c] sm:$0xf]  ;;  %v3398_v23 = vor.u32 %v4449_v17, %v3395_v19  ;;  %2247 = vmatpush.bf16.msra.mxu3 %v4230_v18  ;;  %v3785_v8 = vld [vmem:[#allocation2 + $0x310] sm:$0xf]  ;;  %v3530_v11 = vor.u32 %v4486_v7, %v3529_v5 }
  0xdf   : > { %v3651_v21 = vld [vmem:[#allocation2 + $0x228] sm:$0xf0]  ;;  %2117 = vmatmul.bf16.vlgmr.msrb.gmra.mxu0 %v5006_v26  ;;  %v4550_v9 = vld [vmem:[#allocation2 + $0x32c] sm:$0xf0] }
  0xe0   : > { %v3654_v24 = vor.u32 %v4513_v20, %v3651_v21  ;;  %v4585_v25 = vld [vmem:[#allocation2 + $0x44c] sm:$0xf]  ;;  %2192 = vmatpush.bf16.msra.mxu0 %v3398_v23  ;;  %2136 = vmatmul.bf16.vlgmr.msrb.gmra.mxu1 %v5009_v30  ;;  %v3786_v16 = vor.u32 %v4550_v9, %v3785_v8  ;;  %v4073_v14 = vld [vmem:[#allocation2 + $0x550] sm:$0xf] }
  0xe1   : > { %v3939_v27 = vld [vmem:[#allocation2 + $0x468] sm:$0xf0]  ;;  %v4622_v17 = vld [vmem:[#allocation2 + $0x56c] sm:$0xf0] }
  0xe2   : > { %v4649_v28 = vld [vmem:[#allocation2 + $0x64c] sm:$0xf]  ;;  %v3942_v29 = vor.u32 %v4585_v25, %v3939_v27  ;;  %2211 = vmatpush.bf16.msra.mxu1 %v3654_v24  ;;  %v4329_v18 = vld [vmem:[#allocation2 + $0x750] sm:$0xf]  ;;  %v4074_v19 = vor.u32 %v4622_v17, %v4073_v14  ;;  %v4570_v14 = vld [vmem:[#allocation2 + $0x3d4] sm:$0xf] }
  0xe3   : > { %v4195_v15 = vld [vmem:[#allocation2 + $0x668] sm:$0xf0]  ;;  %v4686_v20 = vld [vmem:[#allocation2 + $0x76c] sm:$0xf0] }
  0xe4   : > { %v4198_v31 = vor.u32 %v4649_v28, %v4195_v15  ;;  %2229 = vmatpush.bf16.msra.mxu2 %v3942_v29  ;;  %v4577_v37 = vld [vmem:[#allocation2 + $0x40c] sm:$0xf]  ;;  %2261 = vmatpush.bf16.msrb.mxu0 %v3626_v35  ;;  %v4330_v21 = vor.u32 %v4686_v20, %v4329_v18  ;;  %v3497_v23 = vld [vmem:[#allocation2 + $0xd0] sm:$0xf]  ;;  %v3883_v18 = vld [vmem:[#allocation2 + $0x3f0] sm:$0xf0] }
  0xe5   : > { %v3907_v39 = vld [vmem:[#allocation2 + $0x428] sm:$0xf0]  ;;  %v4478_v24 = vld [vmem:[#allocation2 + $0xec] sm:$0xf0] }
  0xe6   : > { %2248 = vmatpush.bf16.msra.mxu3 %v4198_v31  ;;  %v3910_v40 = vor.u32 %v4577_v37, %v3907_v39  ;;  %v4641_v41 = vld [vmem:[#allocation2 + $0x60c] sm:$0xf]  ;;  %2280 = vmatpush.bf16.msrb.mxu1 %v3882_v22  ;;  %v3753_v25 = vld [vmem:[#allocation2 + $0x2d0] sm:$0xf]  ;;  %v3498_v27 = vor.u32 %v4478_v24, %v3497_v23 }
  0xe7   : > { %v4163_v42 = vld [vmem:[#allocation2 + $0x628] sm:$0xf0]  ;;  %2155 = vmatmul.bf16.vlgmr.msrb.gmra.mxu2 %v5019_v61  ;;  %v4542_v28 = vld [vmem:[#allocation2 + $0x2ec] sm:$0xf0] }
  0xe8   : > { %v4166_v45 = vor.u32 %v4641_v41, %v4163_v42  ;;  %2230 = vmatpush.bf16.msra.mxu2 %v3910_v40  ;;  %2262 = vmatpush.bf16.msrb.mxu0 %v3594_v49  ;;  %v4041_v29 = vld [vmem:[#allocation2 + $0x510] sm:$0xf]  ;;  %v3754_v31 = vor.u32 %v4542_v28, %v3753_v25  ;;  %v4498_v28 = vld [vmem:[#allocation2 + $0x194] sm:$0xf] }
  0xe9   : > { %2174 = vmatmul.bf16.vlgmr.msrb.gmra.mxu3 %v5021_v63  ;;  %v4614_v15 = vld [vmem:[#allocation2 + $0x52c] sm:$0xf0] }
  0xea   : > { %2249 = vmatpush.bf16.msra.mxu3 %v4166_v45  ;;  %2281 = vmatpush.bf16.msrb.mxu1 %v3850_v50  ;;  %v4042_v32 = vor.u32 %v4614_v15, %v4041_v29  ;;  %v4297_v33 = vld [vmem:[#allocation2 + $0x710] sm:$0xf]  ;;  %v3595_v29 = vld [vmem:[#allocation2 + $0x1b0] sm:$0xf0] }
  0xeb   : > { %v4678_v34 = vld [vmem:[#allocation2 + $0x72c] sm:$0xf0]  ;;  %v4562_v15 = vld [vmem:[#allocation2 + $0x394] sm:$0xf] }
  0xec   : > { %2299 = vmatpush.bf16.msrb.mxu2 %v4138_v54  ;;  %2263 = vmatpush.bf16.msrb.mxu0 %v3562_v60  ;;  %v3465_v35 = vld [vmem:[#allocation2 + $0x90] sm:$0xf]  ;;  %v4298_v36 = vor.u32 %v4678_v34, %v4297_v33  ;;  %v4634_v34 = vld [vmem:[#allocation2 + $0x5d4] sm:$0xf] }
  0xed   : > { %v4470_v37 = vld [vmem:[#allocation2 + $0xac] sm:$0xf0] }
  0xee   : > { %2318 = vmatpush.bf16.msrb.mxu3 %v4394_v56  ;;  %2282 = vmatpush.bf16.msrb.mxu1 %v3818_v2  ;;  %v3721_v39 = vld [vmem:[#allocation2 + $0x290] sm:$0xf]  ;;  %v3466_v40 = vor.u32 %v4470_v37, %v3465_v35  ;;  %v4139_v35 = vld [vmem:[#allocation2 + $0x5f0] sm:$0xf0] }
  0xef   : > { %2122 = vmatmul.bf16.gmra.mxu0 %v5029_v43  ;;  %v4534_v22 = vld [vmem:[#allocation2 + $0x2ac] sm:$0xf0]  ;;  %v4142_v37 = vor.u32 %v4634_v34, %v4139_v35  ;;  %v4522_v34 = vld [vmem:[#allocation2 + $0x254] sm:$0xf] }
  0xf0   : > { %2300 = vmatpush.bf16.msrb.mxu2 %v4106_v3  ;;  %2264 = vmatpush.bf16.msrb.mxu0 %v3530_v11  ;;  %v3722_v41 = vor.u32 %v4534_v22, %v3721_v39  ;;  %v4009_v42 = vld [vmem:[#allocation2 + $0x4d0] sm:$0xf]  ;;  %v4506_v11 = vld [vmem:[#allocation2 + $0x1d4] sm:$0xf] }
  0xf1   : > { %2141 = vmatmul.bf16.gmra.mxu1 %v5032_v46  ;;  %v4606_v44 = vld [vmem:[#allocation2 + $0x4ec] sm:$0xf0]  ;;  %v4395_v39 = vld [vmem:[#allocation2 + $0x7f0] sm:$0xf0] }
  0xf2   : > { %2319 = vmatpush.bf16.msrb.mxu3 %v4362_v6  ;;  %2283 = vmatpush.bf16.msrb.mxu1 %v3786_v16  ;;  %v4265_v45 = vld [vmem:[#allocation2 + $0x6d0] sm:$0xf]  ;;  %v4010_v38 = vor.u32 %v4606_v44, %v4009_v42  ;;  %v3627_v16 = vld [vmem:[#allocation2 + $0x1f0] sm:$0xf0] }
  0xf3   : > { %v4670_v47 = vld [vmem:[#allocation2 + $0x6ec] sm:$0xf0]  ;;  %v3630_v17 = vor.u32 %v4506_v11, %v3627_v16  ;;  %v4554_v42 = vld [vmem:[#allocation2 + $0x354] sm:$0xf] }
  0xf4   : > { %2301 = vmatpush.bf16.msrb.mxu2 %v4074_v19  ;;  %2265 = vmatpush.bf16.msrb.mxu0 %v3498_v27  ;;  %v4266_v48 = vor.u32 %v4670_v47, %v4265_v45  ;;  %v3433_v49 = vld [vmem:[#allocation2 + $0x50] sm:$0xf]  ;;  %v3819_v45 = vld [vmem:[#allocation2 + $0x370] sm:$0xf0] }
  0xf5   : > { %v4462_v50 = vld [vmem:[#allocation2 + $0x6c] sm:$0xf0]  ;;  %v4626_v47 = vld [vmem:[#allocation2 + $0x594] sm:$0xf] }
  0xf6   : > { %2320 = vmatpush.bf16.msrb.mxu3 %v4330_v21  ;;  %2284 = vmatpush.bf16.msrb.mxu1 %v3754_v31  ;;  %v3689_v51 = vld [vmem:[#allocation2 + $0x250] sm:$0xf]  ;;  %v3434_v52 = vor.u32 %v4462_v50, %v3433_v49  ;;  %v3886_v21 = vor.u32 %v4570_v14, %v3883_v18  ;;  %v3598_v31 = vor.u32 %v4498_v28, %v3595_v29  ;;  %v4690_v49 = vld [vmem:[#allocation2 + $0x794] sm:$0xf] }
  0xf7   : > { %2160 = vmatmul.bf16.gmra.mxu2 %v5039_v12  ;;  %v4526_v53 = vld [vmem:[#allocation2 + $0x26c] sm:$0xf0]  ;;  %v4674_v11 = vld [vmem:[#allocation2 + $0x714] sm:$0xf] }
  0xf8   : > { %2302 = vmatpush.bf16.msrb.mxu2 %v4042_v32  ;;  %2266 = vmatpush.bf16.msrb.mxu0 %v3466_v40  ;;  %v3977_v54 = vld [vmem:[#allocation2 + $0x490] sm:$0xf]  ;;  %v3690_v56 = vor.u32 %v4526_v53, %v3689_v51  ;;  %v3851_v32 = vld [vmem:[#allocation2 + $0x3b0] sm:$0xf0] }
  0xf9   : > { %2179 = vmatmul.bf16.gmra.mxu3 %v5041_v13  ;;  %v4598_v55 = vld [vmem:[#allocation2 + $0x4ac] sm:$0xf0]  ;;  %v3854_v33 = vor.u32 %v4562_v15, %v3851_v32  ;;  %v4490_v40 = vld [vmem:[#allocation2 + $0x154] sm:$0xf] }
  0xfa   : > { %2321 = vmatpush.bf16.msrb.mxu3 %v4298_v36  ;;  %2285 = vmatpush.bf16.msrb.mxu1 %v3722_v41  ;;  %v3978_v57 = vor.u32 %v4598_v55, %v3977_v54  ;;  %v4233_v58 = vld [vmem:[#allocation2 + $0x690] sm:$0xf]  ;;  %v4698_v36 = vld [vmem:[#allocation2 + $0x7d4] sm:$0xf] }
  0xfb   : > { %v4662_v59 = vld [vmem:[#allocation2 + $0x6ac] sm:$0xf0]  ;;  %v4398_v22 = vor.u32 %v4698_v36, %v4395_v39  ;;  %v3563_v41 = vld [vmem:[#allocation2 + $0x170] sm:$0xf0] }
  0xfc   : > { %2303 = vmatpush.bf16.msrb.mxu2 %v4010_v38  ;;  %2267 = vmatpush.bf16.msrb.mxu0 %v3434_v52  ;;  %v4234_v60 = vor.u32 %v4662_v59, %v4233_v58  ;;  %v3401_v62 = vld [vmem:[#allocation2 + $0x10] sm:$0xf]  ;;  %v3566_v44 = vor.u32 %v4490_v40, %v3563_v41  ;;  %v3822_v38 = vor.u32 %v4554_v42, %v3819_v45  ;;  %v4363_v51 = vld [vmem:[#allocation2 + $0x7b0] sm:$0xf0] }
  0xfd   : > { %v4454_v0 = vld [vmem:[#allocation2 + $0x2c] sm:$0xf0]  ;;  %v4366_v52 = vor.u32 %v4690_v49, %v4363_v51  ;;  %v4482_v53 = vld [vmem:[#allocation2 + $0x114] sm:$0xf]  ;;  %v5072_v51 = vld [vmem:[%s5407_s4] sm:$0xff] }
  0xfe   : > { %2322 = vmatpush.bf16.msrb.mxu3 %v4266_v48  ;;  %2286 = vmatpush.bf16.msrb.mxu1 %v3690_v56  ;;  %v3657_v1 = vld [vmem:[#allocation2 + $0x210] sm:$0xf]  ;;  %v3402_v2 = vor.u32 %v4454_v0, %v3401_v62  ;;  %v4107_v48 = vld [vmem:[#allocation2 + $0x5b0] sm:$0xf0] }
  0xff   : > { %v4518_v3 = vld [vmem:[#allocation2 + $0x22c] sm:$0xf0]  ;;  %2193 = vmatmul.bf16.vlgmr.msra.gmra.mxu0 %v5006_v26  ;;  %v4110_v50 = vor.u32 %v4626_v47, %v4107_v48  ;;  %v3531_v54 = vld [vmem:[#allocation2 + $0x130] sm:$0xf0] }
 0x100   : > { %2304 = vmatpush.bf16.msrb.mxu2 %v3978_v57  ;;  %v3658_v4 = vor.u32 %v4518_v3, %v3657_v1  ;;  %v3945_v10 = vld [vmem:[#allocation2 + $0x450] sm:$0xf]  ;;  %2268 = vmatpush.bf16.msrb.mxu0 %v3402_v2  ;;  %v4546_v55 = vld [vmem:[#allocation2 + $0x314] sm:$0xf]  ;;  %v3534_v56 = vor.u32 %v4482_v53, %v3531_v54 }
 0x101   : > { %v4590_v5 = vld [vmem:[#allocation2 + $0x46c] sm:$0xf0]  ;;  %2212 = vmatmul.bf16.vlgmr.msra.gmra.mxu1 %v5009_v30  ;;  %v3787_v57 = vld [vmem:[#allocation2 + $0x330] sm:$0xf0] }
 0x102   : > { %2323 = vmatpush.bf16.msrb.mxu3 %v4234_v60  ;;  %v4201_v6 = vld [vmem:[#allocation2 + $0x650] sm:$0xf]  ;;  %v3946_v7 = vor.u32 %v4590_v5, %v3945_v10  ;;  %2287 = vmatpush.bf16.msrb.mxu1 %v3658_v4  ;;  %v3790_v58 = vor.u32 %v4546_v55, %v3787_v57  ;;  %v4618_v59 = vld [vmem:[#allocation2 + $0x554] sm:$0xf] }
 0x103   : > { %v4654_v8 = vld [vmem:[#allocation2 + $0x66c] sm:$0xf0]  ;;  %v4075_v60 = vld [vmem:[#allocation2 + $0x570] sm:$0xf0] }
 0x104   : > { %v4202_v9 = vor.u32 %v4654_v8, %v4201_v6  ;;  %2305 = vmatpush.bf16.msrb.mxu2 %v3946_v7  ;;  %v3913_v19 = vld [vmem:[#allocation2 + $0x410] sm:$0xf]  ;;  %2337 = vmatpush.bf16.msra.mxu0 %v3630_v17  ;;  %v4682_v62 = vld [vmem:[#allocation2 + $0x754] sm:$0xf]  ;;  %v4078_v0 = vor.u32 %v4618_v59, %v4075_v60  ;;  %v3633_v60 = vld [vmem:[#allocation2 + $0x1d8] sm:$0xf] }
 0x105   : > { %v4582_v20 = vld [vmem:[#allocation2 + $0x42c] sm:$0xf0]  ;;  %v4331_v1 = vld [vmem:[#allocation2 + $0x770] sm:$0xf0] }
 0x106   : > { %2324 = vmatpush.bf16.msrb.mxu3 %v4202_v9  ;;  %v3914_v23 = vor.u32 %v4582_v20, %v3913_v19  ;;  %v4169_v24 = vld [vmem:[#allocation2 + $0x610] sm:$0xf]  ;;  %2356 = vmatpush.bf16.msra.mxu1 %v3886_v21  ;;  %v4334_v2 = vor.u32 %v4682_v62, %v4331_v1  ;;  %v4474_v3 = vld [vmem:[#allocation2 + $0xd4] sm:$0xf]  ;;  %v4511_v62 = vld [vmem:[#allocation2 + $0x1f4] sm:$0xf0] }
 0x107   : > { %v4646_v25 = vld [vmem:[#allocation2 + $0x62c] sm:$0xf0]  ;;  %2231 = vmatmul.bf16.vlgmr.msra.gmra.mxu2 %v5019_v61  ;;  %v3499_v4 = vld [vmem:[#allocation2 + $0xf0] sm:$0xf0]  ;;  %v5076_v1 = vperm.slane %v5072_v51, 0 }
 0x108   : > { %v4170_v27 = vor.u32 %v4646_v25, %v4169_v24  ;;  %2306 = vmatpush.bf16.msrb.mxu2 %v3914_v23  ;;  %2338 = vmatpush.bf16.msra.mxu0 %v3598_v31  ;;  %v4538_v10 = vld [vmem:[#allocation2 + $0x2d4] sm:$0xf]  ;;  %v3502_v5 = vor.u32 %v4474_v3, %v3499_v4  ;;  %v4575_v3 = vld [vmem:[#allocation2 + $0x3f4] sm:$0xf0] }
 0x109   : > { %2250 = vmatmul.bf16.vlgmr.msra.gmra.mxu3 %v5021_v63  ;;  %v3755_v6 = vld [vmem:[#allocation2 + $0x2f0] sm:$0xf0] }
 0x10a   : > { %2325 = vmatpush.bf16.msrb.mxu3 %v4170_v27  ;;  %2357 = vmatpush.bf16.msra.mxu1 %v3854_v33  ;;  %v3758_v7 = vor.u32 %v4538_v10, %v3755_v6  ;;  %v4610_v8 = vld [vmem:[#allocation2 + $0x514] sm:$0xf] }
 0x10b   : > { %v4043_v9 = vld [vmem:[#allocation2 + $0x530] sm:$0xf0] }
 0x10c   : > { %2375 = vmatpush.bf16.msra.mxu2 %v4142_v37  ;;  %2339 = vmatpush.bf16.msra.mxu0 %v3566_v44  ;;  %v4046_v16 = vor.u32 %v4610_v8, %v4043_v9  ;;  %v4299_v14 = vld [vmem:[#allocation2 + $0x730] sm:$0xf0] }
 0x10d   : > { %v4302_v17 = vor.u32 %v4674_v11, %v4299_v14  ;;  %v4466_v18 = vld [vmem:[#allocation2 + $0x94] sm:$0xf]  ;;  %v3601_v11 = vld [vmem:[#allocation2 + $0x198] sm:$0xf] }
 0x10e   : > { %2394 = vmatpush.bf16.msra.mxu3 %v4398_v22  ;;  %2358 = vmatpush.bf16.msra.mxu1 %v3822_v38  ;;  %v3467_v19 = vld [vmem:[#allocation2 + $0xb0] sm:$0xf0]  ;;  %v3857_v14 = vld [vmem:[#allocation2 + $0x398] sm:$0xf] }
 0x10f   : > { %2198 = vmatmul.bf16.gmra.mxu0 %v5029_v43  ;;  %v4530_v20 = vld [vmem:[#allocation2 + $0x294] sm:$0xf]  ;;  %v3470_v21 = vor.u32 %v4466_v18, %v3467_v19 }
 0x110   : > { %2376 = vmatpush.bf16.msra.mxu2 %v4110_v50  ;;  %2340 = vmatpush.bf16.msra.mxu0 %v3534_v56  ;;  %v3723_v23 = vld [vmem:[#allocation2 + $0x2b0] sm:$0xf0] }
 0x111   : > { %2217 = vmatmul.bf16.gmra.mxu1 %v5032_v46  ;;  %v3726_v24 = vor.u32 %v4530_v20, %v3723_v23  ;;  %v4602_v25 = vld [vmem:[#allocation2 + $0x4d4] sm:$0xf]  ;;  %v4567_v20 = vld [vmem:[#allocation2 + $0x3b4] sm:$0xf0] }
 0x112   : > { %2395 = vmatpush.bf16.msra.mxu3 %v4366_v52  ;;  %2359 = vmatpush.bf16.msra.mxu1 %v3790_v58  ;;  %v4011_v27 = vld [vmem:[#allocation2 + $0x4f0] sm:$0xf0]  ;;  %v3858_v23 = vor.u32 %v4567_v20, %v3857_v14  ;;  %v4049_v14 = vld [vmem:[#allocation2 + $0x518] sm:$0xf] }
 0x113   : > { %v4666_v28 = vld [vmem:[#allocation2 + $0x6d4] sm:$0xf]  ;;  %v4014_v29 = vor.u32 %v4602_v25, %v4011_v27  ;;  %v4639_v25 = vld [vmem:[#allocation2 + $0x5f4] sm:$0xf0] }
 0x114   : > { %2377 = vmatpush.bf16.msra.mxu2 %v4078_v0  ;;  %2341 = vmatpush.bf16.msra.mxu0 %v3502_v5  ;;  %v4267_v15 = vld [vmem:[#allocation2 + $0x6f0] sm:$0xf0]  ;;  %v3889_v0 = vld [vmem:[#allocation2 + $0x3d8] sm:$0xf] }
 0x115   : > { %v4270_v31 = vor.u32 %v4666_v28, %v4267_v15  ;;  %v4458_v32 = vld [vmem:[#allocation2 + $0x54] sm:$0xf]  ;;  %v3890_v4 = vor.u32 %v4575_v3, %v3889_v0  ;;  %v4401_v27 = vld [vmem:[#allocation2 + $0x7d8] sm:$0xf] }
 0x116   : > { %2396 = vmatpush.bf16.msra.mxu3 %v4334_v2  ;;  %2360 = vmatpush.bf16.msra.mxu1 %v3758_v7  ;;  %v3435_v33 = vld [vmem:[#allocation2 + $0x70] sm:$0xf0]  ;;  %v3634_v2 = vor.u32 %v4511_v62, %v3633_v60  ;;  %v4623_v60 = vld [vmem:[#allocation2 + $0x574] sm:$0xf0] }
 0x117   : > { %2236 = vmatmul.bf16.gmra.mxu2 %v5039_v12  ;;  %v3438_v35 = vor.u32 %v4458_v32, %v3435_v33  ;;  %v3691_v36 = vld [vmem:[#allocation2 + $0x270] sm:$0xf0]  ;;  %v4495_v32 = vld [vmem:[#allocation2 + $0x174] sm:$0xf0] }
 0x118   : > { %2378 = vmatpush.bf16.msra.mxu2 %v4046_v16  ;;  %2342 = vmatpush.bf16.msra.mxu0 %v3470_v21  ;;  %v3694_v37 = vor.u32 %v4522_v34, %v3691_v36  ;;  %v4594_v39 = vld [vmem:[#allocation2 + $0x494] sm:$0xf]  ;;  %v4503_v16 = vld [vmem:[#allocation2 + $0x1b4] sm:$0xf0] }
 0x119   : > { %2255 = vmatmul.bf16.gmra.mxu3 %v5041_v13  ;;  %v3979_v22 = vld [vmem:[#allocation2 + $0x4b0] sm:$0xf0]  ;;  %v3602_v19 = vor.u32 %v4503_v16, %v3601_v11  ;;  %v3825_v33 = vld [vmem:[#allocation2 + $0x358] sm:$0xf] }
 0x11a   : > { %2397 = vmatpush.bf16.msra.mxu3 %v4302_v17  ;;  %2361 = vmatpush.bf16.msra.mxu1 %v3726_v24  ;;  %v4658_v40 = vld [vmem:[#allocation2 + $0x694] sm:$0xf]  ;;  %v3982_v41 = vor.u32 %v4594_v39, %v3979_v22  ;;  %v4145_v24 = vld [vmem:[#allocation2 + $0x5d8] sm:$0xf] }
 0x11b   : > { %v4235_v42 = vld [vmem:[#allocation2 + $0x6b0] sm:$0xf0]  ;;  %v4146_v28 = vor.u32 %v4639_v25, %v4145_v24  ;;  %v4559_v36 = vld [vmem:[#allocation2 + $0x374] sm:$0xf0] }
 0x11c   : > { %2379 = vmatpush.bf16.msra.mxu2 %v4014_v29  ;;  %2343 = vmatpush.bf16.msra.mxu0 %v3438_v35  ;;  %v4238_v44 = vor.u32 %v4658_v40, %v4235_v42  ;;  %v4450_v45 = vld [vmem:[#allocation2 + $0x14] sm:$0xf]  ;;  %v1966_v48 = vpop.f32.mrf.mxu0  ;;  %v4703_v29 = vld [vmem:[#allocation2 + $0x7f4] sm:$0xf0]  ;;  %v3826_v39 = vor.u32 %v4559_v36, %v3825_v33 }
 0x11d   : > { %v3403_v38 = vld [vmem:[#allocation2 + $0x30] sm:$0xf0]  ;;  %v1985_v52 = vpop.f32.mrf.mxu1  ;;  %v1967_v17 = vadd.f32 %v1966_v48, %v5076_v1  ;;  %v4402_v15 = vor.u32 %v4703_v29, %v4401_v27  ;;  %v4113_v22 = vld [vmem:[#allocation2 + $0x598] sm:$0xf] }
 0x11e   : > { %2398 = vmatpush.bf16.msra.mxu3 %v4270_v31  ;;  %2362 = vmatpush.bf16.msra.mxu1 %v3694_v37  ;;  %v4514_v47 = vld [vmem:[#allocation2 + $0x214] sm:$0xf]  ;;  %v3406_v49 = vor.u32 %v4450_v45, %v3403_v38  ;;  %v3569_v31 = vld [vmem:[#allocation2 + $0x158] sm:$0xf] }
 0x11f   : > { %v3659_v50 = vld [vmem:[#allocation2 + $0x230] sm:$0xf0]  ;;  %2269 = vmatmul.bf16.vlgmr.msrb.gmra.mxu0 %v5006_v26  ;;  %v1986_v34 = vadd.f32 %v1985_v52, %v1967_v17  ;;  %v3570_v35 = vor.u32 %v4495_v32, %v3569_v31  ;;  %v4631_v40 = vld [vmem:[#allocation2 + $0x5b4] sm:$0xf0] }
 0x120   : > { %2380 = vmatpush.bf16.msra.mxu2 %v3982_v41  ;;  %v3662_v53 = vor.u32 %v4514_v47, %v3659_v50  ;;  %v4586_v54 = vld [vmem:[#allocation2 + $0x454] sm:$0xf]  ;;  %2344 = vmatpush.bf16.msra.mxu0 %v3406_v49  ;;  %v4369_v41 = vld [vmem:[#allocation2 + $0x798] sm:$0xf]  ;;  %v4114_v45 = vor.u32 %v4631_v40, %v4113_v22 }
 0x121   : > { %v3947_v55 = vld [vmem:[#allocation2 + $0x470] sm:$0xf0]  ;;  %2288 = vmatmul.bf16.vlgmr.msrb.gmra.mxu1 %v5009_v30  ;;  %v4695_v38 = vld [vmem:[#allocation2 + $0x7b4] sm:$0xf0] }
 0x122   : > { %2399 = vmatpush.bf16.msra.mxu3 %v4238_v44  ;;  %v3950_v56 = vor.u32 %v4586_v54, %v3947_v55  ;;  %v4650_v57 = vld [vmem:[#allocation2 + $0x654] sm:$0xf]  ;;  %2363 = vmatpush.bf16.msra.mxu1 %v3662_v53  ;;  %v4370_v47 = vor.u32 %v4695_v38, %v4369_v41  ;;  %v3537_v48 = vld [vmem:[#allocation2 + $0x118] sm:$0xf] }
 0x123   : > { %v4203_v58 = vld [vmem:[#allocation2 + $0x670] sm:$0xf0]  ;;  %v4487_v49 = vld [vmem:[#allocation2 + $0x134] sm:$0xf0] }
 0x124   : > { %v4206_v59 = vor.u32 %v4650_v57, %v4203_v58  ;;  %2381 = vmatpush.bf16.msra.mxu2 %v3950_v56  ;;  %v4578_v10 = vld [vmem:[#allocation2 + $0x414] sm:$0xf]  ;;  %2413 = vmatpush.bf16.msrb.mxu0 %v3634_v2  ;;  %v1968_v18 = vpop.f32.mrf.mxu0  ;;  %v3793_v50 = vld [vmem:[#allocation2 + $0x318] sm:$0xf]  ;;  %v3538_v55 = vor.u32 %v4487_v49, %v3537_v48 }
 0x125   : > { %v3915_v5 = vld [vmem:[#allocation2 + $0x430] sm:$0xf0]  ;;  %v1987_v21 = vpop.f32.mrf.mxu1  ;;  %v1969_v52 = vadd.f32 %v1968_v18, %v5076_v1  ;;  %v4551_v56 = vld [vmem:[#allocation2 + $0x334] sm:$0xf0] }
 0x126   : > { %2400 = vmatpush.bf16.msra.mxu3 %v4206_v59  ;;  %v4642_v6 = vld [vmem:[#allocation2 + $0x614] sm:$0xf]  ;;  %v3918_v7 = vor.u32 %v4578_v10, %v3915_v5  ;;  %2432 = vmatpush.bf16.msrb.mxu1 %v3890_v4  ;;  %v3794_v58 = vor.u32 %v4551_v56, %v3793_v50  ;;  %v4081_v59 = vld [vmem:[#allocation2 + $0x558] sm:$0xf] }
 0x127   : > { %v4171_v8 = vld [vmem:[#allocation2 + $0x630] sm:$0xf0]  ;;  %2307 = vmatmul.bf16.vlgmr.msrb.gmra.mxu2 %v5019_v61  ;;  %v4337_v62 = vld [vmem:[#allocation2 + $0x758] sm:$0xf]  ;;  %v4082_v2 = vor.u32 %v4623_v60, %v4081_v59 }
 0x128   : > { %v4174_v9 = vor.u32 %v4642_v6, %v4171_v8  ;;  %2382 = vmatpush.bf16.msra.mxu2 %v3918_v7  ;;  %2414 = vmatpush.bf16.msrb.mxu0 %v3602_v19  ;;  %v4687_v3 = vld [vmem:[#allocation2 + $0x774] sm:$0xf0]  ;;  %v1988_v7 = vadd.f32 %v1987_v21, %v1969_v52 }
 0x129   : > { %2326 = vmatmul.bf16.vlgmr.msrb.gmra.mxu3 %v5021_v63  ;;  %v2004_v37 = vpop.f32.mrf.mxu2  ;;  %v4338_v4 = vor.u32 %v4687_v3, %v4337_v62  ;;  %v3505_v10 = vld [vmem:[#allocation2 + $0xd8] sm:$0xf] }
 0x12a   : > { %2401 = vmatpush.bf16.msra.mxu3 %v4174_v9  ;;  %2433 = vmatpush.bf16.msrb.mxu1 %v3858_v23  ;;  %v2005_v42 = vadd.f32 %v2004_v37, %v1986_v34  ;;  %v2023_v44 = vpop.f32.mrf.mxu3  ;;  %v4479_v5 = vld [vmem:[#allocation2 + $0xf4] sm:$0xf0] }
 0x12b   : > { %v3761_v6 = vld [vmem:[#allocation2 + $0x2d8] sm:$0xf]  ;;  %v3506_v8 = vor.u32 %v4479_v5, %v3505_v10 }
 0x12c   : > { %2451 = vmatpush.bf16.msrb.mxu2 %v4146_v28  ;;  %2415 = vmatpush.bf16.msrb.mxu0 %v3570_v35  ;;  %v2024_v53 = vadd.f32 %v2023_v44, %v2005_v42  ;;  %v1971_v54 = vpop.f32.mrf.mxu0  ;;  %v4543_v9 = vld [vmem:[#allocation2 + $0x2f4] sm:$0xf0] }
 0x12d   : > { %v1990_v57 = vpop.f32.mrf.mxu1  ;;  %v3762_v16 = vor.u32 %v4543_v9, %v3761_v6  ;;  %v4615_v17 = vld [vmem:[#allocation2 + $0x534] sm:$0xf0]  ;;  %v1972_v29 = vadd.f32 %v1971_v54, %v5076_v1 }
 0x12e   : > { %2470 = vmatpush.bf16.msrb.mxu3 %v4402_v15  ;;  %2434 = vmatpush.bf16.msrb.mxu1 %v3826_v39  ;;  %v4407_v0 = vmul.f32 -1.442695, %v2024_v53  ;;  %v4305_v18 = vld [vmem:[#allocation2 + $0x718] sm:$0xf]  ;;  %v4050_v23 = vor.u32 %v4615_v17, %v4049_v14 }
 0x12f   : > { %2274 = vmatmul.bf16.gmra.mxu0 %v5029_v43  ;;  %v4679_v24 = vld [vmem:[#allocation2 + $0x734] sm:$0xf0]  ;;  %v1991_v48 = vadd.f32 %v1990_v57, %v1972_v29 }
 0x130   : > { %2452 = vmatpush.bf16.msrb.mxu2 %v4114_v45  ;;  %2416 = vmatpush.bf16.msrb.mxu0 %v3538_v55  ;;  %4725 = vpow2.f32 %v4407_v0  ;;  %v4306_v25 = vor.u32 %v4679_v24, %v4305_v18  ;;  %v3473_v21 = vld [vmem:[#allocation2 + $0x98] sm:$0xf] }
 0x131   : > { %2293 = vmatmul.bf16.gmra.mxu1 %v5032_v46  ;;  %v2006_v11 = vpop.f32.mrf.mxu2  ;;  %v4471_v27 = vld [vmem:[#allocation2 + $0xb4] sm:$0xf0] }
 0x132   : > { %2471 = vmatpush.bf16.msrb.mxu3 %v4370_v47  ;;  %2435 = vmatpush.bf16.msrb.mxu1 %v3794_v58  ;;  %v2007_v19 = vadd.f32 %v2006_v11, %v1988_v7  ;;  %v2025_v20 = vpop.f32.mrf.mxu3  ;;  %v3729_v28 = vld [vmem:[#allocation2 + $0x298] sm:$0xf]  ;;  %v3474_v32 = vor.u32 %v4471_v27, %v3473_v21  ;;  %v4507_v27 = vld [vmem:[#allocation2 + $0x1dc] sm:$0xf] }
 0x133   : > { %v4535_v33 = vld [vmem:[#allocation2 + $0x2b4] sm:$0xf0] }
 0x134   : > { %2453 = vmatpush.bf16.msrb.mxu2 %v4082_v2  ;;  %2417 = vmatpush.bf16.msrb.mxu0 %v3506_v8  ;;  %v2026_v15 = vadd.f32 %v2025_v20, %v2007_v19  ;;  %v1973_v31 = vpop.f32.mrf.mxu0  ;;  %v3730_v35 = vor.u32 %v4535_v33, %v3729_v28  ;;  %v4017_v36 = vld [vmem:[#allocation2 + $0x4d8] sm:$0xf]  ;;  %v3635_v28 = vld [vmem:[#allocation2 + $0x1f8] sm:$0xf0] }
 0x135   : > { %v5086_v34 = vpop.f32.mrf.mxu1  ;;  %v4607_v37 = vld [vmem:[#allocation2 + $0x4f4] sm:$0xf0]  ;;  %v3891_v33 = vld [vmem:[#allocation2 + $0x3f8] sm:$0xf0] }
 0x136   : > { %2472 = vmatpush.bf16.msrb.mxu3 %v4338_v4  ;;  %2436 = vmatpush.bf16.msrb.mxu1 %v3762_v16  ;;  %v4273_v39 = vld [vmem:[#allocation2 + $0x6d8] sm:$0xf]  ;;  %v4726_v22 = vpop.eup %4725  ;;  %v4415_v40 = vmul.f32 -1.442695, %v2026_v15  ;;  %v4018_v41 = vor.u32 %v4607_v37, %v4017_v36  ;;  %v1974_v4 = vadd.f32 %v1973_v31, %v5076_v1  ;;  %v3638_v31 = vor.u32 %v4507_v27, %v3635_v28  ;;  %v4555_v27 = vld [vmem:[#allocation2 + $0x35c] sm:$0xf] }
 0x137   : > { %2312 = vmatmul.bf16.gmra.mxu2 %v5039_v12  ;;  %v4671_v42 = vld [vmem:[#allocation2 + $0x6f4] sm:$0xf0]  ;;  %v5089_v44 = vadd.f32 1.0, %v4726_v22  ;;  %v3827_v28 = vld [vmem:[#allocation2 + $0x378] sm:$0xf0] }
 0x138   : > { %2454 = vmatpush.bf16.msrb.mxu2 %v4050_v23  ;;  %2418 = vmatpush.bf16.msrb.mxu0 %v3474_v32  ;;  %v4274_v45 = vor.u32 %v4671_v42, %v4273_v39  ;;  %v3441_v38 = vld [vmem:[#allocation2 + $0x58] sm:$0xf]  ;;  %4727 = vpow2.f32 %v4415_v40  ;;  %v1993_v15 = vadd.f32 %v5086_v34, %v1974_v4  ;;  %v4571_v32 = vld [vmem:[#allocation2 + $0x3dc] sm:$0xf] }
 0x139   : > { %2331 = vmatmul.bf16.gmra.mxu3 %v5041_v13  ;;  %v4463_v47 = vld [vmem:[#allocation2 + $0x74] sm:$0xf0]  ;;  %4729 = vrcp.f32 %v5089_v44  ;;  %v2009_v53 = vpop.f32.mrf.mxu2  ;;  %v3894_v34 = vor.u32 %v4571_v32, %v3891_v33  ;;  %vm2698_vm2 = vweird.f32 %v5089_v44  ;;  %v4115_v32 = vld [vmem:[#allocation2 + $0x5b8] sm:$0xf0] }
 0x13a   : > { %2473 = vmatpush.bf16.msrb.mxu3 %v4306_v25  ;;  %2437 = vmatpush.bf16.msrb.mxu1 %v3730_v35  ;;  %v3442_v49 = vor.u32 %v4463_v47, %v3441_v38  ;;  %v3697_v50 = vld [vmem:[#allocation2 + $0x258] sm:$0xf]  ;;  %v2010_v55 = vadd.f32 %v2009_v53, %v1991_v48  ;;  %v5101_v25 = vperm.slane %v5072_v51, 1  ;;  %v2702_v35 = vand.u32 2147483647, %v5089_v44 }
 0x13b   : > { %v4527_v52 = vld [vmem:[#allocation2 + $0x274] sm:$0xf0]  ;;  %v2028_v56 = vpop.f32.mrf.mxu3 }
 0x13c   : > { %2455 = vmatpush.bf16.msrb.mxu2 %v4018_v41  ;;  %v3985_v54 = vld [vmem:[#allocation2 + $0x498] sm:$0xf]  ;;  %2419 = vmatpush.bf16.msrb.mxu0 %v3442_v49  ;;  %v3698_v58 = vor.u32 %v4527_v52, %v3697_v50  ;;  %v2029_v10 = vadd.f32 %v2028_v56, %v2010_v55  ;;  %v2042_v5 = vpop.f32.mrf.mxu0  ;;  %v4499_v49 = vld [vmem:[#allocation2 + $0x19c] sm:$0xf]  ;;  %vm5131_vm4 = vcmp.eq.f32.partialorder %v2702_v35, 8.507059e+37 }
 0x13d   : > { %v4599_v59 = vld [vmem:[#allocation2 + $0x4b4] sm:$0xf0]  ;;  %v5094_v9 = vpop.f32.mrf.mxu1  ;;  %v2043_v38 = vadd.f32 %v2042_v5, %v5101_v25  ;;  %v3603_v55 = vld [vmem:[#allocation2 + $0x1b8] sm:$0xf0] }
 0x13e   : > { %2474 = vmatpush.bf16.msrb.mxu3 %v4274_v45  ;;  %v4241_v60 = vld [vmem:[#allocation2 + $0x698] sm:$0xf]  ;;  %v3986_v0 = vor.u32 %v4599_v59, %v3985_v54  ;;  %2438 = vmatpush.bf16.msrb.mxu1 %v3698_v58  ;;  %v4728_v17 = vpop.eup %4727  ;;  %v4423_v18 = vmul.f32 -1.442695, %v2029_v10  ;;  %v2704_v45 = vand.u32 2147483648, %v5089_v44 }
 0x13f   : > { %v4663_v62 = vld [vmem:[#allocation2 + $0x6b4] sm:$0xf0]  ;;  %v5096_v1 = vpop.eup %4729  ;;  %v5098_v24 = vadd.f32 1.0, %v4728_v17  ;;  %2345 = vmatmul.bf16.vlgmr.msra.gmra.mxu0 %v5006_v26  ;;  %v4563_v56 = vld [vmem:[#allocation2 + $0x39c] sm:$0xf] }
 0x140   : > { %v4242_v2 = vor.u32 %v4663_v62, %v4241_v60  ;;  %v3409_v57 = vld [vmem:[#allocation2 + $0x18] sm:$0xf]  ;;  %2456 = vmatpush.bf16.msrb.mxu2 %v3986_v0  ;;  %v2694_v29 = vmul.f32 %v5096_v1, %v5089_v44  ;;  %4731 = vpow2.f32 %v4423_v18  ;;  %vm2699_vm1 = vweird.f32 %v5096_v1  ;;  %v3859_v58 = vld [vmem:[#allocation2 + $0x3b8] sm:$0xf0] }
 0x141   : > { %v4455_v3 = vld [vmem:[#allocation2 + $0x34] sm:$0xf0]  ;;  %2364 = vmatmul.bf16.vlgmr.msra.gmra.mxu1 %v5009_v30  ;;  %4733 = vrcp.f32 %v5098_v24  ;;  %v2011_v36 = vpop.f32.mrf.mxu2  ;;  %v3606_v60 = vor.u32 %v4499_v49, %v3603_v55  ;;  %v3862_v62 = vor.u32 %v4563_v56, %v3859_v58  ;;  %v4635_v0 = vld [vmem:[#allocation2 + $0x5dc] sm:$0xf]  ;;  %v2822_v10 = vand.u32 2147483647, %v5098_v24  ;;  %vm5127_vm3 = vmor %vm2698_vm2, %vm2699_vm1 }
 0x142   : > { %v3410_v6 = vor.u32 %v4455_v3, %v3409_v57  ;;  %v3665_v7 = vld [vmem:[#allocation2 + $0x218] sm:$0xf]  ;;  %2475 = vmatpush.bf16.msrb.mxu3 %v4242_v2  ;;  %v2695_v39 = vsub.f32 1.0, %v2694_v29  ;;  %v2012_v22 = vadd.f32 %v2011_v36, %v1993_v15  ;;  %v4147_v2 = vld [vmem:[#allocation2 + $0x5f8] sm:$0xf0]  ;;  %v2824_v15 = vand.u32 2147483648, %v5098_v24 }
 0x143   : > { %v4519_v8 = vld [vmem:[#allocation2 + $0x234] sm:$0xf0]  ;;  %v2030_v40 = vpop.f32.mrf.mxu3  ;;  %v4699_v57 = vld [vmem:[#allocation2 + $0x7dc] sm:$0xf]  ;;  %vm5148_vm5 = vcmp.eq.f32.partialorder %v2822_v10, 8.507059e+37  ;;  %vm2818_vm7 = vweird.f32 %v5098_v24 }
 0x144   : > { %v3666_v11 = vor.u32 %v4519_v8, %v3665_v7  ;;  %v3953_v16 = vld [vmem:[#allocation2 + $0x458] sm:$0xf]  ;;  %2420 = vmatpush.bf16.msrb.mxu0 %v3410_v6  ;;  %v2696_v50 = vmul.f32 %v5096_v1, %v2695_v39  ;;  %v2031_v52 = vadd.f32 %v2030_v40, %v2012_v22  ;;  %v2044_v53 = vpop.f32.mrf.mxu0  ;;  %v4150_v6 = vor.u32 %v4635_v0, %v4147_v2  ;;  %v4403_v7 = vld [vmem:[#allocation2 + $0x7f8] sm:$0xf0] }
 0x145   : > { %v4591_v14 = vld [vmem:[#allocation2 + $0x474] sm:$0xf0]  ;;  %v5115_v59 = vpop.f32.mrf.mxu1  ;;  %v4406_v18 = vor.u32 %v4699_v57, %v4403_v7  ;;  %v4691_v39 = vld [vmem:[#allocation2 + $0x79c] sm:$0xf]  ;;  %v2045_v22 = vadd.f32 %v2044_v53, %v5101_v25 }
 0x146   : > { %v3954_v19 = vor.u32 %v4591_v14, %v3953_v16  ;;  %v4209_v20 = vld [vmem:[#allocation2 + $0x658] sm:$0xf]  ;;  %2439 = vmatpush.bf16.msrb.mxu1 %v3666_v11  ;;  %v4732_v3 = vpop.eup %4731  ;;  %v2697_v4 = vadd.f32 %v5096_v1, %v2696_v50  ;;  %v4431_v5 = vmul.f32 -1.442695, %v2031_v52  ;;  %v2705_v14 = vor.u32 1.1754944e-38, %v2704_v45 }
 0x147   : > { %v4655_v23 = vld [vmem:[#allocation2 + $0x674] sm:$0xf0]  ;;  %2383 = vmatmul.bf16.vlgmr.msra.gmra.mxu2 %v5019_v61  ;;  %v5120_v8 = vpop.eup %4733  ;;  %v5135_v17 = vadd.f32 1.0, %v4732_v3  ;;  %v4483_v45 = vld [vmem:[#allocation2 + $0x11c] sm:$0xf] }
 0x148   : > { %v4210_v21 = vor.u32 %v4655_v23, %v4209_v20  ;;  %2457 = vmatpush.bf16.msrb.mxu2 %v3954_v19  ;;  %v3921_v37 = vld [vmem:[#allocation2 + $0x418] sm:$0xf]  ;;  %2489 = vmatpush.bf16.msra.mxu0 %v3638_v31  ;;  %v4491_v19 = vld [vmem:[#allocation2 + $0x15c] sm:$0xf]  ;;  %v2701_v44 = vsel %vm5127_vm3, %v5096_v1, %v2697_v4  ;;  %v2814_v20 = vmul.f32 %v5120_v8, %v5098_v24  ;;  %4735 = vpow2.f32 %v4431_v5 }
 0x149   : > { %v4583_v41 = vld [vmem:[#allocation2 + $0x434] sm:$0xf0]  ;;  %2402 = vmatmul.bf16.vlgmr.msra.gmra.mxu3 %v5021_v63  ;;  %v2062_v23 = vadd.f32 %v5094_v9, %v2043_v38  ;;  %v2706_v29 = vsel %vm5131_vm4, %v2705_v14, %v2701_v44  ;;  %4737 = vrcp.f32 %v5135_v17  ;;  %v2080_v1 = vpop.f32.mrf.mxu2  ;;  %v4627_v31 = vld [vmem:[#allocation2 + $0x59c] sm:$0xf]  ;;  %vm2819_vm6 = vweird.f32 %v5120_v8 }
 0x14a   : > { %2476 = vmatpush.bf16.msrb.mxu3 %v4210_v21  ;;  %v4177_v42 = vld [vmem:[#allocation2 + $0x618] sm:$0xf]  ;;  %v3922_v47 = vor.u32 %v4583_v41, %v3921_v37  ;;  %2508 = vmatpush.bf16.msra.mxu1 %v3894_v34  ;;  %v3571_v21 = vld [vmem:[#allocation2 + $0x178] sm:$0xf0]  ;;  %v3173_v33 = vmax.f32 %v2706_v29, 1e-06  ;;  %v3830_v34 = vor.u32 %v4555_v27, %v3827_v28  ;;  %v4118_v41 = vor.u32 %v4627_v31, %v4115_v32  ;;  %vm5171_vm8 = vmor %vm2818_vm7, %vm2819_vm6 }
 0x14b   : > { %v4647_v48 = vld [vmem:[#allocation2 + $0x634] sm:$0xf0]  ;;  %v2815_v9 = vsub.f32 1.0, %v2814_v20  ;;  %v2081_v36 = vadd.f32 %v2080_v1, %v2062_v23  ;;  %v2099_v37 = vpop.f32.mrf.mxu3  ;;  %v3574_v40 = vor.u32 %v4491_v19, %v3571_v21  ;;  %v3539_v50 = vld [vmem:[#allocation2 + $0x138] sm:$0xf0]  ;;  %v2825_v5 = vor.u32 1.1754944e-38, %v2824_v15 }
 0x14c   : > { %v4178_v54 = vor.u32 %v4647_v48, %v4177_v42  ;;  %2458 = vmatpush.bf16.msrb.mxu2 %v3922_v47  ;;  %2490 = vmatpush.bf16.msra.mxu0 %v3606_v60  ;;  %v4371_v42 = vld [vmem:[#allocation2 + $0x7b8] sm:$0xf0]  ;;  %v3205_v38 = vmin.f32 %v3173_v33, 0.999999  ;;  %v2047_v49 = vpop.f32.mrf.mxu0  ;;  %v3542_v53 = vor.u32 %v4483_v45, %v3539_v50  ;;  %v2942_v21 = vand.u32 2147483647, %v5135_v17 }
 0x14d   : > { %v2816_v47 = vmul.f32 %v5120_v8, %v2815_v9  ;;  %v2100_v48 = vadd.f32 %v2099_v37, %v2081_v36  ;;  %v5162_v52 = vpop.f32.mrf.mxu1  ;;  %v4547_v55 = vld [vmem:[#allocation2 + $0x31c] sm:$0xf]  ;;  %v2944_v15 = vand.u32 2147483648, %v5135_v17  ;;  %v2048_v33 = vadd.f32 %v2047_v49, %v5101_v25 }
 0x14e   : > { %2477 = vmatpush.bf16.msrb.mxu3 %v4178_v54  ;;  %2509 = vmatpush.bf16.msra.mxu1 %v3862_v62  ;;  %v4374_v54 = vor.u32 %v4691_v39, %v4371_v42  ;;  %v3795_v56 = vld [vmem:[#allocation2 + $0x338] sm:$0xf0]  ;;  %v4736_v60 = vpop.eup %4735  ;;  %3237 = vst [vmem:[%s5157_s7] sm:$0xff] %v3205_v38  ;;  %vm2938_vm10 = vweird.f32 %v5135_v17  ;;  %vm5198_vm11 = vcmp.eq.f32.partialorder %v2942_v21, 8.507059e+37 }
 0x14f   : > { %v4619_v58 = vld [vmem:[#allocation2 + $0x55c] sm:$0xf]  ;;  %v2817_v62 = vadd.f32 %v5120_v8, %v2816_v47  ;;  %v4408_v0 = vmul.f32 -1.442695, %v2100_v48  ;;  %v3798_v2 = vor.u32 %v4547_v55, %v3795_v56  ;;  %v5167_v4 = vpop.eup %4737  ;;  %2350 = vmatmul.bf16.gmra.mxu0 %v5029_v43 }
 0x150   : > { %2527 = vmatpush.bf16.msra.mxu2 %v4150_v6  ;;  %2491 = vmatpush.bf16.msra.mxu0 %v3574_v40  ;;  %v4083_v57 = vld [vmem:[#allocation2 + $0x578] sm:$0xf0]  ;;  %v5175_v6 = vadd.f32 1.0, %v4736_v60  ;;  %v2934_v14 = vmul.f32 %v5167_v4, %v5135_v17  ;;  %vm2939_vm9 = vweird.f32 %v5167_v4 }
 0x151   : > { %v4683_v3 = vld [vmem:[#allocation2 + $0x75c] sm:$0xf]  ;;  %v4086_v24 = vor.u32 %v4619_v58, %v4083_v57  ;;  %v2821_v16 = vsel %vm5171_vm8, %v5120_v8, %v2817_v62  ;;  %4739 = vpow2.f32 %v4408_v0  ;;  %2369 = vmatmul.bf16.gmra.mxu1 %v5032_v46  ;;  %v2082_v27 = vpop.f32.mrf.mxu2  ;;  %vm5209_vm12 = vmor %vm2938_vm10, %vm2939_vm9 }
 0x152   : > { %2546 = vmatpush.bf16.msra.mxu3 %v4406_v18  ;;  %2510 = vmatpush.bf16.msra.mxu1 %v3830_v34  ;;  %v4339_v7 = vld [vmem:[#allocation2 + $0x778] sm:$0xf0]  ;;  %v2064_v18 = vadd.f32 %v5115_v59, %v2045_v22  ;;  %v2826_v23 = vsel %vm5148_vm5, %v2825_v5, %v2821_v16  ;;  %4741 = vrcp.f32 %v5175_v6  ;;  %v2935_v59 = vsub.f32 1.0, %v2934_v14 }
 0x153   : > { %v4475_v11 = vld [vmem:[#allocation2 + $0xdc] sm:$0xf]  ;;  %v3181_v29 = vmax.f32 %v2826_v23, 1e-06  ;;  %v2101_v31 = vpop.f32.mrf.mxu3  ;;  %v4342_v9 = vor.u32 %v4683_v3, %v4339_v7  ;;  %vm3058_vm14 = vweird.f32 %v5175_v6 }
 0x154   : > { %2528 = vmatpush.bf16.msra.mxu2 %v4118_v41  ;;  %v3507_v19 = vld [vmem:[#allocation2 + $0xf8] sm:$0xf0]  ;;  %2492 = vmatpush.bf16.msra.mxu0 %v3542_v53  ;;  %v2083_v1 = vadd.f32 %v2082_v27, %v2064_v18  ;;  %v2936_v40 = vmul.f32 %v5167_v4, %v2935_v59  ;;  %v2049_v41 = vpop.f32.mrf.mxu0 }
 0x155   : > { %v4539_v44 = vld [vmem:[#allocation2 + $0x2dc] sm:$0xf]  ;;  %v3510_v35 = vor.u32 %v4475_v11, %v3507_v19  ;;  %v3213_v22 = vmin.f32 %v3181_v29, 0.999999  ;;  %v5194_v45 = vpop.f32.mrf.mxu1  ;;  %v2067_v11 = vadd.f32 %v5162_v52, %v2048_v33  ;;  %v3064_v52 = vand.u32 2147483648, %v5175_v6 }
 0x156   : > { %2547 = vmatpush.bf16.msra.mxu3 %v4374_v54  ;;  %v3763_v20 = vld [vmem:[#allocation2 + $0x2f8] sm:$0xf0]  ;;  %2511 = vmatpush.bf16.msra.mxu1 %v3798_v2  ;;  %v2102_v34 = vadd.f32 %v2101_v31, %v2083_v1  ;;  %v2937_v53 = vadd.f32 %v5167_v4, %v2936_v40  ;;  %v2945_v2 = vor.u32 1.1754944e-38, %v2944_v15  ;;  %v2050_v59 = vadd.f32 %v2049_v41, %v5101_v25 }
 0x157   : > { %v4611_v8 = vld [vmem:[#allocation2 + $0x51c] sm:$0xf]  ;;  %v3766_v36 = vor.u32 %v4539_v44, %v3763_v20  ;;  %v4740_v54 = vpop.eup %4739  ;;  %3245 = vst [vmem:[%s5157_s7 + $0x40] sm:$0xff] %v3213_v22  ;;  %2388 = vmatmul.bf16.gmra.mxu2 %v5039_v12  ;;  %v3062_v44 = vand.u32 2147483647, %v5175_v6  ;;  %v5231_v22 = vperm.slane %v5072_v51, 2 }
 0x158   : > { %v4051_v28 = vld [vmem:[#allocation2 + $0x538] sm:$0xf0]  ;;  %2529 = vmatpush.bf16.msra.mxu2 %v4086_v24  ;;  %2493 = vmatpush.bf16.msra.mxu0 %v3510_v35  ;;  %v4416_v56 = vmul.f32 -1.442695, %v2102_v34  ;;  %v5203_v62 = vpop.eup %4741  ;;  %v5213_v57 = vadd.f32 1.0, %v4740_v54  ;;  %v2941_v7 = vsel %vm5209_vm12, %v5167_v4, %v2937_v53  ;;  %v3065_v53 = vor.u32 1.1754944e-38, %v3064_v52 }
 0x159   : > { %v4675_v32 = vld [vmem:[#allocation2 + $0x71c] sm:$0xf]  ;;  %v4054_v38 = vor.u32 %v4611_v8, %v4051_v28  ;;  %2407 = vmatmul.bf16.gmra.mxu3 %v5041_v13  ;;  %v3054_v17 = vmul.f32 %v5203_v62, %v5175_v6  ;;  %v2946_v19 = vsel %vm5198_vm11, %v2945_v2, %v2941_v7  ;;  %v2085_v20 = vpop.f32.mrf.mxu2  ;;  %vm3059_vm13 = vweird.f32 %v5203_v62 }
 0x15a   : > { %v4307_v37 = vld [vmem:[#allocation2 + $0x738] sm:$0xf0]  ;;  %2548 = vmatpush.bf16.msra.mxu3 %v4342_v9  ;;  %2512 = vmatpush.bf16.msra.mxu1 %v3766_v36  ;;  %4743 = vpow2.f32 %v4416_v56  ;;  %v3189_v21 = vmax.f32 %v2946_v19, 1e-06  ;;  %v2086_v8 = vadd.f32 %v2085_v20, %v2067_v11  ;;  %vm5242_vm15 = vmor %vm3058_vm14, %vm3059_vm13  ;;  %vm3063_vm0 = vcmp.eq.f32.partialorder %v3062_v44, 8.507059e+37 }
 0x15b   : > { %v4467_v39 = vld [vmem:[#allocation2 + $0x9c] sm:$0xf]  ;;  %v4310_v47 = vor.u32 %v4675_v32, %v4307_v37  ;;  %4745 = vrcp.f32 %v5213_v57  ;;  %v3055_v27 = vsub.f32 1.0, %v3054_v17  ;;  %v2104_v28 = vpop.f32.mrf.mxu3  ;;  %v2069_v0 = vadd.f32 %v5194_v45, %v2050_v59 }
 0x15c   : > { %v3475_v42 = vld [vmem:[#allocation2 + $0xb8] sm:$0xf0]  ;;  %2530 = vmatpush.bf16.msra.mxu2 %v4054_v38  ;;  %v3221_v9 = vmin.f32 %v3189_v21, 0.999999  ;;  %v2105_v36 = vadd.f32 %v2104_v28, %v2086_v8  ;;  %v2118_v37 = vpop.f32.mrf.mxu0  ;;  %v2719_v19 = vand.u32 2147483648, %v5213_v57  ;;  %vm2713_vm2 = vweird.f32 %v5213_v57 }
 0x15d   : > { %v4531_v48 = vld [vmem:[#allocation2 + $0x29c] sm:$0xf]  ;;  %v3478_v58 = vor.u32 %v4467_v39, %v3475_v42  ;;  %v3056_v35 = vmul.f32 %v5203_v62, %v3055_v27  ;;  %v5233_v40 = vpop.f32.mrf.mxu1  ;;  %v2119_v44 = vadd.f32 %v2118_v37, %v5231_v22 }
 0x15e   : > { %v3731_v49 = vld [vmem:[#allocation2 + $0x2b8] sm:$0xf0]  ;;  %2549 = vmatpush.bf16.msra.mxu3 %v4310_v47  ;;  %3253 = vst [vmem:[%s5157_s7 + $0x80] sm:$0xff] %v3221_v9 }
 0x15f   : > { %v4603_v50 = vld [vmem:[#allocation2 + $0x4dc] sm:$0xf]  ;;  %v3734_v3 = vor.u32 %v4531_v48, %v3731_v49  ;;  %2494 = vmatpush.bf16.msra.mxu0 %v3478_v58  ;;  %v3057_v47 = vadd.f32 %v5203_v62, %v3056_v35  ;;  %v4424_v48 = vmul.f32 -1.442695, %v2105_v36  ;;  %v2138_v37 = vadd.f32 %v5233_v40, %v2119_v44 }
 0x160   : > { %v4019_v60 = vld [vmem:[#allocation2 + $0x4f8] sm:$0xf0]  ;;  %v4744_v38 = vpop.eup %4743  ;;  %2421 = vmatmul.bf16.vlgmr.msrb.gmra.mxu0 %v5006_v26 }
 0x161   : > { %v4022_v10 = vor.u32 %v4603_v50, %v4019_v60  ;;  %v4667_v5 = vld [vmem:[#allocation2 + $0x6dc] sm:$0xf]  ;;  %2513 = vmatpush.bf16.msra.mxu1 %v3734_v3  ;;  %v5238_v51 = vpop.eup %4745  ;;  %v5246_v55 = vadd.f32 1.0, %v4744_v38  ;;  %v3061_v58 = vsel %vm5242_vm15, %v5203_v62, %v3057_v47  ;;  %4747 = vpow2.f32 %v4424_v48  ;;  %v2087_v7 = vpop.f32.mrf.mxu2 }
 0x162   : > { %v4275_v24 = vld [vmem:[#allocation2 + $0x6f8] sm:$0xf0]  ;;  %v2709_v60 = vmul.f32 %v5238_v51, %v5213_v57  ;;  %2440 = vmatmul.bf16.vlgmr.msrb.gmra.mxu1 %v5009_v30  ;;  %vm2714_vm1 = vweird.f32 %v5238_v51 }
 0x163   : > { %v4459_v16 = vld [vmem:[#allocation2 + $0x5c] sm:$0xf]  ;;  %2531 = vmatpush.bf16.msra.mxu2 %v4022_v10  ;;  %v4278_v15 = vor.u32 %v4667_v5, %v4275_v24  ;;  %v3066_v5 = vsel %vm3063_vm0, %v3065_v53, %v3061_v58  ;;  %v2717_v24 = vand.u32 2147483647, %v5213_v57  ;;  %4749 = vrcp.f32 %v5246_v55  ;;  %v2106_v45 = vpop.f32.mrf.mxu3  ;;  %vm2715_vm3 = vmor %vm2713_vm2, %vm2714_vm1 }
 0x164   : > { %v3443_v14 = vld [vmem:[#allocation2 + $0x78] sm:$0xf0]  ;;  %v3197_v11 = vmax.f32 %v3066_v5, 1e-06  ;;  %v2120_v8 = vpop.f32.mrf.mxu0  ;;  %v2837_v38 = vand.u32 2147483647, %v5246_v55  ;;  %vm2833_vm6 = vweird.f32 %v5246_v55 }
 0x165   : > { %v4523_v18 = vld [vmem:[#allocation2 + $0x25c] sm:$0xf]  ;;  %v3446_v1 = vor.u32 %v4459_v16, %v3443_v14  ;;  %2550 = vmatpush.bf16.msra.mxu3 %v4278_v15  ;;  %v2710_v16 = vsub.f32 1.0, %v2709_v60  ;;  %v2088_v14 = vadd.f32 %v2087_v7, %v2069_v0  ;;  %v2139_v28 = vpop.f32.mrf.mxu1  ;;  %vm2718_vm4 = vcmp.eq.f32.partialorder %v2717_v24, 8.507059e+37 }
 0x166   : > { %v3699_v4 = vld [vmem:[#allocation2 + $0x278] sm:$0xf0]  ;;  %v3229_v21 = vmin.f32 %v3197_v11, 0.999999  ;;  %v2839_v47 = vand.u32 2147483648, %v5246_v55  ;;  %v2121_v48 = vadd.f32 %v2120_v8, %v5231_v22  ;;  %vm2838_vm8 = vcmp.eq.f32.partialorder %v2837_v38, 8.507059e+37 }
 0x167   : > { %v4595_v23 = vld [vmem:[#allocation2 + $0x49c] sm:$0xf]  ;;  %v3702_v31 = vor.u32 %v4523_v18, %v3699_v4  ;;  %2495 = vmatpush.bf16.msra.mxu0 %v3446_v1  ;;  %v2711_v27 = vmul.f32 %v5238_v51, %v2710_v16  ;;  %v2107_v52 = vadd.f32 %v2106_v45, %v2088_v14  ;;  %v4748_v15 = vpop.eup %4747  ;;  %2459 = vmatmul.bf16.vlgmr.msrb.gmra.mxu2 %v5019_v61 }
 0x168   : > { %v3987_v29 = vld [vmem:[#allocation2 + $0x4b8] sm:$0xf0]  ;;  %3261 = vst [vmem:[%s5157_s7 + $0xc0] sm:$0xff] %v3229_v21  ;;  %v5268_v9 = vadd.f32 1.0, %v4748_v15  ;;  %v2840_v60 = vor.u32 1.1754944e-38, %v2839_v47 }
 0x169   : > { %v4659_v32 = vld [vmem:[#allocation2 + $0x69c] sm:$0xf]  ;;  %v3990_v25 = vor.u32 %v4595_v23, %v3987_v29  ;;  %2514 = vmatpush.bf16.msra.mxu1 %v3702_v31  ;;  %v2712_v1 = vadd.f32 %v5238_v51, %v2711_v27  ;;  %v4432_v31 = vmul.f32 -1.442695, %v2107_v52  ;;  %2478 = vmatmul.bf16.vlgmr.msrb.gmra.mxu3 %v5021_v63 }
 0x16a   : > { %v4243_v33 = vld [vmem:[#allocation2 + $0x6b8] sm:$0xf0]  ;;  %v2957_v11 = vand.u32 2147483647, %v5268_v9  ;;  %v2959_v16 = vand.u32 2147483648, %v5268_v9  ;;  %vm2953_vm10 = vweird.f32 %v5268_v9 }
 0x16b   : > { %v4451_v39 = vld [vmem:[#allocation2 + $0x1c] sm:$0xf]  ;;  %v4246_v34 = vor.u32 %v4659_v32, %v4243_v33  ;;  %2532 = vmatpush.bf16.msra.mxu2 %v3990_v25  ;;  %v4750_v32 = vpop.eup %4749  ;;  %v2720_v33 = vor.u32 1.1754944e-38, %v2719_v19  ;;  %v2716_v35 = vsel %vm2715_vm3, %v5238_v51, %v2712_v1  ;;  %4751 = vpow2.f32 %v4432_v31 }
 0x16c   : > { %v3411_v41 = vld [vmem:[#allocation2 + $0x38] sm:$0xf0]  ;;  %v2829_v36 = vmul.f32 %v4750_v32, %v5246_v55  ;;  %4753 = vrcp.f32 %v5268_v9  ;;  %vm2834_vm5 = vweird.f32 %v4750_v32  ;;  %v2123_v51 = vpop.f32.mrf.mxu0  ;;  %vm2958_vm12 = vcmp.eq.f32.partialorder %v2957_v11, 8.507059e+37 }
 0x16d   : > { %v4515_v42 = vld [vmem:[#allocation2 + $0x21c] sm:$0xf]  ;;  %v3414_v49 = vor.u32 %v4451_v39, %v3411_v41  ;;  %2551 = vmatpush.bf16.msra.mxu3 %v4246_v34  ;;  %v2721_v57 = vsel %vm2718_vm4, %v2720_v33, %v2716_v35  ;;  %v2156_v39 = vpop.f32.mrf.mxu2  ;;  %vm2835_vm7 = vmor %vm2833_vm6, %vm2834_vm5  ;;  %v2124_v14 = vadd.f32 %v2123_v51, %v5231_v22  ;;  %v2960_v52 = vor.u32 1.1754944e-38, %v2959_v16 }
 0x16e   : > { %v3667_v50 = vld [vmem:[#allocation2 + $0x238] sm:$0xf0]  ;;  %v3174_v25 = vmax.f32 %v2721_v57, 1e-06  ;;  %v2830_v34 = vsub.f32 1.0, %v2829_v36  ;;  %v2157_v41 = vadd.f32 %v2156_v39, %v2138_v37  ;;  %v2142_v54 = vpop.f32.mrf.mxu1 }
 0x16f   : > { %v3670_v6 = vor.u32 %v4515_v42, %v3667_v50  ;;  %v4587_v56 = vld [vmem:[#allocation2 + $0x45c] sm:$0xf]  ;;  %2496 = vmatpush.bf16.msra.mxu0 %v3414_v49  ;;  %v2175_v42 = vpop.f32.mrf.mxu3 }
 0x170   : > { %v3955_v2 = vld [vmem:[#allocation2 + $0x478] sm:$0xf0]  ;;  %v3206_v49 = vmin.f32 %v3174_v25, 0.999999  ;;  %v2831_v40 = vmul.f32 %v4750_v32, %v2830_v34  ;;  %v2176_v50 = vadd.f32 %v2175_v42, %v2157_v41  ;;  %2426 = vmatmul.bf16.gmra.mxu0 %v5029_v43 }
 0x171   : > { %v4651_v3 = vld [vmem:[#allocation2 + $0x65c] sm:$0xf]  ;;  %2515 = vmatpush.bf16.msra.mxu1 %v3670_v6  ;;  %v3958_v20 = vor.u32 %v4587_v56, %v3955_v2  ;;  %v4752_v53 = vpop.eup %4751 }
 0x172   : > { %v4211_v10 = vld [vmem:[#allocation2 + $0x678] sm:$0xf0]  ;;  %3238 = vst [vmem:[%s5157_s7 + $0x8] sm:$0xff] %v3206_v49  ;;  %v2832_v6 = vadd.f32 %v4750_v32, %v2831_v40  ;;  %v4409_v56 = vmul.f32 -1.442695, %v2176_v50  ;;  %v4754_v58 = vpop.eup %4753  ;;  %v5280_v0 = vadd.f32 1.0, %v4752_v53  ;;  %2445 = vmatmul.bf16.gmra.mxu1 %v5032_v46 }
 0x173   : > { %v4579_v62 = vld [vmem:[#allocation2 + $0x41c] sm:$0xf]  ;;  %v4214_v4 = vor.u32 %v4651_v3, %v4211_v10  ;;  %2533 = vmatpush.bf16.msra.mxu2 %v3958_v20  ;;  %v2949_v3 = vmul.f32 %v4754_v58, %v5268_v9  ;;  %v2140_v10 = vadd.f32 %v2139_v28, %v2121_v48  ;;  %vm2954_vm9 = vweird.f32 %v4754_v58 }
 0x174   : > { %v3923_v17 = vld [vmem:[#allocation2 + $0x438] sm:$0xf0]  ;;  %v2836_v2 = vsel %vm2835_vm7, %v4750_v32, %v2832_v6  ;;  %4755 = vpow2.f32 %v4409_v56  ;;  %v2125_v44 = vpop.f32.mrf.mxu0  ;;  %vm2955_vm11 = vmor %vm2953_vm10, %vm2954_vm9  ;;  %v3077_v35 = vand.u32 2147483647, %v5280_v0  ;;  %v3079_v36 = vand.u32 2147483648, %v5280_v0 }
 0x175   : > { %v4643_v18 = vld [vmem:[#allocation2 + $0x61c] sm:$0xf]  ;;  %2552 = vmatpush.bf16.msra.mxu3 %v4214_v4  ;;  %v3926_v29 = vor.u32 %v4579_v62, %v3923_v17  ;;  %v2841_v5 = vsel %vm2838_vm8, %v2840_v60, %v2836_v2  ;;  %4757 = vrcp.f32 %v5280_v0  ;;  %v2158_v55 = vpop.f32.mrf.mxu2  ;;  %v2950_v7 = vsub.f32 1.0, %v2949_v3 }
 0x176   : > { %v4179_v23 = vld [vmem:[#allocation2 + $0x638] sm:$0xf0]  ;;  %v3182_v24 = vmax.f32 %v2841_v5, 1e-06  ;;  %v2159_v62 = vadd.f32 %v2158_v55, %v2140_v10  ;;  %v2144_v20 = vpop.f32.mrf.mxu1  ;;  %v2126_v37 = vadd.f32 %v2125_v44, %v5231_v22  ;;  %vm3073_vm14 = vweird.f32 %v5280_v0  ;;  %v5307_v22 = vld [vmem:[%s5407_s4] sm:$0xff] }
 0x177   : > { %v4182_v59 = vor.u32 %v4643_v18, %v4179_v23  ;;  %2534 = vmatpush.bf16.msra.mxu2 %v3926_v29  ;;  %v2177_v17 = vpop.f32.mrf.mxu3  ;;  %v2951_v18 = vmul.f32 %v4754_v58, %v2950_v7  ;;  %vm3078_vm0 = vcmp.eq.f32.partialorder %v3077_v35, 8.507059e+37  ;;  %v3080_v49 = vor.u32 1.1754944e-38, %v3079_v36 }
 0x178   : > { %v3214_v45 = vmin.f32 %v3182_v24, 0.999999  ;;  %v2178_v19 = vadd.f32 %v2177_v17, %v2159_v62  ;;  %2464 = vmatmul.bf16.gmra.mxu2 %v5039_v12  ;;  %v5310_v50 = vperm.slane %v5307_v22, 3  ;;  %v2145_v53 = vadd.f32 %v2144_v20, %v2126_v37 }
 0x179   : > { %2553 = vmatpush.bf16.msra.mxu3 %v4182_v59  ;;  %v2952_v23 = vadd.f32 %v4754_v58, %v2951_v18  ;;  %v2143_v59 = vadd.f32 %v2142_v54, %v2124_v14 }
 0x17a   : > { %v4756_v4 = vpop.eup %4755  ;;  %3246 = vst [vmem:[%s5157_s7 + $0x48] sm:$0xff] %v3214_v45  ;;  %v4417_v21 = vmul.f32 -1.442695, %v2178_v19  ;;  %2483 = vmatmul.bf16.gmra.mxu3 %v5041_v13 }
 0x17b   : > { %v4758_v27 = vpop.eup %4757  ;;  %v5292_v8 = vadd.f32 1.0, %v4756_v4  ;;  %v2956_v28 = vsel %vm2955_vm11, %v4754_v58, %v2952_v23 }
 0x17c   : > { %v3069_v29 = vmul.f32 %v4758_v27, %v5280_v0  ;;  %4759 = vpow2.f32 %v4417_v21  ;;  %v2961_v15 = vsel %vm2958_vm12, %v2960_v52, %v2956_v28  ;;  %vm3074_vm13 = vweird.f32 %v4758_v27  ;;  %v2194_v34 = vpop.f32.mrf.mxu0 }
 0x17d   : > { %4761 = vrcp.f32 %v5292_v8  ;;  %v2161_v1 = vpop.f32.mrf.mxu2  ;;  %v3190_v31 = vmax.f32 %v2961_v15, 1e-06  ;;  %vm3075_vm15 = vmor %vm3073_vm14, %vm3074_vm13  ;;  %v2732_v3 = vand.u32 2147483647, %v5292_v8  ;;  %v2195_v10 = vadd.f32 %v2194_v34, %v5310_v50 }
 0x17e   : > { %v3070_v32 = vsub.f32 1.0, %v3069_v29  ;;  %v2162_v33 = vadd.f32 %v2161_v1, %v2143_v59  ;;  %v2213_v41 = vpop.f32.mrf.mxu1  ;;  %vm2728_vm2 = vweird.f32 %v5292_v8 }
 0x17f   : > { %v2180_v9 = vpop.f32.mrf.mxu3  ;;  %v3222_v57 = vmin.f32 %v3190_v31, 0.999999  ;;  %vm2733_vm4 = vcmp.eq.f32.partialorder %v2732_v3, 8.507059e+37  ;;  %v2214_v44 = vadd.f32 %v2213_v41, %v2195_v10 }
 0x180   : > { %v3071_v39 = vmul.f32 %v4758_v27, %v3070_v32  ;;  %v2181_v25 = vadd.f32 %v2180_v9, %v2162_v33  ;;  %2497 = vmatmul.bf16.vlgmr.msra.gmra.mxu0 %v5006_v26  ;;  %v2734_v26 = vand.u32 2147483648, %v5292_v8 }
 0x181   : > { %3254 = vst [vmem:[%s5157_s7 + $0x88] sm:$0xff] %v3222_v57 }
 0x182   : > { %v4760_v42 = vpop.eup %4759  ;;  %v3072_v38 = vadd.f32 %v4758_v27, %v3071_v39  ;;  %v4425_v47 = vmul.f32 -1.442695, %v2181_v25  ;;  %2516 = vmatmul.bf16.vlgmr.msra.gmra.mxu1 %v5009_v30  ;;  %v2735_v14 = vor.u32 1.1754944e-38, %v2734_v26 }
 0x183   : > { %v4762_v48 = vpop.eup %4761  ;;  %v5302_v40 = vadd.f32 1.0, %v4760_v42 }
 0x184   : > { %v3076_v51 = vsel %vm3075_vm15, %v4758_v27, %v3072_v38  ;;  %v2724_v54 = vmul.f32 %v4762_v48, %v5292_v8  ;;  %4763 = vpow2.f32 %v4425_v47  ;;  %vm2729_vm1 = vweird.f32 %v4762_v48  ;;  %v2196_v30 = vpop.f32.mrf.mxu0 }
 0x185   : > { %v3081_v6 = vsel %vm3078_vm0, %v3080_v49, %v3076_v51  ;;  %4765 = vrcp.f32 %v5302_v40  ;;  %v2163_v56 = vpop.f32.mrf.mxu2  ;;  %vm2730_vm3 = vmor %vm2728_vm2, %vm2729_vm1  ;;  %v2852_v52 = vand.u32 2147483647, %v5302_v40  ;;  %v2854_v8 = vand.u32 2147483648, %v5302_v40 }
 0x186   : > { %v3198_v58 = vmax.f32 %v3081_v6, 1e-06  ;;  %v2725_v60 = vsub.f32 1.0, %v2724_v54  ;;  %v2164_v0 = vadd.f32 %v2163_v56, %v2145_v53  ;;  %v2215_v7 = vpop.f32.mrf.mxu1  ;;  %vm2848_vm6 = vweird.f32 %v5302_v40 }
 0x187   : > { %v2182_v2 = vpop.f32.mrf.mxu3  ;;  %vm2853_vm8 = vcmp.eq.f32.partialorder %v2852_v52, 8.507059e+37  ;;  %v2855_v35 = vor.u32 1.1754944e-38, %v2854_v8 }
 0x188   : > { %v3230_v5 = vmin.f32 %v3198_v58, 0.999999  ;;  %v2726_v55 = vmul.f32 %v4762_v48, %v2725_v60  ;;  %v2183_v24 = vadd.f32 %v2182_v2, %v2164_v0  ;;  %2535 = vmatmul.bf16.vlgmr.msra.gmra.mxu2 %v5019_v61 }
 0x18a   : > { %v4764_v62 = vpop.eup %4763  ;;  %3262 = vst [vmem:[%s5157_s7 + $0xc8] sm:$0xff] %v3230_v5  ;;  %v2727_v17 = vadd.f32 %v4762_v48, %v2726_v55  ;;  %v4433_v11 = vmul.f32 -1.442695, %v2183_v24  ;;  %2554 = vmatmul.bf16.vlgmr.msra.gmra.mxu3 %v5021_v63  ;;  %v2197_v63 = vadd.f32 %v2196_v30, %v5310_v50 }
 0x18b   : > { %v4766_v16 = vpop.eup %4765  ;;  %v5322_v45 = vadd.f32 1.0, %v4764_v62 }
 0x18c   : > { %v2731_v18 = vsel %vm2730_vm3, %v4762_v48, %v2727_v17  ;;  %v2844_v19 = vmul.f32 %v4766_v16, %v5302_v40  ;;  %4767 = vpow2.f32 %v4433_v11  ;;  %vm2849_vm5 = vweird.f32 %v4766_v16  ;;  %v2199_v15 = vpop.f32.mrf.mxu0 }
 0x18d   : > { %v2736_v20 = vsel %vm2733_vm4, %v2735_v14, %v2731_v18  ;;  %4769 = vrcp.f32 %v5322_v45  ;;  %v2232_v4 = vpop.f32.mrf.mxu2  ;;  %vm2850_vm7 = vmor %vm2848_vm6, %vm2849_vm5  ;;  %v2216_v39 = vadd.f32 %v2215_v7, %v2197_v63  ;;  %v2972_v48 = vand.u32 2147483647, %v5322_v45 }
 0x18e   : > { %v3175_v23 = vmax.f32 %v2736_v20, 1e-06  ;;  %v2845_v61 = vsub.f32 1.0, %v2844_v19  ;;  %v2233_v21 = vadd.f32 %v2232_v4, %v2214_v44  ;;  %v2218_v1 = vpop.f32.mrf.mxu1  ;;  %v2200_v49 = vadd.f32 %v2199_v15, %v5310_v50 }
 0x18f   : > { %v2251_v27 = vpop.f32.mrf.mxu3  ;;  %vm2968_vm10 = vweird.f32 %v5322_v45  ;;  %vm2973_vm12 = vcmp.eq.f32.partialorder %v2972_v48, 8.507059e+37 }
 0x190   : > { %v3207_v28 = vmin.f32 %v3175_v23, 0.999999  ;;  %v2846_v29 = vmul.f32 %v4766_v16, %v2845_v61  ;;  %v2252_v59 = vadd.f32 %v2251_v27, %v2233_v21  ;;  %2502 = vmatmul.bf16.gmra.mxu0 %v5029_v43  ;;  %v2974_v43 = vand.u32 2147483648, %v5322_v45 }
 0x191   : > { %v2219_v10 = vadd.f32 %v2218_v1, %v2200_v49  ;;  %v5352_v21 = vperm.slane %v5307_v22, 4 }
 0x192   : > { %v4768_v31 = vpop.eup %4767  ;;  %3239 = vst [vmem:[%s5157_s7 + $0x10] sm:$0xff] %v3207_v28  ;;  %v2847_v32 = vadd.f32 %v4766_v16, %v2846_v29  ;;  %v4410_v33 = vmul.f32 -1.442695, %v2252_v59  ;;  %2521 = vmatmul.bf16.gmra.mxu1 %v5032_v46  ;;  %v2975_v0 = vor.u32 1.1754944e-38, %v2974_v43 }
 0x193   : > { %v4770_v9 = vpop.eup %4769  ;;  %v5332_v36 = vadd.f32 1.0, %v4768_v31 }
 0x194   : > { %v2851_v37 = vsel %vm2850_vm7, %v4766_v16, %v2847_v32  ;;  %v2964_v57 = vmul.f32 %v4770_v9, %v5322_v45  ;;  %4771 = vpow2.f32 %v4410_v33  ;;  %vm2969_vm9 = vweird.f32 %v4770_v9  ;;  %v2201_v46 = vpop.f32.mrf.mxu0 }
 0x195   : > { %v2856_v25 = vsel %vm2853_vm8, %v2855_v35, %v2851_v37  ;;  %4773 = vrcp.f32 %v5332_v36  ;;  %v2234_v34 = vpop.f32.mrf.mxu2  ;;  %vm2970_vm11 = vmor %vm2968_vm10, %vm2969_vm9  ;;  %v3092_v62 = vand.u32 2147483647, %v5332_v36  ;;  %v3094_v17 = vand.u32 2147483648, %v5332_v36 }
 0x196   : > { %v3183_v41 = vmax.f32 %v2856_v25, 1e-06  ;;  %v2965_v42 = vsub.f32 1.0, %v2964_v57  ;;  %v2235_v38 = vadd.f32 %v2234_v34, %v2216_v39  ;;  %v2220_v53 = vpop.f32.mrf.mxu1  ;;  %v2202_v11 = vadd.f32 %v2201_v46, %v5310_v50 }
 0x197   : > { %v2253_v47 = vpop.f32.mrf.mxu3  ;;  %vm3088_vm14 = vweird.f32 %v5332_v36  ;;  %vm3093_vm0 = vcmp.eq.f32.partialorder %v3092_v62, 8.507059e+37  ;;  %v3095_v23 = vor.u32 1.1754944e-38, %v3094_v17 }
 0x198   : > { %v3215_v40 = vmin.f32 %v3183_v41, 0.999999  ;;  %v2966_v51 = vmul.f32 %v4770_v9, %v2965_v42  ;;  %v2254_v54 = vadd.f32 %v2253_v47, %v2235_v38  ;;  %2540 = vmatmul.bf16.gmra.mxu2 %v5039_v12  ;;  %v2221_v52 = vadd.f32 %v2220_v53, %v2202_v11 }
 0x19a   : > { %v4772_v6 = vpop.eup %4771  ;;  %3247 = vst [vmem:[%s5157_s7 + $0x50] sm:$0xff] %v3215_v40  ;;  %v2967_v56 = vadd.f32 %v4770_v9, %v2966_v51  ;;  %v4418_v58 = vmul.f32 -1.442695, %v2254_v54  ;;  %2559 = vmatmul.bf16.gmra.mxu3 %v5041_v13 }
 0x19b   : > { %v4774_v60 = vpop.eup %4773  ;;  %v2664_v2 = vadd.f32 1.0, %v4772_v6 }
 0x19c   : > { %v2971_v3 = vsel %vm2970_vm11, %v4770_v9, %v2967_v56  ;;  %v3084_v26 = vmul.f32 %v4774_v60, %v5332_v36  ;;  %4775 = vpow2.f32 %v4418_v58  ;;  %vm3089_vm13 = vweird.f32 %v4774_v60  ;;  %v2270_v45 = vpop.f32.mrf.mxu0 }
 0x19d   : > { %v2976_v5 = vsel %vm2973_vm12, %v2975_v0, %v2971_v3  ;;  %4777 = vrcp.f32 %v2664_v2  ;;  %v2237_v55 = vpop.f32.mrf.mxu2  ;;  %vm3090_vm15 = vmor %vm3088_vm14, %vm3089_vm13  ;;  %v2747_v1 = vand.u32 2147483647, %v2664_v2  ;;  %v2749_v31 = vand.u32 2147483648, %v2664_v2 }
 0x19e   : > { %v3191_v24 = vmax.f32 %v2976_v5, 1e-06  ;;  %v3085_v30 = vsub.f32 1.0, %v3084_v26  ;;  %v2238_v7 = vadd.f32 %v2237_v55, %v2219_v10  ;;  %v2289_v18 = vpop.f32.mrf.mxu1  ;;  %v2271_v32 = vadd.f32 %v2270_v45, %v5352_v21 }
 0x19f   : > { %v2256_v12 = vpop.f32.mrf.mxu3  ;;  %vm2743_vm2 = vweird.f32 %v2664_v2  ;;  %vm2748_vm4 = vcmp.eq.f32.partialorder %v2747_v1, 8.507059e+37  ;;  %v2750_v41 = vor.u32 1.1754944e-38, %v2749_v31 }
 0x1a0   : > { %v3223_v13 = vmin.f32 %v3191_v24, 0.999999  ;;  %v3086_v16 = vmul.f32 %v4774_v60, %v3085_v30  ;;  %v2257_v14 = vadd.f32 %v2256_v12, %v2238_v7  ;;  %v2290_v48 = vadd.f32 %v2289_v18, %v2271_v32 }
 0x1a2   : > { %v4776_v19 = vpop.eup %4775  ;;  %3255 = vst [vmem:[%s5157_s7 + $0x90] sm:$0xff] %v3223_v13  ;;  %v3087_v44 = vadd.f32 %v4774_v60, %v3086_v16  ;;  %v4426_v20 = vmul.f32 -1.442695, %v2257_v14 }
 0x1a3   : > { %v4778_v4 = vpop.eup %4777  ;;  %v2672_v61 = vadd.f32 1.0, %v4776_v19 }
 0x1a4   : > { %v3091_v50 = vsel %vm3090_vm15, %v4774_v60, %v3087_v44  ;;  %v2739_v27 = vmul.f32 %v4778_v4, %v2664_v2  ;;  %4779 = vpow2.f32 %v4426_v20  ;;  %vm2744_vm1 = vweird.f32 %v4778_v4  ;;  %v2272_v36 = vpop.f32.mrf.mxu0 }
 0x1a5   : > { %v3096_v8 = vsel %vm3093_vm0, %v3095_v23, %v3091_v50  ;;  %4781 = vrcp.f32 %v2672_v61  ;;  %v2239_v63 = vpop.f32.mrf.mxu2  ;;  %vm2745_vm3 = vmor %vm2743_vm2, %vm2744_vm1  ;;  %v2867_v53 = vand.u32 2147483647, %v2672_v61  ;;  %v2869_v6 = vand.u32 2147483648, %v2672_v61 }
 0x1a6   : > { %v3199_v28 = vmax.f32 %v3096_v8, 1e-06  ;;  %v2740_v29 = vsub.f32 1.0, %v2739_v27  ;;  %v2240_v59 = vadd.f32 %v2239_v63, %v2221_v52  ;;  %v2291_v37 = vpop.f32.mrf.mxu1  ;;  %v2273_v56 = vadd.f32 %v2272_v36, %v5352_v21 }
 0x1a7   : > { %v2258_v15 = vpop.f32.mrf.mxu3  ;;  %vm2863_vm6 = vweird.f32 %v2672_v61  ;;  %vm2868_vm8 = vcmp.eq.f32.partialorder %v2867_v53, 8.507059e+37  ;;  %v2870_v24 = vor.u32 1.1754944e-38, %v2869_v6 }
 0x1a8   : > { %v3231_v33 = vmin.f32 %v3199_v28, 0.999999  ;;  %v2741_v9 = vmul.f32 %v4778_v4, %v2740_v29  ;;  %v2259_v35 = vadd.f32 %v2258_v15, %v2240_v59  ;;  %v2292_v62 = vadd.f32 %v2291_v37, %v2273_v56 }
 0x1aa   : > { %v4780_v57 = vpop.eup %4779  ;;  %3263 = vst [vmem:[%s5157_s7 + $0xd0] sm:$0xff] %v3231_v33  ;;  %v2742_v39 = vadd.f32 %v4778_v4, %v2741_v9  ;;  %v4434_v25 = vmul.f32 -1.442695, %v2259_v35 }
 0x1ab   : > { %v4782_v34 = vpop.eup %4781  ;;  %v2680_v42 = vadd.f32 1.0, %v4780_v57 }
 0x1ac   : > { %v2746_v38 = vsel %vm2745_vm3, %v4778_v4, %v2742_v39  ;;  %v2859_v47 = vmul.f32 %v4782_v34, %v2672_v61  ;;  %4783 = vpow2.f32 %v4434_v25  ;;  %vm2864_vm5 = vweird.f32 %v4782_v34  ;;  %v2275_v2 = vpop.f32.mrf.mxu0 }
 0x1ad   : > { %v2751_v43 = vsel %vm2748_vm4, %v2750_v41, %v2746_v38  ;;  %4785 = vrcp.f32 %v2680_v42  ;;  %v2308_v49 = vpop.f32.mrf.mxu2  ;;  %vm2865_vm7 = vmor %vm2863_vm6, %vm2864_vm5  ;;  %v2987_v18 = vand.u32 2147483647, %v2680_v42  ;;  %v2989_v19 = vand.u32 2147483648, %v2680_v42 }
 0x1ae   : > { %v3176_v40 = vmax.f32 %v2751_v43, 1e-06  ;;  %v2860_v51 = vsub.f32 1.0, %v2859_v47  ;;  %v2309_v54 = vadd.f32 %v2308_v49, %v2290_v48  ;;  %v2294_v3 = vpop.f32.mrf.mxu1  ;;  %v2276_v44 = vadd.f32 %v2275_v2, %v5352_v21 }
 0x1af   : > { %v2327_v46 = vpop.f32.mrf.mxu3  ;;  %vm2983_vm10 = vweird.f32 %v2680_v42  ;;  %vm2988_vm12 = vcmp.eq.f32.partialorder %v2987_v18, 8.507059e+37  ;;  %v2990_v28 = vor.u32 1.1754944e-38, %v2989_v19 }
 0x1b0   : > { %v3208_v58 = vmin.f32 %v3176_v40, 0.999999  ;;  %v2861_v60 = vmul.f32 %v4782_v34, %v2860_v51  ;;  %v2328_v0 = vadd.f32 %v2327_v46, %v2309_v54  ;;  %v2295_v1 = vadd.f32 %v2294_v3, %v2276_v44 }
 0x1b1   : > { %v5363_v54 = vperm.slane %v5307_v22, 5 }
 0x1b2   : > { %v4784_v26 = vpop.eup %4783  ;;  %3240 = vst [vmem:[%s5157_s7 + $0x18] sm:$0xff] %v3208_v58  ;;  %v2862_v10 = vadd.f32 %v4782_v34, %v2861_v60  ;;  %v4411_v5 = vmul.f32 -1.442695, %v2328_v0 }
 0x1b3   : > { %v4786_v55 = vpop.eup %4785  ;;  %v2688_v30 = vadd.f32 1.0, %v4784_v26 }
 0x1b4   : > { %v2866_v7 = vsel %vm2865_vm7, %v4782_v34, %v2862_v10  ;;  %v2979_v12 = vmul.f32 %v4786_v55, %v2680_v42  ;;  %4787 = vpow2.f32 %v4411_v5  ;;  %vm2984_vm9 = vweird.f32 %v4786_v55  ;;  %v2277_v61 = vpop.f32.mrf.mxu0 }
 0x1b5   : > { %v2871_v17 = vsel %vm2868_vm8, %v2870_v24, %v2866_v7  ;;  %4789 = vrcp.f32 %v2688_v30  ;;  %v2310_v11 = vpop.f32.mrf.mxu2  ;;  %vm2985_vm11 = vmor %vm2983_vm10, %vm2984_vm9  ;;  %v3107_v37 = vand.u32 2147483647, %v2688_v30  ;;  %v3109_v57 = vand.u32 2147483648, %v2688_v30 }
 0x1b6   : > { %v3184_v13 = vmax.f32 %v2871_v17, 1e-06  ;;  %v2980_v16 = vsub.f32 1.0, %v2979_v12  ;;  %v2311_v14 = vadd.f32 %v2310_v11, %v2292_v62  ;;  %v2296_v50 = vpop.f32.mrf.mxu1  ;;  %v2278_v39 = vadd.f32 %v2277_v61, %v5352_v21 }
 0x1b7   : > { %v2329_v45 = vpop.f32.mrf.mxu3  ;;  %vm3103_vm14 = vweird.f32 %v2688_v30  ;;  %vm3108_vm0 = vcmp.eq.f32.partialorder %v3107_v37, 8.507059e+37  ;;  %v3110_v40 = vor.u32 1.1754944e-38, %v3109_v57 }
 0x1b8   : > { %v3216_v20 = vmin.f32 %v3184_v13, 0.999999  ;;  %v2981_v4 = vmul.f32 %v4786_v55, %v2980_v16  ;;  %v2330_v23 = vadd.f32 %v2329_v45, %v2311_v14  ;;  %v2297_v53 = vadd.f32 %v2296_v50, %v2278_v39 }
 0x1ba   : > { %v4788_v27 = vpop.eup %4787  ;;  %3248 = vst [vmem:[%s5157_s7 + $0x58] sm:$0xff] %v3216_v20  ;;  %v2982_v52 = vadd.f32 %v4786_v55, %v2981_v4  ;;  %v4419_v8 = vmul.f32 -1.442695, %v2330_v23 }
 0x1bb   : > { %v4790_v63 = vpop.eup %4789  ;;  %v2665_v29 = vadd.f32 1.0, %v4788_v27 }
 0x1bc   : > { %v2986_v59 = vsel %vm2985_vm11, %v4786_v55, %v2982_v52  ;;  %v3099_v15 = vmul.f32 %v4790_v63, %v2688_v30  ;;  %4791 = vpow2.f32 %v4419_v8  ;;  %vm3104_vm13 = vweird.f32 %v4790_v63  ;;  %v2346_v42 = vpop.f32.mrf.mxu0 }
 0x1bd   : > { %v2991_v31 = vsel %vm2988_vm12, %v2990_v28, %v2986_v59  ;;  %4793 = vrcp.f32 %v2665_v29  ;;  %v2313_v32 = vpop.f32.mrf.mxu2  ;;  %vm3105_vm15 = vmor %vm3103_vm14, %vm3104_vm13  ;;  %v2762_v3 = vand.u32 2147483647, %v2665_v29  ;;  %v2764_v26 = vand.u32 2147483648, %v2665_v29 }
 0x1be   : > { %v3192_v33 = vmax.f32 %v2991_v31, 1e-06  ;;  %v3100_v9 = vsub.f32 1.0, %v3099_v15  ;;  %v2314_v35 = vadd.f32 %v2313_v32, %v2295_v1  ;;  %v2365_v38 = vpop.f32.mrf.mxu1  ;;  %v2347_v10 = vadd.f32 %v2346_v42, %v5363_v54 }
 0x1bf   : > { %v2332_v36 = vpop.f32.mrf.mxu3  ;;  %vm2758_vm2 = vweird.f32 %v2665_v29  ;;  %vm2763_vm4 = vcmp.eq.f32.partialorder %v2762_v3, 8.507059e+37  ;;  %v2765_v13 = vor.u32 1.1754944e-38, %v2764_v26 }
 0x1c0   : > { %v3224_v25 = vmin.f32 %v3192_v33, 0.999999  ;;  %v3101_v34 = vmul.f32 %v4790_v63, %v3100_v9  ;;  %v2333_v41 = vadd.f32 %v2332_v36, %v2314_v35  ;;  %v2366_v18 = vadd.f32 %v2365_v38, %v2347_v10 }
 0x1c2   : > { %v4792_v47 = vpop.eup %4791  ;;  %3256 = vst [vmem:[%s5157_s7 + $0x98] sm:$0xff] %v3224_v25  ;;  %v3102_v48 = vadd.f32 %v4790_v63, %v3101_v34  ;;  %v4427_v43 = vmul.f32 -1.442695, %v2333_v41 }
 0x1c3   : > { %v4794_v49 = vpop.eup %4793  ;;  %v2673_v51 = vadd.f32 1.0, %v4792_v47 }
 0x1c4   : > { %v3106_v21 = vsel %vm3105_vm15, %v4790_v63, %v3102_v48  ;;  %v2754_v46 = vmul.f32 %v4794_v49, %v2665_v29  ;;  %4795 = vpow2.f32 %v4427_v43  ;;  %vm2759_vm1 = vweird.f32 %v4794_v49  ;;  %v2348_v30 = vpop.f32.mrf.mxu0 }
 0x1c5   : > { %v3111_v6 = vsel %vm3108_vm0, %v3110_v40, %v3106_v21  ;;  %4797 = vrcp.f32 %v2673_v51  ;;  %v2315_v56 = vpop.f32.mrf.mxu2  ;;  %vm2760_vm3 = vmor %vm2758_vm2, %vm2759_vm1  ;;  %v2882_v50 = vand.u32 2147483647, %v2673_v51  ;;  %v2884_v27 = vand.u32 2147483648, %v2673_v51 }
 0x1c6   : > { %v3200_v58 = vmax.f32 %v3111_v6, 1e-06  ;;  %v2755_v60 = vsub.f32 1.0, %v2754_v46  ;;  %v2316_v0 = vadd.f32 %v2315_v56, %v2297_v53  ;;  %v2367_v7 = vpop.f32.mrf.mxu1  ;;  %v2349_v52 = vadd.f32 %v2348_v30, %v5363_v54 }
 0x1c7   : > { %v2334_v2 = vpop.f32.mrf.mxu3  ;;  %vm2878_vm6 = vweird.f32 %v2673_v51  ;;  %vm2883_vm8 = vcmp.eq.f32.partialorder %v2882_v50, 8.507059e+37  ;;  %v2885_v33 = vor.u32 1.1754944e-38, %v2884_v27 }
 0x1c8   : > { %v3232_v5 = vmin.f32 %v3200_v58, 0.999999  ;;  %v2756_v55 = vmul.f32 %v4794_v49, %v2755_v60  ;;  %v2335_v24 = vadd.f32 %v2334_v2, %v2316_v0  ;;  %v2368_v37 = vadd.f32 %v2367_v7, %v2349_v52 }
 0x1ca   : > { %v4796_v12 = vpop.eup %4795  ;;  %3264 = vst [vmem:[%s5157_s7 + $0xd8] sm:$0xff] %v3232_v5  ;;  %v2757_v62 = vadd.f32 %v4794_v49, %v2756_v55  ;;  %v4435_v17 = vmul.f32 -1.442695, %v2335_v24 }
 0x1cb   : > { %v4798_v11 = vpop.eup %4797  ;;  %v2681_v16 = vadd.f32 1.0, %v4796_v12 }
 0x1cc   : > { %v2761_v14 = vsel %vm2760_vm3, %v4794_v49, %v2757_v62  ;;  %v2874_v45 = vmul.f32 %v4798_v11, %v2673_v51  ;;  %4799 = vpow2.f32 %v4435_v17  ;;  %vm2879_vm5 = vweird.f32 %v4798_v11  ;;  %v2351_v29 = vpop.f32.mrf.mxu0 }
 0x1cd   : > { %v2766_v19 = vsel %vm2763_vm4, %v2765_v13, %v2761_v14  ;;  %4801 = vrcp.f32 %v2681_v16  ;;  %v2384_v44 = vpop.f32.mrf.mxu2  ;;  %vm2880_vm7 = vmor %vm2878_vm6, %vm2879_vm5  ;;  %v3002_v38 = vand.u32 2147483647, %v2681_v16  ;;  %v3004_v47 = vand.u32 2147483648, %v2681_v16 }
 0x1ce   : > { %v3177_v20 = vmax.f32 %v2766_v19, 1e-06  ;;  %v2875_v4 = vsub.f32 1.0, %v2874_v45  ;;  %v2385_v23 = vadd.f32 %v2384_v44, %v2366_v18  ;;  %v2370_v59 = vpop.f32.mrf.mxu1  ;;  %v2352_v48 = vadd.f32 %v2351_v29, %v5363_v54 }
 0x1cf   : > { %v2403_v61 = vpop.f32.mrf.mxu3  ;;  %vm2998_vm10 = vweird.f32 %v2681_v16  ;;  %vm3003_vm12 = vcmp.eq.f32.partialorder %v3002_v38, 8.507059e+37  ;;  %v3005_v58 = vor.u32 1.1754944e-38, %v3004_v47 }
 0x1d0   : > { %v3209_v8 = vmin.f32 %v3177_v20, 0.999999  ;;  %v2876_v63 = vmul.f32 %v4798_v11, %v2875_v4  ;;  %v2404_v28 = vadd.f32 %v2403_v61, %v2385_v23  ;;  %v2371_v3 = vadd.f32 %v2370_v59, %v2352_v48 }
 0x1d1   : > { %v5374_v23 = vperm.slane %v5307_v22, 6 }
 0x1d2   : > { %v4800_v15 = vpop.eup %4799  ;;  %3241 = vst [vmem:[%s5157_s7 + $0x20] sm:$0xff] %v3209_v8  ;;  %v2877_v1 = vadd.f32 %v4798_v11, %v2876_v63  ;;  %v4412_v31 = vmul.f32 -1.442695, %v2404_v28 }
 0x1d3   : > { %v4802_v32 = vpop.eup %4801  ;;  %v2689_v9 = vadd.f32 1.0, %v4800_v15 }
 0x1d4   : > { %v2881_v35 = vsel %vm2880_vm7, %v4798_v11, %v2877_v1  ;;  %v2994_v36 = vmul.f32 %v4802_v32, %v2681_v16  ;;  %4803 = vpow2.f32 %v4412_v31  ;;  %vm2999_vm9 = vweird.f32 %v4802_v32  ;;  %v2353_v51 = vpop.f32.mrf.mxu0 }
 0x1d5   : > { %v2886_v57 = vsel %vm2883_vm8, %v2885_v33, %v2881_v35  ;;  %4805 = vrcp.f32 %v2689_v9  ;;  %v2386_v39 = vpop.f32.mrf.mxu2  ;;  %vm3000_vm11 = vmor %vm2998_vm10, %vm2999_vm9  ;;  %v3122_v7 = vand.u32 2147483647, %v2689_v9  ;;  %v3124_v12 = vand.u32 2147483648, %v2689_v9 }
 0x1d6   : > { %v3185_v25 = vmax.f32 %v2886_v57, 1e-06  ;;  %v2995_v34 = vsub.f32 1.0, %v2994_v36  ;;  %v2387_v41 = vadd.f32 %v2386_v39, %v2368_v37  ;;  %v2372_v21 = vpop.f32.mrf.mxu1  ;;  %v2354_v62 = vadd.f32 %v2353_v51, %v5363_v54 }
 0x1d7   : > { %v2405_v42 = vpop.f32.mrf.mxu3  ;;  %vm3118_vm14 = vweird.f32 %v2689_v9  ;;  %vm3123_vm0 = vcmp.eq.f32.partialorder %v3122_v7, 8.507059e+37  ;;  %v3125_v20 = vor.u32 1.1754944e-38, %v3124_v12 }
 0x1d8   : > { %v3217_v43 = vmin.f32 %v3185_v25, 0.999999  ;;  %v2996_v49 = vmul.f32 %v4802_v32, %v2995_v34  ;;  %v2406_v40 = vadd.f32 %v2405_v42, %v2387_v41  ;;  %v2373_v50 = vadd.f32 %v2372_v21, %v2354_v62 }
 0x1da   : > { %v4804_v46 = vpop.eup %4803  ;;  %3249 = vst [vmem:[%s5157_s7 + $0x60] sm:$0xff] %v3217_v43  ;;  %v2997_v53 = vadd.f32 %v4802_v32, %v2996_v49  ;;  %v4420_v6 = vmul.f32 -1.442695, %v2406_v40 }
 0x1db   : > { %v4806_v56 = vpop.eup %4805  ;;  %v2666_v60 = vadd.f32 1.0, %v4804_v46 }
 0x1dc   : > { %v3001_v0 = vsel %vm3000_vm11, %v4802_v32, %v2997_v53  ;;  %v3114_v2 = vmul.f32 %v4806_v56, %v2689_v9  ;;  %4807 = vpow2.f32 %v4420_v6  ;;  %vm3119_vm13 = vweird.f32 %v4806_v56 }
 0x1dd   : > { %v3006_v26 = vsel %vm3003_vm12, %v3005_v58, %v3001_v0  ;;  %4809 = vrcp.f32 %v2666_v60  ;;  %v2389_v10 = vpop.f32.mrf.mxu2  ;;  %v2422_v16 = vpop.f32.mrf.mxu0  ;;  %vm3120_vm15 = vmor %vm3118_vm14, %vm3119_vm13  ;;  %v2777_v59 = vand.u32 2147483647, %v2666_v60  ;;  %v2779_v15 = vand.u32 2147483648, %v2666_v60 }
 0x1de   : > { %v3193_v5 = vmax.f32 %v3006_v26, 1e-06  ;;  %v3115_v55 = vsub.f32 1.0, %v3114_v2  ;;  %v2390_v24 = vadd.f32 %v2389_v10, %v2371_v3  ;;  %v2423_v1 = vadd.f32 %v2422_v16, %v5374_v23 }
 0x1df   : > { %v2408_v30 = vpop.f32.mrf.mxu3  ;;  %v2441_v14 = vpop.f32.mrf.mxu1  ;;  %vm2773_vm2 = vweird.f32 %v2666_v60  ;;  %vm2778_vm4 = vcmp.eq.f32.partialorder %v2777_v59, 8.507059e+37  ;;  %v2780_v25 = vor.u32 1.1754944e-38, %v2779_v15 }
 0x1e0   : > { %v3225_v17 = vmin.f32 %v3193_v5, 0.999999  ;;  %v3116_v11 = vmul.f32 %v4806_v56, %v3115_v55  ;;  %v2409_v13 = vadd.f32 %v2408_v30, %v2390_v24  ;;  %v2442_v38 = vadd.f32 %v2441_v14, %v2423_v1 }
 0x1e2   : > { %v4808_v45 = vpop.eup %4807  ;;  %3257 = vst [vmem:[%s5157_s7 + $0xa0] sm:$0xff] %v3225_v17  ;;  %v3117_v18 = vadd.f32 %v4806_v56, %v3116_v11  ;;  %v4428_v19 = vmul.f32 -1.442695, %v2409_v13 }
 0x1e3   : > { %v4810_v44 = vpop.eup %4809  ;;  %v2674_v4 = vadd.f32 1.0, %v4808_v45 }
 0x1e4   : > { %v3121_v54 = vsel %vm3120_vm15, %v4806_v56, %v3117_v18  ;;  %v2769_v61 = vmul.f32 %v4810_v44, %v2666_v60  ;;  %4811 = vpow2.f32 %v4428_v19  ;;  %vm2774_vm1 = vweird.f32 %v4810_v44 }
 0x1e5   : > { %v3126_v27 = vsel %vm3123_vm0, %v3125_v20, %v3121_v54  ;;  %4813 = vrcp.f32 %v2674_v4  ;;  %v2391_v52 = vpop.f32.mrf.mxu2  ;;  %v2424_v9 = vpop.f32.mrf.mxu0  ;;  %vm2775_vm3 = vmor %vm2773_vm2, %vm2774_vm1  ;;  %v2897_v21 = vand.u32 2147483647, %v2674_v4  ;;  %v2899_v46 = vand.u32 2147483648, %v2674_v4 }
 0x1e6   : > { %v3201_v8 = vmax.f32 %v3126_v27, 1e-06  ;;  %v2770_v63 = vsub.f32 1.0, %v2769_v61  ;;  %v2392_v28 = vadd.f32 %v2391_v52, %v2373_v50  ;;  %v2425_v53 = vadd.f32 %v2424_v9, %v5374_v23 }
 0x1e7   : > { %v2410_v29 = vpop.f32.mrf.mxu3  ;;  %v2443_v35 = vpop.f32.mrf.mxu1  ;;  %vm2893_vm6 = vweird.f32 %v2674_v4  ;;  %vm2898_vm8 = vcmp.eq.f32.partialorder %v2897_v21, 8.507059e+37  ;;  %v2900_v5 = vor.u32 1.1754944e-38, %v2899_v46 }
 0x1e8   : > { %v3233_v31 = vmin.f32 %v3201_v8, 0.999999  ;;  %v2771_v32 = vmul.f32 %v4810_v44, %v2770_v63  ;;  %v2411_v33 = vadd.f32 %v2410_v29, %v2392_v28  ;;  %v2444_v7 = vadd.f32 %v2443_v35, %v2425_v53 }
 0x1ea   : > { %v4812_v36 = vpop.eup %4811  ;;  %3265 = vst [vmem:[%s5157_s7 + $0xe0] sm:$0xff] %v3233_v31  ;;  %v2772_v37 = vadd.f32 %v4810_v44, %v2771_v32  ;;  %v4436_v57 = vmul.f32 -1.442695, %v2411_v33 }
 0x1eb   : > { %v4814_v39 = vpop.eup %4813  ;;  %v2682_v34 = vadd.f32 1.0, %v4812_v36 }
 0x1ec   : > { %v2776_v41 = vsel %vm2775_vm3, %v4810_v44, %v2772_v37  ;;  %v2889_v42 = vmul.f32 %v4814_v39, %v2674_v4  ;;  %4815 = vpow2.f32 %v4436_v57  ;;  %vm2894_vm5 = vweird.f32 %v4814_v39 }
 0x1ed   : > { %v2781_v47 = vsel %vm2778_vm4, %v2780_v25, %v2776_v41  ;;  %4817 = vrcp.f32 %v2682_v34  ;;  %v2460_v48 = vpop.f32.mrf.mxu2  ;;  %v2427_v60 = vpop.f32.mrf.mxu0  ;;  %vm2895_vm7 = vmor %vm2893_vm6, %vm2894_vm5  ;;  %v3017_v14 = vand.u32 2147483647, %v2682_v34  ;;  %v3019_v45 = vand.u32 2147483648, %v2682_v34 }
 0x1ee   : > { %v3178_v43 = vmax.f32 %v2781_v47, 1e-06  ;;  %v2890_v49 = vsub.f32 1.0, %v2889_v42  ;;  %v2461_v40 = vadd.f32 %v2460_v48, %v2442_v38  ;;  %v2428_v18 = vadd.f32 %v2427_v60, %v5374_v23 }
 0x1ef   : > { %v2479_v51 = vpop.f32.mrf.mxu3  ;;  %v2446_v0 = vpop.f32.mrf.mxu1  ;;  %vm3013_vm10 = vweird.f32 %v2682_v34  ;;  %vm3018_vm12 = vcmp.eq.f32.partialorder %v3017_v14, 8.507059e+37  ;;  %v3020_v52 = vor.u32 1.1754944e-38, %v3019_v45 }
 0x1f0   : > { %v3210_v6 = vmin.f32 %v3178_v43, 0.999999  ;;  %v2891_v56 = vmul.f32 %v4814_v39, %v2890_v49  ;;  %v2480_v58 = vadd.f32 %v2479_v51, %v2461_v40  ;;  %v2447_v59 = vadd.f32 %v2446_v0, %v2428_v18 }
 0x1f1   : > { %v5385_v49 = vperm.slane %v5307_v22, 7 }
 0x1f2   : > { %v4816_v2 = vpop.eup %4815  ;;  %3242 = vst [vmem:[%s5157_s7 + $0x28] sm:$0xff] %v3210_v6  ;;  %v2892_v3 = vadd.f32 %v4814_v39, %v2891_v56  ;;  %v4413_v26 = vmul.f32 -1.442695, %v2480_v58 }
 0x1f3   : > { %v4818_v10 = vpop.eup %4817  ;;  %v2690_v55 = vadd.f32 1.0, %v4816_v2 }
 0x1f4   : > { %v2896_v24 = vsel %vm2895_vm7, %v4814_v39, %v2892_v3  ;;  %v3009_v30 = vmul.f32 %v4818_v10, %v2682_v34  ;;  %4819 = vpow2.f32 %v4413_v26  ;;  %vm3014_vm9 = vweird.f32 %v4818_v10 }
 0x1f5   : > { %v2901_v12 = vsel %vm2898_vm8, %v2900_v5, %v2896_v24  ;;  %4821 = vrcp.f32 %v2690_v55  ;;  %v2462_v62 = vpop.f32.mrf.mxu2  ;;  %v2429_v4 = vpop.f32.mrf.mxu0  ;;  %vm3015_vm11 = vmor %vm3013_vm10, %vm3014_vm9  ;;  %v3137_v35 = vand.u32 2147483647, %v2690_v55  ;;  %v3139_v36 = vand.u32 2147483648, %v2690_v55 }
 0x1f6   : > { %v3186_v17 = vmax.f32 %v2901_v12, 1e-06  ;;  %v3010_v11 = vsub.f32 1.0, %v3009_v30  ;;  %v2463_v13 = vadd.f32 %v2462_v62, %v2444_v7  ;;  %v2430_v37 = vadd.f32 %v2429_v4, %v5374_v23 }
 0x1f7   : > { %v2481_v16 = vpop.f32.mrf.mxu3  ;;  %v2448_v63 = vpop.f32.mrf.mxu1  ;;  %vm3133_vm14 = vweird.f32 %v2690_v55  ;;  %vm3138_vm0 = vcmp.eq.f32.partialorder %v3137_v35, 8.507059e+37  ;;  %v3140_v48 = vor.u32 1.1754944e-38, %v3139_v36 }
 0x1f8   : > { %v3218_v19 = vmin.f32 %v3186_v17, 0.999999  ;;  %v3011_v44 = vmul.f32 %v4818_v10, %v3010_v11  ;;  %v2482_v20 = vadd.f32 %v2481_v16, %v2463_v13  ;;  %v2449_v51 = vadd.f32 %v2448_v63, %v2430_v37 }
 0x1fa   : > { %v4820_v54 = vpop.eup %4819  ;;  %3250 = vst [vmem:[%s5157_s7 + $0x68] sm:$0xff] %v3218_v19  ;;  %v3012_v61 = vadd.f32 %v4818_v10, %v3011_v44  ;;  %v4421_v50 = vmul.f32 -1.442695, %v2482_v20 }
 0x1fb   : > { %v4822_v27 = vpop.eup %4821  ;;  %v2667_v8 = vadd.f32 1.0, %v4820_v54 }
 0x1fc   : > { %v3016_v28 = vsel %vm3015_vm11, %v4818_v10, %v3012_v61  ;;  %v3129_v29 = vmul.f32 %v4822_v27, %v2690_v55  ;;  %4823 = vpow2.f32 %v4421_v50  ;;  %vm3134_vm13 = vweird.f32 %v4822_v27 }
 0x1fd   : > { %v3021_v15 = vsel %vm3018_vm12, %v3020_v52, %v3016_v28  ;;  %4825 = vrcp.f32 %v2667_v8  ;;  %v2465_v1 = vpop.f32.mrf.mxu2  ;;  %v2498_v34 = vpop.f32.mrf.mxu0  ;;  %vm3135_vm15 = vmor %vm3133_vm14, %vm3134_vm13  ;;  %v2792_v0 = vand.u32 2147483647, %v2667_v8  ;;  %v2794_v2 = vand.u32 2147483648, %v2667_v8 }
 0x1fe   : > { %v3194_v31 = vmax.f32 %v3021_v15, 1e-06  ;;  %v3130_v32 = vsub.f32 1.0, %v3129_v29  ;;  %v2466_v33 = vadd.f32 %v2465_v1, %v2447_v59  ;;  %v2499_v3 = vadd.f32 %v2498_v34, %v5385_v49 }
 0x1ff   : > { %v2484_v9 = vpop.f32.mrf.mxu3  ;;  %v2517_v46 = vpop.f32.mrf.mxu1  ;;  %vm2788_vm2 = vweird.f32 %v2667_v8  ;;  %vm2793_vm4 = vcmp.eq.f32.partialorder %v2792_v0, 8.507059e+37  ;;  %v2795_v12 = vor.u32 1.1754944e-38, %v2794_v2 }
 0x200   : > { %v3226_v57 = vmin.f32 %v3194_v31, 0.999999  ;;  %v3131_v39 = vmul.f32 %v4822_v27, %v3130_v32  ;;  %v2485_v25 = vadd.f32 %v2484_v9, %v2466_v33  ;;  %v2518_v13 = vadd.f32 %v2517_v46, %v2499_v3 }
 0x202   : > { %v4824_v41 = vpop.eup %4823  ;;  %3258 = vst [vmem:[%s5157_s7 + $0xa8] sm:$0xff] %v3226_v57  ;;  %v3132_v42 = vadd.f32 %v4822_v27, %v3131_v39  ;;  %v4429_v38 = vmul.f32 -1.442695, %v2485_v25 }
 0x203   : > { %v4826_v47 = vpop.eup %4825  ;;  %v2675_v43 = vadd.f32 1.0, %v4824_v41 }
 0x204   : > { %v3136_v40 = vsel %vm3135_vm15, %v4822_v27, %v3132_v42  ;;  %v2784_v23 = vmul.f32 %v4826_v47, %v2667_v8  ;;  %4827 = vpow2.f32 %v4429_v38  ;;  %vm2789_vm1 = vweird.f32 %v4826_v47 }
 0x205   : > { %v3141_v21 = vsel %vm3138_vm0, %v3140_v48, %v3136_v40  ;;  %4829 = vrcp.f32 %v2675_v43  ;;  %v2467_v53 = vpop.f32.mrf.mxu2  ;;  %v2500_v5 = vpop.f32.mrf.mxu0  ;;  %vm2790_vm3 = vmor %vm2788_vm2, %vm2789_vm1  ;;  %v2912_v20 = vand.u32 2147483647, %v2675_v43  ;;  %v2914_v4 = vand.u32 2147483648, %v2675_v43 }
 0x206   : > { %v3202_v6 = vmax.f32 %v3141_v21, 1e-06  ;;  %v2785_v56 = vsub.f32 1.0, %v2784_v23  ;;  %v2468_v58 = vadd.f32 %v2467_v53, %v2449_v51  ;;  %v2501_v54 = vadd.f32 %v2500_v5, %v5385_v49 }
 0x207   : > { %v2486_v60 = vpop.f32.mrf.mxu3  ;;  %v2519_v61 = vpop.f32.mrf.mxu1  ;;  %vm2908_vm6 = vweird.f32 %v2675_v43  ;;  %vm2913_vm8 = vcmp.eq.f32.partialorder %v2912_v20, 8.507059e+37  ;;  %v2915_v15 = vor.u32 1.1754944e-38, %v2914_v4 }
 0x208   : > { %v3234_v26 = vmin.f32 %v3202_v6, 0.999999  ;;  %v2786_v22 = vmul.f32 %v4826_v47, %v2785_v56  ;;  %v2487_v10 = vadd.f32 %v2486_v60, %v2468_v58  ;;  %v2520_v33 = vadd.f32 %v2519_v61, %v2501_v54 }
 0x20a   : > { %v4828_v55 = vpop.eup %4827  ;;  %3266 = vst [vmem:[%s5157_s7 + $0xe8] sm:$0xff] %v3234_v26  ;;  %v2787_v24 = vadd.f32 %v4826_v47, %v2786_v22  ;;  %v4437_v30 = vmul.f32 -1.442695, %v2487_v10 }
 0x20b   : > { %v4830_v7 = vpop.eup %4829  ;;  %v2683_v62 = vadd.f32 1.0, %v4828_v55 }
 0x20c   : > { %v2791_v17 = vsel %vm2790_vm3, %v4826_v47, %v2787_v24  ;;  %v2904_v11 = vmul.f32 %v4830_v7, %v2675_v43  ;;  %4831 = vpow2.f32 %v4437_v30  ;;  %vm2909_vm5 = vweird.f32 %v4830_v7 }
 0x20d   : > { %v2796_v16 = vsel %vm2793_vm4, %v2795_v12, %v2791_v17  ;;  %4833 = vrcp.f32 %v2683_v62  ;;  %v2536_v14 = vpop.f32.mrf.mxu2  ;;  %v2503_v29 = vpop.f32.mrf.mxu0  ;;  %vm2910_vm7 = vmor %vm2908_vm6, %vm2909_vm5  ;;  %v3032_v25 = vand.u32 2147483647, %v2683_v62  ;;  %v3034_v34 = vand.u32 2147483648, %v2683_v62 }
 0x20e   : > { %v3179_v45 = vmax.f32 %v2796_v16, 1e-06  ;;  %v2905_v18 = vsub.f32 1.0, %v2904_v11  ;;  %v2537_v19 = vadd.f32 %v2536_v14, %v2518_v13  ;;  %v2504_v41 = vadd.f32 %v2503_v29, %v5385_v49 }
 0x20f   : > { %v2555_v44 = vpop.f32.mrf.mxu3  ;;  %v2522_v48 = vpop.f32.mrf.mxu1  ;;  %vm3028_vm10 = vweird.f32 %v2683_v62  ;;  %vm3033_vm12 = vcmp.eq.f32.partialorder %v3032_v25, 8.507059e+37  ;;  %v3035_v21 = vor.u32 1.1754944e-38, %v3034_v34 }
 0x210   : > { %v3211_v50 = vmin.f32 %v3179_v45, 0.999999  ;;  %v2906_v27 = vmul.f32 %v4830_v7, %v2905_v18  ;;  %v2556_v52 = vadd.f32 %v2555_v44, %v2537_v19  ;;  %v2523_v56 = vadd.f32 %v2522_v48, %v2504_v41 }
 0x212   : > { %v4832_v8 = vpop.eup %4831  ;;  %3243 = vst [vmem:[%s5157_s7 + $0x30] sm:$0xff] %v3211_v50  ;;  %v2907_v63 = vadd.f32 %v4830_v7, %v2906_v27  ;;  %v4414_v28 = vmul.f32 -1.442695, %v2556_v52 }
 0x213   : > { %v4834_v59 = vpop.eup %4833  ;;  %v2691_v1 = vadd.f32 1.0, %v4832_v8 }
 0x214   : > { %v2911_v31 = vsel %vm2910_vm7, %v4830_v7, %v2907_v63  ;;  %v3024_v32 = vmul.f32 %v4834_v59, %v2683_v62  ;;  %4835 = vpow2.f32 %v4414_v28  ;;  %vm3029_vm9 = vweird.f32 %v4834_v59 }
 0x215   : > { %v2916_v9 = vsel %vm2913_vm8, %v2915_v15, %v2911_v31  ;;  %4837 = vrcp.f32 %v2691_v1  ;;  %v2538_v35 = vpop.f32.mrf.mxu2  ;;  %vm3030_vm11 = vmor %vm3028_vm10, %vm3029_vm9  ;;  %v2505_v58 = vpop.f32.mrf.mxu0  ;;  %v3152_v10 = vand.u32 2147483647, %v2691_v1  ;;  %v3154_v5 = vand.u32 2147483648, %v2691_v1 }
 0x216   : > { %v3187_v36 = vmax.f32 %v2916_v9, 1e-06  ;;  %v3025_v37 = vsub.f32 1.0, %v3024_v32  ;;  %v2539_v57 = vadd.f32 %v2538_v35, %v2520_v33  ;;  %v2506_v55 = vadd.f32 %v2505_v58, %v5385_v49 }
 0x217   : > { %v2557_v39 = vpop.f32.mrf.mxu3  ;;  %vm3148_vm14 = vweird.f32 %v2691_v1  ;;  %vm3153_vm0 = vcmp.eq.f32.partialorder %v3152_v10, 8.507059e+37  ;;  %v3155_v13 = vor.u32 1.1754944e-38, %v3154_v5  ;;  %v2524_v14 = vpop.f32.mrf.mxu1 }
 0x218   : > { %v3219_v42 = vmin.f32 %v3187_v36, 0.999999  ;;  %v3026_v38 = vmul.f32 %v4834_v59, %v3025_v37  ;;  %v2558_v47 = vadd.f32 %v2557_v39, %v2539_v57  ;;  %v2525_v19 = vadd.f32 %v2524_v14, %v2506_v55 }
 0x21a   : > { %v4836_v43 = vpop.eup %4835  ;;  %3251 = vst [vmem:[%s5157_s7 + $0x70] sm:$0xff] %v3219_v42  ;;  %v3027_v40 = vadd.f32 %v4834_v59, %v3026_v38  ;;  %v4422_v23 = vmul.f32 -1.442695, %v2558_v47 }
 0x21b   : > { %v4838_v51 = vpop.eup %4837  ;;  %v2668_v46 = vadd.f32 1.0, %v4836_v43 }
 0x21c   : > { %v3031_v53 = vsel %vm3030_vm11, %v4834_v59, %v3027_v40  ;;  %v3144_v6 = vmul.f32 %v4838_v51, %v2691_v1  ;;  %4839 = vpow2.f32 %v4422_v23  ;;  %vm3149_vm13 = vweird.f32 %v4838_v51 }
 0x21d   : > { %v3036_v60 = vsel %vm3033_vm12, %v3035_v21, %v3031_v53  ;;  %4841 = vrcp.f32 %v2668_v46  ;;  %v2541_v0 = vpop.f32.mrf.mxu2  ;;  %vm3150_vm15 = vmor %vm3148_vm14, %vm3149_vm13  ;;  %v2807_v61 = vand.u32 2147483647, %v2668_v46  ;;  %v2809_v50 = vand.u32 2147483648, %v2668_v46 }
 0x21e   : > { %v3195_v2 = vmax.f32 %v3036_v60, 1e-06  ;;  %v3145_v3 = vsub.f32 1.0, %v3144_v6  ;;  %v2542_v26 = vadd.f32 %v2541_v0, %v2523_v56  ;;  %vm2803_vm2 = vweird.f32 %v2668_v46 }
 0x21f   : > { %v2560_v22 = vpop.f32.mrf.mxu3  ;;  %v2810_v1 = vor.u32 1.1754944e-38, %v2809_v50  ;;  %vm2808_vm4 = vcmp.eq.f32.partialorder %v2807_v61, 8.507059e+37 }
 0x220   : > { %v3227_v24 = vmin.f32 %v3195_v2, 0.999999  ;;  %v3146_v30 = vmul.f32 %v4838_v51, %v3145_v3  ;;  %v2561_v7 = vadd.f32 %v2560_v22, %v2542_v26 }
 0x222   : > { %v4840_v12 = vpop.eup %4839  ;;  %3259 = vst [vmem:[%s5157_s7 + $0xb0] sm:$0xff] %v3227_v24  ;;  %v3147_v62 = vadd.f32 %v4838_v51, %v3146_v30  ;;  %v4430_v17 = vmul.f32 -1.442695, %v2561_v7 }
 0x223   : > { %v4842_v11 = vpop.eup %4841  ;;  %v2676_v16 = vadd.f32 1.0, %v4840_v12 }
 0x224   : > { %v3151_v45 = vsel %vm3150_vm15, %v4838_v51, %v3147_v62  ;;  %v2799_v18 = vmul.f32 %v4842_v11, %v2668_v46  ;;  %4843 = vpow2.f32 %v4430_v17  ;;  %vm2804_vm1 = vweird.f32 %v4842_v11 }
 0x225   : > { %v3156_v49 = vsel %vm3153_vm0, %v3155_v13, %v3151_v45  ;;  %4845 = vrcp.f32 %v2676_v16  ;;  %v2543_v44 = vpop.f32.mrf.mxu2  ;;  %vm2805_vm3 = vmor %vm2803_vm2, %vm2804_vm1  ;;  %v2929_v37 = vand.u32 2147483648, %v2676_v16  ;;  %v2927_v25 = vand.u32 2147483647, %v2676_v16 }
 0x226   : > { %v3203_v20 = vmax.f32 %v3156_v49, 1e-06  ;;  %v2800_v4 = vsub.f32 1.0, %v2799_v18  ;;  %v2544_v54 = vadd.f32 %v2543_v44, %v2525_v19  ;;  %vm2923_vm6 = vweird.f32 %v2676_v16 }
 0x227   : > { %v2562_v27 = vpop.f32.mrf.mxu3  ;;  %v2930_v38 = vor.u32 1.1754944e-38, %v2929_v37  ;;  %vm2928_vm8 = vcmp.eq.f32.partialorder %v2927_v25, 8.507059e+37 }
 0x228   : > { %v3235_v52 = vmin.f32 %v3203_v20, 0.999999  ;;  %v2801_v8 = vmul.f32 %v4842_v11, %v2800_v4  ;;  %v2563_v63 = vadd.f32 %v2562_v27, %v2544_v54 }
 0x22a   : > { %v4844_v28 = vpop.eup %4843  ;;  %3267 = vst [vmem:[%s5157_s7 + $0xf0] sm:$0xff] %v3235_v52  ;;  %v2802_v29 = vadd.f32 %v4842_v11, %v2801_v8  ;;  %v4438_v59 = vmul.f32 -1.442695, %v2563_v63 }
 0x22b   : > { %v4846_v15 = vpop.eup %4845  ;;  %v2684_v31 = vadd.f32 1.0, %v4844_v28 }
 0x22c   : > { %v2806_v32 = vsel %vm2805_vm3, %v4842_v11, %v2802_v29  ;;  %v2919_v33 = vmul.f32 %v4846_v15, %v2676_v16  ;;  %4847 = vpow2.f32 %v4438_v59  ;;  %vm2924_vm5 = vweird.f32 %v4846_v15 }
 0x22d   : > { %v2811_v9 = vsel %vm2808_vm4, %v2810_v1, %v2806_v32  ;;  %4849 = vrcp.f32 %v2684_v31  ;;  %vm2925_vm7 = vmor %vm2923_vm6, %vm2924_vm5  ;;  %v3049_v21 = vand.u32 2147483648, %v2684_v31  ;;  %v3047_v6 = vand.u32 2147483647, %v2684_v31 }
 0x22e   : > { %v3180_v35 = vmax.f32 %v2811_v9, 1e-06  ;;  %v2920_v36 = vsub.f32 1.0, %v2919_v33  ;;  %vm3043_vm10 = vweird.f32 %v2684_v31 }
 0x22f   : > { %v3050_v60 = vor.u32 1.1754944e-38, %v3049_v21  ;;  %vm3048_vm12 = vcmp.eq.f32.partialorder %v3047_v6, 8.507059e+37 }
 0x230   : > { %v3212_v57 = vmin.f32 %v3180_v35, 0.999999  ;;  %v2921_v39 = vmul.f32 %v4846_v15, %v2920_v36 }
 0x232   : > { %v4848_v34 = vpop.eup %4847  ;;  %3244 = vst [vmem:[%s5157_s7 + $0x38] sm:$0xff] %v3212_v57  ;;  %v2922_v41 = vadd.f32 %v4846_v15, %v2921_v39 }
 0x233   : > { %v4850_v42 = vpop.eup %4849  ;;  %v2692_v47 = vadd.f32 1.0, %v4848_v34 }
 0x234   : > { %v2926_v48 = vsel %vm2925_vm7, %v4846_v15, %v2922_v41  ;;  %v3039_v43 = vmul.f32 %v4850_v42, %v2684_v31  ;;  %vm3044_vm9 = vweird.f32 %v4850_v42 }
 0x235   : > { %v2931_v40 = vsel %vm2928_vm8, %v2930_v38, %v2926_v48  ;;  %4851 = vrcp.f32 %v2692_v47  ;;  %vm3045_vm11 = vmor %vm3043_vm10, %vm3044_vm9  ;;  %v3169_v10 = vand.u32 2147483648, %v2692_v47  ;;  %v3167_v24 = vand.u32 2147483647, %v2692_v47 }
 0x236   : > { %v3188_v23 = vmax.f32 %v2931_v40, 1e-06  ;;  %v3040_v51 = vsub.f32 1.0, %v3039_v43  ;;  %vm3163_vm14 = vweird.f32 %v2692_v47 }
 0x237   : > { %v3170_v7 = vor.u32 1.1754944e-38, %v3169_v10  ;;  %vm3168_vm0 = vcmp.eq.f32.partialorder %v3167_v24, 8.507059e+37 }
 0x238   : > { %v3220_v46 = vmin.f32 %v3188_v23, 0.999999  ;;  %v3041_v53 = vmul.f32 %v4850_v42, %v3040_v51 }
 0x23a   : > { %3252 = vst [vmem:[%s5157_s7 + $0x78] sm:$0xff] %v3220_v46  ;;  %v3042_v56 = vadd.f32 %v4850_v42, %v3041_v53 }
 0x23b   : > { %v4852_v58 = vpop.eup %4851 }
 0x23c   : > { %v3046_v0 = vsel %vm3045_vm11, %v4850_v42, %v3042_v56  ;;  %v3159_v2 = vmul.f32 %v4852_v58, %v2692_v47  ;;  %vm3164_vm13 = vweird.f32 %v4852_v58 }
 0x23d   : > { %v3051_v3 = vsel %vm3048_vm12, %v3050_v60, %v3046_v0  ;;  %vm3165_vm15 = vmor %vm3163_vm14, %vm3164_vm13 }
 0x23e   : > { %v3196_v26 = vmax.f32 %v3051_v3, 1e-06  ;;  %v3160_v22 = vsub.f32 1.0, %v3159_v2 }
 0x240   : > { %v3228_v5 = vmin.f32 %v3196_v26, 0.999999  ;;  %v3161_v55 = vmul.f32 %v4852_v58, %v3160_v22 }
 0x242   : > { %3260 = vst [vmem:[%s5157_s7 + $0xb8] sm:$0xff] %v3228_v5  ;;  %v3162_v30 = vadd.f32 %v4852_v58, %v3161_v55 }
 0x244   : > { %v3166_v12 = vsel %vm3165_vm15, %v4852_v58, %v3162_v30 }
 0x245   : > { %v3171_v62 = vsel %vm3168_vm0, %v3170_v7, %v3166_v12 }
 0x246   : > { %v3204_v17 = vmax.f32 %v3171_v62, 1e-06 }
 0x248   : > { %v3236_v11 = vmin.f32 %v3204_v17, 0.999999 }
 0x24a   : > { %3268 = vst [vmem:[%s5157_s7 + $0xf8] sm:$0xff] %v3236_v11 }
 0x24b PF: > { %s16_s18 = sadd.s32 1, %s4894_s18  }
 0x24c   : > { %p13_p7 = scmp.ge.s32.totalorder %s16_s18, 4  }
 0x24e   :  { %15 = sbr.rel (!%p13_p7) target bundleno = 1 (0x1), region = 75 }
 0x253   :  { %3293 = vsyncpa [#allocation3], 1 }
 0x254   :  { %3295 = vsyncpa [#allocation3 + $0x1], 1 }

</bundles_post_ra>
